<compile_context>
chip_gen: v7x
topology: tpu7x:2x2x1
jax: 0.10.0
libtpu: 0.0.40
codegen_flags: <defaults>
</compile_context>

<pallas_src>
import functools
import math

import jax
import jax.numpy as jnp
from jax import lax
from jax.experimental import pallas as pl
from jax.experimental.pallas import tpu as pltpu

LN_EPS = 1e-5
VMEM_LIMIT = 48 * 1024 * 1024     # leave headroom under v7x's 64 MiB per-TC VMEM


def _round_up(x, m):
    return ((x + m - 1) // m) * m


def _pick_row_tile(m, cap=512):
    """Largest row tile <= cap dividing m (avoids activation zero-pad copies)."""
    if m <= cap:
        return m
    for cand in (512, 256, 128, 64, 32, 16, 8):
        if cand <= cap and m % cand == 0:
            return cand
    return m   # fallback: single tile (correct; only hit for awkward odd M)


def _pick_q_tile(t):
    """Query-tile size for the attention grid: divides T, <= 256."""
    if t <= 256:
        return t
    for cand in (256, 128, 64, 32, 16, 8):
        if t % cand == 0:
            return cand
    return t


# ----------------------------------------------------------------------------
# Tiled linear:  y = act(x @ w + b)   (K kept whole -> no reduction grid axis)
# ----------------------------------------------------------------------------
def _linear_kernel(x_ref, w_ref, b_ref, o_ref, *, activation):
    y = jnp.dot(x_ref[...].astype(jnp.bfloat16), w_ref[...],
                preferred_element_type=jnp.float32) + b_ref[...]
    if activation == "relu":
        y = jnp.maximum(y, 0.0)
    o_ref[...] = y


def prep_linear_weights(w, b=None):
    """One-time prep: bf16 cast + lane-pad N to a multiple of 128."""
    K, N = w.shape
    Np = _round_up(N, 128)
    wp = jnp.zeros((K, Np), jnp.bfloat16).at[:, :N].set(w.astype(jnp.bfloat16))
    bias = jnp.zeros((N,), jnp.float32) if b is None else b.astype(jnp.float32)
    bp = jnp.zeros((1, Np), jnp.float32).at[0, :N].set(bias)
    return wp, bp


def pallas_linear(x, w_p, b_p, n_out, activation=None):
    """x: (M, K) f32, w_p: (K, Np) bf16 pre-padded, b_p: (1, Np) -> (M, n_out)."""
    M, K = x.shape
    Np = w_p.shape[1]
    tm = _pick_row_tile(M)
    tn = Np
    if Np > 512:
        for cand in (512, 256, 128):
            if Np % cand == 0:
                tn = cand
                break
    kernel = functools.partial(_linear_kernel, activation=activation)
    out = pl.pallas_call(
        kernel,
        out_shape=jax.ShapeDtypeStruct((M, Np), jnp.float32),
        grid=(M // tm, Np // tn),
        in_specs=[
            pl.BlockSpec((tm, K), lambda i, j: (i, 0)),
            pl.BlockSpec((K, tn), lambda i, j: (0, j)),
            pl.BlockSpec((1, tn), lambda i, j: (0, j)),
        ],
        out_specs=pl.BlockSpec((tm, tn), lambda i, j: (i, j)),
        compiler_params=pltpu.CompilerParams(
            dimension_semantics=("parallel", "parallel"),
            vmem_limit_bytes=VMEM_LIMIT),
    )(x, w_p, b_p)
    return out if Np == n_out else out[:, :n_out]


# ----------------------------------------------------------------------------
# Fused attention block (q-tiled):  LN1( x(+seg) + OutProj(MHA(x(+seg))) )
# ----------------------------------------------------------------------------
def _attn_block_kernel(*refs, n_head, scale, causal, with_seg, tq):
    if with_seg:
        (x_ref, seg_ref, wq_ref, wkv_ref, bq_ref, bkv_ref,
         ow_ref, ob_ref, g_ref, beta_ref, o_ref, hs_ref) = refs
    else:
        (x_ref, wq_ref, wkv_ref, bq_ref, bkv_ref,
         ow_ref, ob_ref, g_ref, beta_ref, o_ref, hs_ref) = refs
        seg_ref = None

    T = x_ref.shape[1]
    E = x_ref.shape[2]
    Dh = E // n_head

    q_off = pl.program_id(1) * tq
    if tq % 8 == 0:
        q_off = pl.multiple_of(q_off, tq)

    # Conditioned input (x + seg): full sequence for K/V, q tile for Q/residual.
    x_full = x_ref[0]
    if with_seg:
        x_full = x_full + seg_ref[0]
    if tq == T:
        x_q = x_full
    else:
        x_q = x_ref[0, pl.ds(q_off, tq), :]
        if with_seg:
            x_q = x_q + seg_ref[0, pl.ds(q_off, tq), :]

    # Projections: bf16 MXU operands, f32 accumulation; scale folded into q;
    # single bf16 cast of k/v before the head loop.
    q = jnp.dot(x_q.astype(jnp.bfloat16), wq_ref[...],
                preferred_element_type=jnp.float32) + bq_ref[...]
    qb = (q * scale).astype(jnp.bfloat16)
    kv = jnp.dot(x_full.astype(jnp.bfloat16), wkv_ref[...],
                 preferred_element_type=jnp.float32) + bkv_ref[...]
    kvb = kv.astype(jnp.bfloat16)

    if causal:
        row = q_off + lax.broadcasted_iota(jnp.int32, (tq, T), 0)
        col = lax.broadcasted_iota(jnp.int32, (tq, T), 1)
        mask_bias = jnp.where(col <= row, 0.0, -1e30)

    # TODO(synk): for very long T switch to a kv-tiled online softmax with
    # pl.when causal tile skipping and lane-aligned (Dh padded to 128) heads.
    for h in range(n_head):
        q_h = qb[:, h * Dh:(h + 1) * Dh]
        k_h = kvb[:, h * Dh:(h + 1) * Dh]
        v_h = kvb[:, E + h * Dh:E + (h + 1) * Dh]
        s = lax.dot_general(q_h, k_h, (((1,), (1,)), ((), ())),
                            preferred_element_type=jnp.float32)      # (tq, T)
        if causal:
            s = s + mask_bias
        m = jnp.max(s, axis=-1, keepdims=True)
        p = jnp.exp(s - m)
        p = p * pl.reciprocal(jnp.sum(p, axis=-1, keepdims=True), approx=True)
        o_h = jnp.dot(p.astype(jnp.bfloat16), v_h,
                      preferred_element_type=jnp.float32)             # (tq, Dh)
        hs_ref[:, h * Dh:(h + 1) * Dh] = o_h.astype(jnp.bfloat16)

    # Single full-E-contraction output projection (fills the MXU depth).
    attn = jnp.dot(hs_ref[...], ow_ref[...],
                   preferred_element_type=jnp.float32) + ob_ref[...]
    h1 = x_q + attn
    mean = jnp.mean(h1, axis=-1, keepdims=True)
    var = jnp.mean(jnp.square(h1 - mean), axis=-1, keepdims=True)
    o_ref[0] = (h1 - mean) * lax.rsqrt(var + LN_EPS) * g_ref[...] + beta_ref[...]


def fused_attention_block(x, lp, n_head, seg=None, causal=False):
    """x: (B, T, E) f32; optional seg: (B, T, E). Returns (B, T, E)."""
    B, T, E = x.shape
    scale = 1.0 / math.sqrt(E // n_head)
    with_seg = seg is not None
    tq = _pick_q_tile(T)
    kernel = functools.partial(_attn_block_kernel, n_head=n_head, scale=scale,
                               causal=causal, with_seg=with_seg, tq=tq)

    args = [x]
    in_specs = [pl.BlockSpec((1, T, E), lambda b, q: (b, 0, 0))]
    if with_seg:
        args.append(seg)
        in_specs.append(pl.BlockSpec((1, T, E), lambda b, q: (b, 0, 0)))
    args += [lp["wq"], lp["wkv"], lp["bq"], lp["bkv"],
             lp["ow"], lp["ob"], lp["ln1_g"], lp["ln1_b"]]
    in_specs += [
        pl.BlockSpec((E, E), lambda b, q: (0, 0)),
        pl.BlockSpec((E, 2 * E), lambda b, q: (0, 0)),
        pl.BlockSpec((1, E), lambda b, q: (0, 0)),
        pl.BlockSpec((1, 2 * E), lambda b, q: (0, 0)),
        pl.BlockSpec((E, E), lambda b, q: (0, 0)),
        pl.BlockSpec((1, E), lambda b, q: (0, 0)),
        pl.BlockSpec((1, E), lambda b, q: (0, 0)),
        pl.BlockSpec((1, E), lambda b, q: (0, 0)),
    ]
    return pl.pallas_call(
        kernel,
        out_shape=jax.ShapeDtypeStruct((B, T, E), jnp.float32),
        grid=(B, T // tq),
        in_specs=in_specs,
        out_specs=pl.BlockSpec((1, tq, E), lambda b, q: (b, q, 0)),
        scratch_shapes=[pltpu.VMEM((tq, E), jnp.bfloat16)],
        compiler_params=pltpu.CompilerParams(
            dimension_semantics=("parallel", "parallel"),
            vmem_limit_bytes=VMEM_LIMIT),
    )(*args)


# ----------------------------------------------------------------------------
# Fused MLP block:  LN2( h + FF2(ReLU(FF1(h))) )
# ----------------------------------------------------------------------------
def _mlp_block_kernel(x_ref, w1_ref, b1_ref, w2_ref, b2_ref, g_ref, beta_ref,
                      o_ref):
    x = x_ref[...]                                        # (tm, E) f32
    h = jnp.dot(x.astype(jnp.bfloat16), w1_ref[...],
                preferred_element_type=jnp.float32) + b1_ref[...]
    h = jnp.maximum(h, 0.0)
    y = jnp.dot(h.astype(jnp.bfloat16), w2_ref[...],
                preferred_element_type=jnp.float32) + b2_ref[...]
    r = x + y
    mean = jnp.mean(r, axis=-1, keepdims=True)
    var = jnp.mean(jnp.square(r - mean), axis=-1, keepdims=True)
    o_ref[...] = (r - mean) * lax.rsqrt(var + LN_EPS) * g_ref[...] + beta_ref[...]


def fused_mlp_block(x, lp):
    """x: (M, E) f32 slab -> (M, E). Row tile divides M (no pad copy)."""
    M, E = x.shape
    d_ff = lp["ff1_w"].shape[1]
    tm = _pick_row_tile(M, cap=512)
    return pl.pallas_call(
        _mlp_block_kernel,
        out_shape=jax.ShapeDtypeStruct((M, E), jnp.float32),
        grid=(M // tm,),
        in_specs=[
            pl.BlockSpec((tm, E), lambda i: (i, 0)),
            pl.BlockSpec((E, d_ff), lambda i: (0, 0)),
            pl.BlockSpec((1, d_ff), lambda i: (0, 0)),
            pl.BlockSpec((d_ff, E), lambda i: (0, 0)),
            pl.BlockSpec((1, E), lambda i: (0, 0)),
            pl.BlockSpec((1, E), lambda i: (0, 0)),
            pl.BlockSpec((1, E), lambda i: (0, 0)),
        ],
        out_specs=pl.BlockSpec((tm, E), lambda i: (i, 0)),
        compiler_params=pltpu.CompilerParams(
            dimension_semantics=("parallel",),
            vmem_limit_bytes=VMEM_LIMIT),
    )(x, lp["ff1_w"], lp["ff1_b"], lp["ff2_w"], lp["ff2_b"],
      lp["ln2_g"], lp["ln2_b"])


# ----------------------------------------------------------------------------
# Transformer building blocks (batch-first layout: (B, T, E))
# ----------------------------------------------------------------------------
def transformer_layer(x, lp, n_head, causal, seg=None):
    """nn.TransformerEncoderLayer (post-norm, relu, dropout=identity)."""
    B, T, E = x.shape
    h1 = fused_attention_block(x, lp, n_head, seg=seg, causal=causal)
    h2 = fused_mlp_block(h1.reshape(B * T, E), lp)
    return h2.reshape(B, T, E)


def build_dec_seg_emb(vae_latent_r, bar_pos, dec_len):
    """Replicates the per-bar (st, ed) scatter loop; returns (B, T, L)."""
    B, n_bars, L = vae_latent_r.shape
    t = jnp.arange(dec_len)

    def per_batch(bp, lat):
        idx = jnp.searchsorted(bp, t, side="right") - 1     # (T,)
        valid = (idx >= 0) & (idx < n_bars)
        idx_c = jnp.clip(idx, 0, n_bars - 1)
        seg = lat[idx_c]                                     # (T, L)
        return jnp.where(valid[:, None], seg, 0.0)

    return jax.vmap(per_batch)(bar_pos, vae_latent_r)        # (B, T, L)


# ----------------------------------------------------------------------------
# Parameters, one-time prep, and top-level forward
# ----------------------------------------------------------------------------
def make_positional_encoding(d_embed, max_pos=512):
    pos = jnp.arange(max_pos, dtype=jnp.float32)[:, None]
    div = jnp.exp(jnp.arange(0, d_embed, 2, dtype=jnp.float32)
                  * (-math.log(10000.0) / d_embed))
    pe = jnp.zeros((max_pos, d_embed), jnp.float32)
    pe = pe.at[:, 0::2].set(jnp.sin(pos * div))
    pe = pe.at[:, 1::2].set(jnp.cos(pos * div))
    return pe


def init_params(key, cfg):
    E = cfg["d_model"]
    keys = iter(jax.random.split(key, 256))

    def nrm(shape, scale=0.02):
        return jax.random.normal(next(keys), shape, jnp.float32) * scale

    def layer_params(d_ff):
        return dict(
            in_w=nrm((E, 3 * E)), in_b=jnp.zeros((3 * E,), jnp.float32),
            out_w=nrm((E, E)), out_b=jnp.zeros((E,), jnp.float32),
            ln1_g=jnp.ones((E,), jnp.float32), ln1_b=jnp.zeros((E,), jnp.float32),
            ln2_g=jnp.ones((E,), jnp.float32), ln2_b=jnp.zeros((E,), jnp.float32),
            ff1_w=nrm((E, d_ff)), ff1_b=jnp.zeros((d_ff,), jnp.float32),
            ff2_w=nrm((d_ff, E)), ff2_b=jnp.zeros((E,), jnp.float32),
        )

    return dict(
        tok_emb=nrm((cfg["n_token"], cfg["d_embed"])),
        composer_emb=nrm((cfg["n_composer_cls"], cfg["d_composer_emb"])),
        pe=make_positional_encoding(cfg["d_embed"]),
        encoder=dict(
            layers=[layer_params(cfg["enc_d_ff"]) for _ in range(cfg["enc_n_layer"])],
            mu_w=nrm((E, cfg["d_vae_latent"])),
            mu_b=jnp.zeros((cfg["d_vae_latent"],), jnp.float32),
            lv_w=nrm((E, cfg["d_vae_latent"])),
            lv_b=jnp.zeros((cfg["d_vae_latent"],), jnp.float32),
        ),
        decoder=dict(
            seg_w=nrm((cfg["d_vae_latent"] + cfg["d_composer_emb"], E)),
            layers=[layer_params(cfg["dec_d_ff"]) for _ in range(cfg["dec_n_layer"])],
        ),
        out_w=nrm((E, cfg["n_token"])),
        out_b=jnp.zeros((cfg["n_token"],), jnp.float32),
    )


def prepare_params(params, cfg):
    """One-time weight prep: bf16 casts, QKV split, bias/LN reshape, lane-pad."""
    E = cfg["d_model"]

    def prep_layer(lp):
        return dict(
            wq=lp["in_w"][:, :E].astype(jnp.bfloat16),
            wkv=lp["in_w"][:, E:].astype(jnp.bfloat16),
            bq=lp["in_b"][:E].reshape(1, E).astype(jnp.float32),
            bkv=lp["in_b"][E:].reshape(1, 2 * E).astype(jnp.float32),
            ow=lp["out_w"].astype(jnp.bfloat16),
            ob=lp["out_b"].reshape(1, E).astype(jnp.float32),
            ln1_g=lp["ln1_g"].reshape(1, E), ln1_b=lp["ln1_b"].reshape(1, E),
            ln2_g=lp["ln2_g"].reshape(1, E), ln2_b=lp["ln2_b"].reshape(1, E),
            ff1_w=lp["ff1_w"].astype(jnp.bfloat16),
            ff1_b=lp["ff1_b"].reshape(1, -1).astype(jnp.float32),
            ff2_w=lp["ff2_w"].astype(jnp.bfloat16),
            ff2_b=lp["ff2_b"].reshape(1, E).astype(jnp.float32),
        )

    enc, dec = params["encoder"], params["decoder"]
    # Fuse mu & logvar projections into a single (E, 2L) matmul.
    mulv_w, mulv_b = prep_linear_weights(
        jnp.concatenate([enc["mu_w"], enc["lv_w"]], axis=1),
        jnp.concatenate([enc["mu_b"], enc["lv_b"]], axis=0))
    seg_w, seg_b = prep_linear_weights(dec["seg_w"], None)       # bias-free
    out_w, out_b = prep_linear_weights(params["out_w"], params["out_b"])

    return dict(
        tok_emb=params["tok_emb"], composer_emb=params["composer_emb"],
        pe=params["pe"],
        enc_layers=[prep_layer(lp) for lp in enc["layers"]],
        mulv_w=mulv_w, mulv_b=mulv_b,
        dec_layers=[prep_layer(lp) for lp in dec["layers"]],
        seg_w=seg_w, seg_b=seg_b,
        out_w=out_w, out_b=out_b,
    )


def musemorphose_forward(prepped, enc_inp, dec_inp, dec_inp_bar_pos,
                         composer_cls, eps_key, cfg):
    """Returns (mu, logvar, dec_logits), matching MuseMorphose.forward."""
    T_enc, B, n_bars = enc_inp.shape
    T_dec = dec_inp.shape[0]
    E = cfg["d_model"]
    L = cfg["d_vae_latent"]
    emb_scale = math.sqrt(E)                               # TokenEmbedding scale
    pe = prepped["pe"]

    # token embeddings (gather = glue) + positional encoding; emb_dropout = id.
    # Internal layout is batch-first: encoder batch = B * n_bars (B-major).
    enc_idx = enc_inp.transpose(1, 2, 0).reshape(B * n_bars, T_enc)
    enc_x = jnp.take(prepped["tok_emb"], enc_idx, axis=0) * emb_scale \
        + pe[None, :T_enc, :]
    dec_x = jnp.take(prepped["tok_emb"], dec_inp.T, axis=0) * emb_scale \
        + pe[None, :T_dec, :]

    # ---------------- encoder -> mu, logvar (fused projection) --------------
    out = enc_x
    for i in range(cfg["enc_n_layer"]):
        out = transformer_layer(out, prepped["enc_layers"][i],
                                cfg["enc_n_head"], causal=False)
    hidden = out[:, 0, :]                                  # (B*n_bars, E)
    mulv = pallas_linear(hidden, prepped["mulv_w"], prepped["mulv_b"], 2 * L)
    mu, logvar = mulv[:, :L], mulv[:, L:]

    # reparameterize (trivial elementwise -> left to XLA fusion)
    eps = jax.random.normal(eps_key, mu.shape, jnp.float32)
    vae_latent = eps * jnp.exp(0.5 * logvar) + mu          # (B*n_bars, L)
    vae_latent_r = vae_latent.reshape(B, n_bars, L)

    # segment embeddings per bar span, batch-first (B, T, L)
    dec_seg_emb = build_dec_seg_emb(vae_latent_r, dec_inp_bar_pos, T_dec)

    # composer attribute embedding + concat
    comp_emb = (jnp.take(prepped["composer_emb"], composer_cls.T, axis=0)
                * math.sqrt(cfg["d_composer_emb"]))        # (B, T, d_comp)
    dec_seg_emb_cat = jnp.concatenate([dec_seg_emb, comp_emb], axis=-1)

    # ---------------- decoder (in-attn conditioning, causal) ----------------
    seg = pallas_linear(dec_seg_emb_cat.reshape(B * T_dec, -1),
                        prepped["seg_w"], prepped["seg_b"], E
                        ).reshape(B, T_dec, E)
    out = dec_x
    for i in range(cfg["dec_n_layer"]):
        out = transformer_layer(out, prepped["dec_layers"][i],
                                cfg["dec_n_head"], causal=True, seg=seg)

    # output projection (lane-dense padded N, no reduction grid axis)
    logits = pallas_linear(out.reshape(B * T_dec, E),
                           prepped["out_w"], prepped["out_b"], cfg["n_token"])
    logits = logits.reshape(B, T_dec, cfg["n_token"]).transpose(1, 0, 2)
    return mu, logvar, logits


# ----------------------------------------------------------------------------
if __name__ == "__main__":
    # TODO(synk): dropout layers are identity (eval mode); the compound=True
    # token-embedding path is not exercised (compound=False); residual stream
    # kept f32 in HBM (bf16 option not adopted — numerics-affecting).
    cfg = dict(
        enc_n_layer=2, enc_n_head=4, enc_d_ff=64,
        dec_n_layer=2, dec_n_head=4, dec_d_ff=64,
        d_model=32, d_embed=32,
        d_vae_latent=16, n_token=40,
        d_composer_emb=32, n_composer_cls=13,
    )

    root = jax.random.PRNGKey(0)
    k_params, k_enc, k_dec, k_cls, k_eps = jax.random.split(root, 5)
    params = init_params(k_params, cfg)
    prepped = prepare_params(params, cfg)      # one-time bf16 cast / pad / split

    T_enc, B, n_bars, T_dec = 8, 2, 2, 12
    enc_inp = jax.random.randint(k_enc, (T_enc, B, n_bars), 0, cfg["n_token"],
                                 dtype=jnp.int32)
    dec_inp = jax.random.randint(k_dec, (T_dec, B), 0, cfg["n_token"],
                                 dtype=jnp.int32)
    dec_inp_bar_pos = jnp.array([[0, 6, 12], [0, 5, 12]], dtype=jnp.int32)
    composer_cls = jax.random.randint(k_cls, (T_dec, B), 0,
                                      cfg["n_composer_cls"], dtype=jnp.int32)

    fwd = jax.jit(functools.partial(musemorphose_forward, cfg=cfg))
    mu, logvar, dec_logits = fwd(prepped, enc_inp, dec_inp, dec_inp_bar_pos,
                                 composer_cls, k_eps)

    jax.block_until_ready((mu, logvar, dec_logits))
    assert mu.shape == (B * n_bars, cfg["d_vae_latent"])
    assert logvar.shape == (B * n_bars, cfg["d_vae_latent"])
    assert dec_logits.shape == (T_dec, B, cfg["n_token"])
    print("KERNEL_OK")
</pallas_src>

<mosaic_0001>
module attributes {stable_mosaic.version = 11 : i64} {
  func.func @_attn_block_kernel(%arg0: i32, %arg1: i32, %arg2: memref<1x8x32xf32, #tpu.memory_space<vmem>>, %arg3: memref<32x32xbf16, #tpu.memory_space<vmem>>, %arg4: memref<32x64xbf16, #tpu.memory_space<vmem>>, %arg5: memref<1x32xf32, #tpu.memory_space<vmem>>, %arg6: memref<1x64xf32, #tpu.memory_space<vmem>>, %arg7: memref<32x32xbf16, #tpu.memory_space<vmem>>, %arg8: memref<1x32xf32, #tpu.memory_space<vmem>>, %arg9: memref<1x32xf32, #tpu.memory_space<vmem>>, %arg10: memref<1x32xf32, #tpu.memory_space<vmem>>, %arg11: memref<1x8x32xf32, #tpu.memory_space<vmem>>, %arg12: memref<8x32xbf16, #tpu.memory_space<vmem>>) attributes {dimension_semantics = [#tpu.dimension_semantics<parallel>, #tpu.dimension_semantics<parallel>], iteration_bounds = array<i64: 4, 1>, scalar_prefetch = 0 : i64, scratch_operands = 1 : i64, tpu.core_type = #tpu.core_type<tc>, window_params = [{transform_indices = @transform_0, window_bounds = array<i64: 1, 8, 32>}, {pipeline_mode = #tpu.pipeline_mode<synchronous>, transform_indices = @transform_1, window_bounds = array<i64: 32, 32>}, {pipeline_mode = #tpu.pipeline_mode<synchronous>, transform_indices = @transform_2, window_bounds = array<i64: 32, 64>}, {pipeline_mode = #tpu.pipeline_mode<synchronous>, transform_indices = @transform_3, window_bounds = array<i64: 1, 32>}, {pipeline_mode = #tpu.pipeline_mode<synchronous>, transform_indices = @transform_4, window_bounds = array<i64: 1, 64>}, {pipeline_mode = #tpu.pipeline_mode<synchronous>, transform_indices = @transform_5, window_bounds = array<i64: 32, 32>}, {pipeline_mode = #tpu.pipeline_mode<synchronous>, transform_indices = @transform_6, window_bounds = array<i64: 1, 32>}, {pipeline_mode = #tpu.pipeline_mode<synchronous>, transform_indices = @transform_7, window_bounds = array<i64: 1, 32>}, {pipeline_mode = #tpu.pipeline_mode<synchronous>, transform_indices = @transform_8, window_bounds = array<i64: 1, 32>}, {transform_indices = @transform_9, window_bounds = array<i64: 1, 8, 32>}]} {
    %c0 = arith.constant 0 : index
    %c0_0 = arith.constant 0 : index
    %c0_1 = arith.constant 0 : index
    %0 = vector.load %arg2[%c0, %c0_0, %c0_1] : memref<1x8x32xf32, #tpu.memory_space<vmem>>, vector<1x8x32xf32>
    %1 = vector.shape_cast %0 : vector<1x8x32xf32> to vector<8x32xf32>
    %2 = arith.truncf %1 : vector<8x32xf32> to vector<8x32xbf16>
    %c0_2 = arith.constant 0 : index
    %c0_3 = arith.constant 0 : index
    %3 = vector.load %arg3[%c0_2, %c0_3] : memref<32x32xbf16, #tpu.memory_space<vmem>>, vector<32x32xbf16>
    %cst = arith.constant dense<0.000000e+00> : vector<8x32xf32>
    %4 = tpu.matmul %2, %3, %cst {dimension_numbers = #tpu.dot_dimension_numbers<[1], [0], [0], [1], [0, 0, 1, 1], [], []>} : vector<8x32xbf16>, vector<32x32xbf16>, vector<8x32xf32> -> vector<8x32xf32>
    %c0_4 = arith.constant 0 : index
    %c0_5 = arith.constant 0 : index
    %5 = vector.load %arg5[%c0_4, %c0_5] : memref<1x32xf32, #tpu.memory_space<vmem>>, vector<1x32xf32>
    %6 = vector.broadcast %5 : vector<1x32xf32> to vector<8x32xf32>
    %7 = arith.addf %4, %6 : vector<8x32xf32>
    %cst_6 = arith.constant 0.353553385 : f32
    %8 = vector.broadcast %cst_6 : f32 to vector<8x32xf32>
    %9 = arith.mulf %7, %8 : vector<8x32xf32>
    %10 = arith.truncf %9 : vector<8x32xf32> to vector<8x32xbf16>
    %11 = arith.truncf %1 : vector<8x32xf32> to vector<8x32xbf16>
    %c0_7 = arith.constant 0 : index
    %c0_8 = arith.constant 0 : index
    %12 = vector.load %arg4[%c0_7, %c0_8] : memref<32x64xbf16, #tpu.memory_space<vmem>>, vector<32x64xbf16>
    %cst_9 = arith.constant dense<0.000000e+00> : vector<8x64xf32>
    %13 = tpu.matmul %11, %12, %cst_9 {dimension_numbers = #tpu.dot_dimension_numbers<[1], [0], [0], [1], [0, 0, 1, 1], [], []>} : vector<8x32xbf16>, vector<32x64xbf16>, vector<8x64xf32> -> vector<8x64xf32>
    %c0_10 = arith.constant 0 : index
    %c0_11 = arith.constant 0 : index
    %14 = vector.load %arg6[%c0_10, %c0_11] : memref<1x64xf32, #tpu.memory_space<vmem>>, vector<1x64xf32>
    %15 = vector.broadcast %14 : vector<1x64xf32> to vector<8x64xf32>
    %16 = arith.addf %13, %15 : vector<8x64xf32>
    %17 = arith.truncf %16 : vector<8x64xf32> to vector<8x64xbf16>
    %18 = vector.extract_strided_slice %10 {offsets = [0, 0], sizes = [8, 8], strides = [1, 1]} : vector<8x32xbf16> to vector<8x8xbf16>
    %19 = vector.extract_strided_slice %17 {offsets = [0, 0], sizes = [8, 8], strides = [1, 1]} : vector<8x64xbf16> to vector<8x8xbf16>
    %20 = vector.extract_strided_slice %17 {offsets = [0, 32], sizes = [8, 8], strides = [1, 1]} : vector<8x64xbf16> to vector<8x8xbf16>
    %cst_12 = arith.constant dense<0.000000e+00> : vector<8x8xf32>
    %21 = tpu.matmul %18, %19, %cst_12 {dimension_numbers = #tpu.dot_dimension_numbers<[1], [1], [0], [0], [0, 0, 1, 0], [], []>} : vector<8x8xbf16>, vector<8x8xbf16>, vector<8x8xf32> -> vector<8x8xf32>
    %cst_13 = arith.constant dense<0xFF800000> : vector<8xf32>
    %22 = vector.multi_reduction <maximumf>, %21, %cst_13 [1] : vector<8x8xf32> to vector<8xf32>
    %23 = vector.shape_cast %22 : vector<8xf32> to vector<8x1xf32>
    %24 = vector.broadcast %23 : vector<8x1xf32> to vector<8x8xf32>
    %25 = arith.subf %21, %24 : vector<8x8xf32>
    %26 = math.exp %25 : vector<8x8xf32>
    %cst_14 = arith.constant dense<0.000000e+00> : vector<8xf32>
    %27 = vector.multi_reduction <add>, %26, %cst_14 [1] : vector<8x8xf32> to vector<8xf32>
    %28 = vector.shape_cast %27 : vector<8xf32> to vector<8x1xf32>
    %29 = tpu.reciprocal %28 {approx = true} : vector<8x1xf32> -> vector<8x1xf32>
    %30 = vector.broadcast %29 : vector<8x1xf32> to vector<8x8xf32>
    %31 = arith.mulf %26, %30 : vector<8x8xf32>
    %32 = arith.truncf %31 : vector<8x8xf32> to vector<8x8xbf16>
    %cst_15 = arith.constant dense<0.000000e+00> : vector<8x8xf32>
    %33 = tpu.matmul %32, %20, %cst_15 {dimension_numbers = #tpu.dot_dimension_numbers<[1], [0], [0], [1], [0, 0, 1, 1], [], []>} : vector<8x8xbf16>, vector<8x8xbf16>, vector<8x8xf32> -> vector<8x8xf32>
    %34 = arith.truncf %33 : vector<8x8xf32> to vector<8x8xbf16>
    %c0_16 = arith.constant 0 : index
    %c0_17 = arith.constant 0 : index
    %35 = vector.load %arg12[%c0_16, %c0_17] : memref<8x32xbf16, #tpu.memory_space<vmem>>, vector<8x8xbf16>
    tpu.vector_store %arg12[%c0_16, %c0_17], %34 {strides = array<i32>} : memref<8x32xbf16, #tpu.memory_space<vmem>>, vector<8x8xbf16>,
    %36 = vector.extract_strided_slice %10 {offsets = [0, 8], sizes = [8, 8], strides = [1, 1]} : vector<8x32xbf16> to vector<8x8xbf16>
    %37 = vector.extract_strided_slice %17 {offsets = [0, 8], sizes = [8, 8], strides = [1, 1]} : vector<8x64xbf16> to vector<8x8xbf16>
    %38 = vector.extract_strided_slice %17 {offsets = [0, 40], sizes = [8, 8], strides = [1, 1]} : vector<8x64xbf16> to vector<8x8xbf16>
    %cst_18 = arith.constant dense<0.000000e+00> : vector<8x8xf32>
    %39 = tpu.matmul %36, %37, %cst_18 {dimension_numbers = #tpu.dot_dimension_numbers<[1], [1], [0], [0], [0, 0, 1, 0], [], []>} : vector<8x8xbf16>, vector<8x8xbf16>, vector<8x8xf32> -> vector<8x8xf32>
    %cst_19 = arith.constant dense<0xFF800000> : vector<8xf32>
    %40 = vector.multi_reduction <maximumf>, %39, %cst_19 [1] : vector<8x8xf32> to vector<8xf32>
    %41 = vector.shape_cast %40 : vector<8xf32> to vector<8x1xf32>
    %42 = vector.broadcast %41 : vector<8x1xf32> to vector<8x8xf32>
    %43 = arith.subf %39, %42 : vector<8x8xf32>
    %44 = math.exp %43 : vector<8x8xf32>
    %cst_20 = arith.constant dense<0.000000e+00> : vector<8xf32>
    %45 = vector.multi_reduction <add>, %44, %cst_20 [1] : vector<8x8xf32> to vector<8xf32>
    %46 = vector.shape_cast %45 : vector<8xf32> to vector<8x1xf32>
    %47 = tpu.reciprocal %46 {approx = true} : vector<8x1xf32> -> vector<8x1xf32>
    %48 = vector.broadcast %47 : vector<8x1xf32> to vector<8x8xf32>
    %49 = arith.mulf %44, %48 : vector<8x8xf32>
    %50 = arith.truncf %49 : vector<8x8xf32> to vector<8x8xbf16>
    %cst_21 = arith.constant dense<0.000000e+00> : vector<8x8xf32>
    %51 = tpu.matmul %50, %38, %cst_21 {dimension_numbers = #tpu.dot_dimension_numbers<[1], [0], [0], [1], [0, 0, 1, 1], [], []>} : vector<8x8xbf16>, vector<8x8xbf16>, vector<8x8xf32> -> vector<8x8xf32>
    %52 = arith.truncf %51 : vector<8x8xf32> to vector<8x8xbf16>
    %c0_22 = arith.constant 0 : index
    %c8 = arith.constant 8 : index
    %53 = vector.load %arg12[%c0_22, %c8] : memref<8x32xbf16, #tpu.memory_space<vmem>>, vector<8x8xbf16>
    tpu.vector_store %arg12[%c0_22, %c8], %52 {strides = array<i32>} : memref<8x32xbf16, #tpu.memory_space<vmem>>, vector<8x8xbf16>,
    %54 = vector.extract_strided_slice %10 {offsets = [0, 16], sizes = [8, 8], strides = [1, 1]} : vector<8x32xbf16> to vector<8x8xbf16>
    %55 = vector.extract_strided_slice %17 {offsets = [0, 16], sizes = [8, 8], strides = [1, 1]} : vector<8x64xbf16> to vector<8x8xbf16>
    %56 = vector.extract_strided_slice %17 {offsets = [0, 48], sizes = [8, 8], strides = [1, 1]} : vector<8x64xbf16> to vector<8x8xbf16>
    %cst_23 = arith.constant dense<0.000000e+00> : vector<8x8xf32>
    %57 = tpu.matmul %54, %55, %cst_23 {dimension_numbers = #tpu.dot_dimension_numbers<[1], [1], [0], [0], [0, 0, 1, 0], [], []>} : vector<8x8xbf16>, vector<8x8xbf16>, vector<8x8xf32> -> vector<8x8xf32>
    %cst_24 = arith.constant dense<0xFF800000> : vector<8xf32>
    %58 = vector.multi_reduction <maximumf>, %57, %cst_24 [1] : vector<8x8xf32> to vector<8xf32>
    %59 = vector.shape_cast %58 : vector<8xf32> to vector<8x1xf32>
    %60 = vector.broadcast %59 : vector<8x1xf32> to vector<8x8xf32>
    %61 = arith.subf %57, %60 : vector<8x8xf32>
    %62 = math.exp %61 : vector<8x8xf32>
    %cst_25 = arith.constant dense<0.000000e+00> : vector<8xf32>
    %63 = vector.multi_reduction <add>, %62, %cst_25 [1] : vector<8x8xf32> to vector<8xf32>
    %64 = vector.shape_cast %63 : vector<8xf32> to vector<8x1xf32>
    %65 = tpu.reciprocal %64 {approx = true} : vector<8x1xf32> -> vector<8x1xf32>
    %66 = vector.broadcast %65 : vector<8x1xf32> to vector<8x8xf32>
    %67 = arith.mulf %62, %66 : vector<8x8xf32>
    %68 = arith.truncf %67 : vector<8x8xf32> to vector<8x8xbf16>
    %cst_26 = arith.constant dense<0.000000e+00> : vector<8x8xf32>
    %69 = tpu.matmul %68, %56, %cst_26 {dimension_numbers = #tpu.dot_dimension_numbers<[1], [0], [0], [1], [0, 0, 1, 1], [], []>} : vector<8x8xbf16>, vector<8x8xbf16>, vector<8x8xf32> -> vector<8x8xf32>
    %70 = arith.truncf %69 : vector<8x8xf32> to vector<8x8xbf16>
    %c0_27 = arith.constant 0 : index
    %c16 = arith.constant 16 : index
    %71 = vector.load %arg12[%c0_27, %c16] : memref<8x32xbf16, #tpu.memory_space<vmem>>, vector<8x8xbf16>
    tpu.vector_store %arg12[%c0_27, %c16], %70 {strides = array<i32>} : memref<8x32xbf16, #tpu.memory_space<vmem>>, vector<8x8xbf16>,
    %72 = vector.extract_strided_slice %10 {offsets = [0, 24], sizes = [8, 8], strides = [1, 1]} : vector<8x32xbf16> to vector<8x8xbf16>
    %73 = vector.extract_strided_slice %17 {offsets = [0, 24], sizes = [8, 8], strides = [1, 1]} : vector<8x64xbf16> to vector<8x8xbf16>
    %74 = vector.extract_strided_slice %17 {offsets = [0, 56], sizes = [8, 8], strides = [1, 1]} : vector<8x64xbf16> to vector<8x8xbf16>
    %cst_28 = arith.constant dense<0.000000e+00> : vector<8x8xf32>
    %75 = tpu.matmul %72, %73, %cst_28 {dimension_numbers = #tpu.dot_dimension_numbers<[1], [1], [0], [0], [0, 0, 1, 0], [], []>} : vector<8x8xbf16>, vector<8x8xbf16>, vector<8x8xf32> -> vector<8x8xf32>
    %cst_29 = arith.constant dense<0xFF800000> : vector<8xf32>
    %76 = vector.multi_reduction <maximumf>, %75, %cst_29 [1] : vector<8x8xf32> to vector<8xf32>
    %77 = vector.shape_cast %76 : vector<8xf32> to vector<8x1xf32>
    %78 = vector.broadcast %77 : vector<8x1xf32> to vector<8x8xf32>
    %79 = arith.subf %75, %78 : vector<8x8xf32>
    %80 = math.exp %79 : vector<8x8xf32>
    %cst_30 = arith.constant dense<0.000000e+00> : vector<8xf32>
    %81 = vector.multi_reduction <add>, %80, %cst_30 [1] : vector<8x8xf32> to vector<8xf32>
    %82 = vector.shape_cast %81 : vector<8xf32> to vector<8x1xf32>
    %83 = tpu.reciprocal %82 {approx = true} : vector<8x1xf32> -> vector<8x1xf32>
    %84 = vector.broadcast %83 : vector<8x1xf32> to vector<8x8xf32>
    %85 = arith.mulf %80, %84 : vector<8x8xf32>
    %86 = arith.truncf %85 : vector<8x8xf32> to vector<8x8xbf16>
    %cst_31 = arith.constant dense<0.000000e+00> : vector<8x8xf32>
    %87 = tpu.matmul %86, %74, %cst_31 {dimension_numbers = #tpu.dot_dimension_numbers<[1], [0], [0], [1], [0, 0, 1, 1], [], []>} : vector<8x8xbf16>, vector<8x8xbf16>, vector<8x8xf32> -> vector<8x8xf32>
    %88 = arith.truncf %87 : vector<8x8xf32> to vector<8x8xbf16>
    %c0_32 = arith.constant 0 : index
    %c24 = arith.constant 24 : index
    %89 = vector.load %arg12[%c0_32, %c24] : memref<8x32xbf16, #tpu.memory_space<vmem>>, vector<8x8xbf16>
    tpu.vector_store %arg12[%c0_32, %c24], %88 {strides = array<i32>} : memref<8x32xbf16, #tpu.memory_space<vmem>>, vector<8x8xbf16>,
    %c0_33 = arith.constant 0 : index
    %c0_34 = arith.constant 0 : index
    %90 = vector.load %arg12[%c0_33, %c0_34] : memref<8x32xbf16, #tpu.memory_space<vmem>>, vector<8x32xbf16>
    %c0_35 = arith.constant 0 : index
    %c0_36 = arith.constant 0 : index
    %91 = vector.load %arg7[%c0_35, %c0_36] : memref<32x32xbf16, #tpu.memory_space<vmem>>, vector<32x32xbf16>
    %cst_37 = arith.constant dense<0.000000e+00> : vector<8x32xf32>
    %92 = tpu.matmul %90, %91, %cst_37 {dimension_numbers = #tpu.dot_dimension_numbers<[1], [0], [0], [1], [0, 0, 1, 1], [], []>} : vector<8x32xbf16>, vector<32x32xbf16>, vector<8x32xf32> -> vector<8x32xf32>
    %c0_38 = arith.constant 0 : index
    %c0_39 = arith.constant 0 : index
    %93 = vector.load %arg8[%c0_38, %c0_39] : memref<1x32xf32, #tpu.memory_space<vmem>>, vector<1x32xf32>
    %94 = vector.broadcast %93 : vector<1x32xf32> to vector<8x32xf32>
    %95 = arith.addf %92, %94 : vector<8x32xf32>
    %96 = arith.addf %1, %95 : vector<8x32xf32>
    %cst_40 = arith.constant dense<0.000000e+00> : vector<8xf32>
    %97 = vector.multi_reduction <add>, %96, %cst_40 [1] : vector<8x32xf32> to vector<8xf32>
    %98 = vector.shape_cast %97 : vector<8xf32> to vector<8x1xf32>
    %cst_41 = arith.constant 3.200000e+01 : f32
    %99 = vector.broadcast %cst_41 : f32 to vector<8x1xf32>
    %100 = arith.divf %98, %99 : vector<8x1xf32>
    %101 = vector.broadcast %100 : vector<8x1xf32> to vector<8x32xf32>
    %102 = arith.subf %96, %101 : vector<8x32xf32>
    %103 = arith.mulf %102, %102 : vector<8x32xf32>
    %cst_42 = arith.constant dense<0.000000e+00> : vector<8xf32>
    %104 = vector.multi_reduction <add>, %103, %cst_42 [1] : vector<8x32xf32> to vector<8xf32>
    %105 = vector.shape_cast %104 : vector<8xf32> to vector<8x1xf32>
    %cst_43 = arith.constant 3.200000e+01 : f32
    %106 = vector.broadcast %cst_43 : f32 to vector<8x1xf32>
    %107 = arith.divf %105, %106 : vector<8x1xf32>
    %108 = vector.broadcast %100 : vector<8x1xf32> to vector<8x32xf32>
    %109 = arith.subf %96, %108 : vector<8x32xf32>
    %cst_44 = arith.constant 9.99999974E-6 : f32
    %110 = vector.broadcast %cst_44 : f32 to vector<8x1xf32>
    %111 = arith.addf %107, %110 : vector<8x1xf32>
    %112 = math.rsqrt %111 : vector<8x1xf32>
    %113 = vector.broadcast %112 : vector<8x1xf32> to vector<8x32xf32>
    %114 = arith.mulf %109, %113 : vector<8x32xf32>
    %c0_45 = arith.constant 0 : index
    %c0_46 = arith.constant 0 : index
    %115 = vector.load %arg9[%c0_45, %c0_46] : memref<1x32xf32, #tpu.memory_space<vmem>>, vector<1x32xf32>
    %116 = vector.broadcast %115 : vector<1x32xf32> to vector<8x32xf32>
    %117 = arith.mulf %114, %116 : vector<8x32xf32>
    %c0_47 = arith.constant 0 : index
    %c0_48 = arith.constant 0 : index
    %118 = vector.load %arg10[%c0_47, %c0_48] : memref<1x32xf32, #tpu.memory_space<vmem>>, vector<1x32xf32>
    %119 = vector.broadcast %118 : vector<1x32xf32> to vector<8x32xf32>
    %120 = arith.addf %117, %119 : vector<8x32xf32>
    %c0_49 = arith.constant 0 : index
    %c0_50 = arith.constant 0 : index
    %c0_51 = arith.constant 0 : index
    %121 = vector.load %arg11[%c0_49, %c0_50, %c0_51] : memref<1x8x32xf32, #tpu.memory_space<vmem>>, vector<1x8x32xf32>
    %122 = vector.shape_cast %121 : vector<1x8x32xf32> to vector<8x32xf32>
    %123 = vector.shape_cast %120 : vector<8x32xf32> to vector<1x8x32xf32>
    tpu.vector_store %arg11[%c0_49, %c0_50, %c0_51], %123 {strides = array<i32>} : memref<1x8x32xf32, #tpu.memory_space<vmem>>, vector<1x8x32xf32>,
    return
  }
  func.func @transform_0(%arg0: i32, %arg1: i32) -> (i32, i32, i32) {
    %c0_i32 = arith.constant 0 : i32
    %c0_i32_0 = arith.constant 0 : i32
    %c0_i32_1 = arith.constant 0 : i32
    return %arg0, %c0_i32, %c0_i32_0 : i32, i32, i32
  }
  func.func @transform_1(%arg0: i32, %arg1: i32) -> (i32, i32) {
    %c0_i32 = arith.constant 0 : i32
    %c0_i32_0 = arith.constant 0 : i32
    %c0_i32_1 = arith.constant 0 : i32
    return %c0_i32, %c0_i32_0 : i32, i32
  }
  func.func @transform_2(%arg0: i32, %arg1: i32) -> (i32, i32) {
    %c0_i32 = arith.constant 0 : i32
    %c0_i32_0 = arith.constant 0 : i32
    %c0_i32_1 = arith.constant 0 : i32
    return %c0_i32, %c0_i32_0 : i32, i32
  }
  func.func @transform_3(%arg0: i32, %arg1: i32) -> (i32, i32) {
    %c0_i32 = arith.constant 0 : i32
    %c0_i32_0 = arith.constant 0 : i32
    %c0_i32_1 = arith.constant 0 : i32
    return %c0_i32, %c0_i32_0 : i32, i32
  }
  func.func @transform_4(%arg0: i32, %arg1: i32) -> (i32, i32) {
    %c0_i32 = arith.constant 0 : i32
    %c0_i32_0 = arith.constant 0 : i32
    %c0_i32_1 = arith.constant 0 : i32
    return %c0_i32, %c0_i32_0 : i32, i32
  }
  func.func @transform_5(%arg0: i32, %arg1: i32) -> (i32, i32) {
    %c0_i32 = arith.constant 0 : i32
    %c0_i32_0 = arith.constant 0 : i32
    %c0_i32_1 = arith.constant 0 : i32
    return %c0_i32, %c0_i32_0 : i32, i32
  }
  func.func @transform_6(%arg0: i32, %arg1: i32) -> (i32, i32) {
    %c0_i32 = arith.constant 0 : i32
    %c0_i32_0 = arith.constant 0 : i32
    %c0_i32_1 = arith.constant 0 : i32
    return %c0_i32, %c0_i32_0 : i32, i32
  }
  func.func @transform_7(%arg0: i32, %arg1: i32) -> (i32, i32) {
    %c0_i32 = arith.constant 0 : i32
    %c0_i32_0 = arith.constant 0 : i32
    %c0_i32_1 = arith.constant 0 : i32
    return %c0_i32, %c0_i32_0 : i32, i32
  }
  func.func @transform_8(%arg0: i32, %arg1: i32) -> (i32, i32) {
    %c0_i32 = arith.constant 0 : i32
    %c0_i32_0 = arith.constant 0 : i32
    %c0_i32_1 = arith.constant 0 : i32
    return %c0_i32, %c0_i32_0 : i32, i32
  }
  func.func @transform_9(%arg0: i32, %arg1: i32) -> (i32, i32, i32) {
    %c0_i32 = arith.constant 0 : i32
    %c0_i32_0 = arith.constant 0 : i32
    return %arg0, %arg1, %c0_i32 : i32, i32, i32
  }
}

module attributes {stable_mosaic.version = 11 : i64} {
  func.func @_linear_kernel(%arg0: i32, %arg1: i32, %arg2: memref<4x32xf32, #tpu.memory_space<vmem>>, %arg3: memref<32x128xbf16, #tpu.memory_space<vmem>>, %arg4: memref<1x128xf32, #tpu.memory_space<vmem>>, %arg5: memref<4x128xf32, #tpu.memory_space<vmem>>) attributes {dimension_semantics = [#tpu.dimension_semantics<parallel>, #tpu.dimension_semantics<parallel>], iteration_bounds = array<i64: 1, 1>, scalar_prefetch = 0 : i64, scratch_operands = 0 : i64, tpu.core_type = #tpu.core_type<tc>, window_params = [{transform_indices = @transform_0, window_bounds = array<i64: 4, 32>}, {transform_indices = @transform_1, window_bounds = array<i64: 32, 128>}, {transform_indices = @transform_2, window_bounds = array<i64: 1, 128>}, {transform_indices = @transform_3, window_bounds = array<i64: 4, 128>}]} {
    %c0 = arith.constant 0 : index
    %c0_0 = arith.constant 0 : index
    %0 = vector.load %arg2[%c0, %c0_0] : memref<4x32xf32, #tpu.memory_space<vmem>>, vector<4x32xf32>
    %1 = arith.truncf %0 : vector<4x32xf32> to vector<4x32xbf16>
    %c0_1 = arith.constant 0 : index
    %c0_2 = arith.constant 0 : index
    %2 = vector.load %arg3[%c0_1, %c0_2] : memref<32x128xbf16, #tpu.memory_space<vmem>>, vector<32x128xbf16>
    %cst = arith.constant dense<0.000000e+00> : vector<4x128xf32>
    %3 = tpu.matmul %1, %2, %cst {dimension_numbers = #tpu.dot_dimension_numbers<[1], [0], [0], [1], [0, 0, 1, 1], [], []>} : vector<4x32xbf16>, vector<32x128xbf16>, vector<4x128xf32> -> vector<4x128xf32>
    %c0_3 = arith.constant 0 : index
    %c0_4 = arith.constant 0 : index
    %4 = vector.load %arg4[%c0_3, %c0_4] : memref<1x128xf32, #tpu.memory_space<vmem>>, vector<1x128xf32>
    %5 = vector.broadcast %4 : vector<1x128xf32> to vector<4x128xf32>
    %6 = arith.addf %3, %5 : vector<4x128xf32>
    %c0_5 = arith.constant 0 : index
    %c0_6 = arith.constant 0 : index
    %7 = vector.load %arg5[%c0_5, %c0_6] : memref<4x128xf32, #tpu.memory_space<vmem>>, vector<4x128xf32>
    tpu.vector_store %arg5[%c0_5, %c0_6], %6 {strides = array<i32>} : memref<4x128xf32, #tpu.memory_space<vmem>>, vector<4x128xf32>,
    return
  }
  func.func @transform_0(%arg0: i32, %arg1: i32) -> (i32, i32) {
    %c0_i32 = arith.constant 0 : i32
    %c0_i32_0 = arith.constant 0 : i32
    return %arg0, %c0_i32 : i32, i32
  }
  func.func @transform_1(%arg0: i32, %arg1: i32) -> (i32, i32) {
    %c0_i32 = arith.constant 0 : i32
    %c0_i32_0 = arith.constant 0 : i32
    return %c0_i32, %arg1 : i32, i32
  }
  func.func @transform_2(%arg0: i32, %arg1: i32) -> (i32, i32) {
    %c0_i32 = arith.constant 0 : i32
    %c0_i32_0 = arith.constant 0 : i32
    return %c0_i32, %arg1 : i32, i32
  }
  func.func @transform_3(%arg0: i32, %arg1: i32) -> (i32, i32) {
    %c0_i32 = arith.constant 0 : i32
    return %arg0, %arg1 : i32, i32
  }
}

module attributes {stable_mosaic.version = 11 : i64} {
  func.func @_mlp_block_kernel(%arg0: i32, %arg1: memref<32x32xf32, #tpu.memory_space<vmem>>, %arg2: memref<32x64xbf16, #tpu.memory_space<vmem>>, %arg3: memref<1x64xf32, #tpu.memory_space<vmem>>, %arg4: memref<64x32xbf16, #tpu.memory_space<vmem>>, %arg5: memref<1x32xf32, #tpu.memory_space<vmem>>, %arg6: memref<1x32xf32, #tpu.memory_space<vmem>>, %arg7: memref<1x32xf32, #tpu.memory_space<vmem>>, %arg8: memref<32x32xf32, #tpu.memory_space<vmem>>) attributes {dimension_semantics = [#tpu.dimension_semantics<parallel>], iteration_bounds = array<i64: 1>, scalar_prefetch = 0 : i64, scratch_operands = 0 : i64, tpu.core_type = #tpu.core_type<tc>, window_params = [{transform_indices = @transform_0, window_bounds = array<i64: 32, 32>}, {pipeline_mode = #tpu.pipeline_mode<synchronous>, transform_indices = @transform_1, window_bounds = array<i64: 32, 64>}, {pipeline_mode = #tpu.pipeline_mode<synchronous>, transform_indices = @transform_2, window_bounds = array<i64: 1, 64>}, {pipeline_mode = #tpu.pipeline_mode<synchronous>, transform_indices = @transform_3, window_bounds = array<i64: 64, 32>}, {pipeline_mode = #tpu.pipeline_mode<synchronous>, transform_indices = @transform_4, window_bounds = array<i64: 1, 32>}, {pipeline_mode = #tpu.pipeline_mode<synchronous>, transform_indices = @transform_5, window_bounds = array<i64: 1, 32>}, {pipeline_mode = #tpu.pipeline_mode<synchronous>, transform_indices = @transform_6, window_bounds = array<i64: 1, 32>}, {transform_indices = @transform_7, window_bounds = array<i64: 32, 32>}]} {
    %c0 = arith.constant 0 : index
    %c0_0 = arith.constant 0 : index
    %0 = vector.load %arg1[%c0, %c0_0] : memref<32x32xf32, #tpu.memory_space<vmem>>, vector<32x32xf32>
    %1 = arith.truncf %0 : vector<32x32xf32> to vector<32x32xbf16>
    %c0_1 = arith.constant 0 : index
    %c0_2 = arith.constant 0 : index
    %2 = vector.load %arg2[%c0_1, %c0_2] : memref<32x64xbf16, #tpu.memory_space<vmem>>, vector<32x64xbf16>
    %cst = arith.constant dense<0.000000e+00> : vector<32x64xf32>
    %3 = tpu.matmul %1, %2, %cst {dimension_numbers = #tpu.dot_dimension_numbers<[1], [0], [0], [1], [0, 0, 1, 1], [], []>} : vector<32x32xbf16>, vector<32x64xbf16>, vector<32x64xf32> -> vector<32x64xf32>
    %c0_3 = arith.constant 0 : index
    %c0_4 = arith.constant 0 : index
    %4 = vector.load %arg3[%c0_3, %c0_4] : memref<1x64xf32, #tpu.memory_space<vmem>>, vector<1x64xf32>
    %5 = vector.broadcast %4 : vector<1x64xf32> to vector<32x64xf32>
    %6 = arith.addf %3, %5 : vector<32x64xf32>
    %cst_5 = arith.constant 0.000000e+00 : f32
    %7 = vector.broadcast %cst_5 : f32 to vector<32x64xf32>
    %8 = arith.maximumf %6, %7 : vector<32x64xf32>
    %9 = arith.truncf %8 : vector<32x64xf32> to vector<32x64xbf16>
    %c0_6 = arith.constant 0 : index
    %c0_7 = arith.constant 0 : index
    %10 = vector.load %arg4[%c0_6, %c0_7] : memref<64x32xbf16, #tpu.memory_space<vmem>>, vector<64x32xbf16>
    %cst_8 = arith.constant dense<0.000000e+00> : vector<32x32xf32>
    %11 = tpu.matmul %9, %10, %cst_8 {dimension_numbers = #tpu.dot_dimension_numbers<[1], [0], [0], [1], [0, 0, 1, 1], [], []>} : vector<32x64xbf16>, vector<64x32xbf16>, vector<32x32xf32> -> vector<32x32xf32>
    %c0_9 = arith.constant 0 : index
    %c0_10 = arith.constant 0 : index
    %12 = vector.load %arg5[%c0_9, %c0_10] : memref<1x32xf32, #tpu.memory_space<vmem>>, vector<1x32xf32>
    %13 = vector.broadcast %12 : vector<1x32xf32> to vector<32x32xf32>
    %14 = arith.addf %11, %13 : vector<32x32xf32>
    %15 = arith.addf %0, %14 : vector<32x32xf32>
    %cst_11 = arith.constant dense<0.000000e+00> : vector<32xf32>
    %16 = vector.multi_reduction <add>, %15, %cst_11 [1] : vector<32x32xf32> to vector<32xf32>
    %17 = vector.shape_cast %16 : vector<32xf32> to vector<32x1xf32>
    %cst_12 = arith.constant 3.200000e+01 : f32
    %18 = vector.broadcast %cst_12 : f32 to vector<32x1xf32>
    %19 = arith.divf %17, %18 : vector<32x1xf32>
    %20 = vector.broadcast %19 : vector<32x1xf32> to vector<32x32xf32>
    %21 = arith.subf %15, %20 : vector<32x32xf32>
    %22 = arith.mulf %21, %21 : vector<32x32xf32>
    %cst_13 = arith.constant dense<0.000000e+00> : vector<32xf32>
    %23 = vector.multi_reduction <add>, %22, %cst_13 [1] : vector<32x32xf32> to vector<32xf32>
    %24 = vector.shape_cast %23 : vector<32xf32> to vector<32x1xf32>
    %cst_14 = arith.constant 3.200000e+01 : f32
    %25 = vector.broadcast %cst_14 : f32 to vector<32x1xf32>
    %26 = arith.divf %24, %25 : vector<32x1xf32>
    %27 = vector.broadcast %19 : vector<32x1xf32> to vector<32x32xf32>
    %28 = arith.subf %15, %27 : vector<32x32xf32>
    %cst_15 = arith.constant 9.99999974E-6 : f32
    %29 = vector.broadcast %cst_15 : f32 to vector<32x1xf32>
    %30 = arith.addf %26, %29 : vector<32x1xf32>
    %31 = math.rsqrt %30 : vector<32x1xf32>
    %32 = vector.broadcast %31 : vector<32x1xf32> to vector<32x32xf32>
    %33 = arith.mulf %28, %32 : vector<32x32xf32>
    %c0_16 = arith.constant 0 : index
    %c0_17 = arith.constant 0 : index
    %34 = vector.load %arg6[%c0_16, %c0_17] : memref<1x32xf32, #tpu.memory_space<vmem>>, vector<1x32xf32>
    %35 = vector.broadcast %34 : vector<1x32xf32> to vector<32x32xf32>
    %36 = arith.mulf %33, %35 : vector<32x32xf32>
    %c0_18 = arith.constant 0 : index
    %c0_19 = arith.constant 0 : index
    %37 = vector.load %arg7[%c0_18, %c0_19] : memref<1x32xf32, #tpu.memory_space<vmem>>, vector<1x32xf32>
    %38 = vector.broadcast %37 : vector<1x32xf32> to vector<32x32xf32>
    %39 = arith.addf %36, %38 : vector<32x32xf32>
    %c0_20 = arith.constant 0 : index
    %c0_21 = arith.constant 0 : index
    %40 = vector.load %arg8[%c0_20, %c0_21] : memref<32x32xf32, #tpu.memory_space<vmem>>, vector<32x32xf32>
    tpu.vector_store %arg8[%c0_20, %c0_21], %39 {strides = array<i32>} : memref<32x32xf32, #tpu.memory_space<vmem>>, vector<32x32xf32>,
    return
  }
  func.func @transform_0(%arg0: i32) -> (i32, i32) {
    %c0_i32 = arith.constant 0 : i32
    %c0_i32_0 = arith.constant 0 : i32
    return %arg0, %c0_i32 : i32, i32
  }
  func.func @transform_1(%arg0: i32) -> (i32, i32) {
    %c0_i32 = arith.constant 0 : i32
    %c0_i32_0 = arith.constant 0 : i32
    %c0_i32_1 = arith.constant 0 : i32
    return %c0_i32, %c0_i32_0 : i32, i32
  }
  func.func @transform_2(%arg0: i32) -> (i32, i32) {
    %c0_i32 = arith.constant 0 : i32
    %c0_i32_0 = arith.constant 0 : i32
    %c0_i32_1 = arith.constant 0 : i32
    return %c0_i32, %c0_i32_0 : i32, i32
  }
  func.func @transform_3(%arg0: i32) -> (i32, i32) {
    %c0_i32 = arith.constant 0 : i32
    %c0_i32_0 = arith.constant 0 : i32
    %c0_i32_1 = arith.constant 0 : i32
    return %c0_i32, %c0_i32_0 : i32, i32
  }
  func.func @transform_4(%arg0: i32) -> (i32, i32) {
    %c0_i32 = arith.constant 0 : i32
    %c0_i32_0 = arith.constant 0 : i32
    %c0_i32_1 = arith.constant 0 : i32
    return %c0_i32, %c0_i32_0 : i32, i32
  }
  func.func @transform_5(%arg0: i32) -> (i32, i32) {
    %c0_i32 = arith.constant 0 : i32
    %c0_i32_0 = arith.constant 0 : i32
    %c0_i32_1 = arith.constant 0 : i32
    return %c0_i32, %c0_i32_0 : i32, i32
  }
  func.func @transform_6(%arg0: i32) -> (i32, i32) {
    %c0_i32 = arith.constant 0 : i32
    %c0_i32_0 = arith.constant 0 : i32
    %c0_i32_1 = arith.constant 0 : i32
    return %c0_i32, %c0_i32_0 : i32, i32
  }
  func.func @transform_7(%arg0: i32) -> (i32, i32) {
    %c0_i32 = arith.constant 0 : i32
    %c0_i32_0 = arith.constant 0 : i32
    return %arg0, %c0_i32 : i32, i32
  }
}

module attributes {stable_mosaic.version = 11 : i64} {
  func.func @_linear_kernel(%arg0: i32, %arg1: i32, %arg2: memref<24x32xf32, #tpu.memory_space<vmem>>, %arg3: memref<32x128xbf16, #tpu.memory_space<vmem>>, %arg4: memref<1x128xf32, #tpu.memory_space<vmem>>, %arg5: memref<24x128xf32, #tpu.memory_space<vmem>>) attributes {dimension_semantics = [#tpu.dimension_semantics<parallel>, #tpu.dimension_semantics<parallel>], iteration_bounds = array<i64: 1, 1>, scalar_prefetch = 0 : i64, scratch_operands = 0 : i64, tpu.core_type = #tpu.core_type<tc>, window_params = [{transform_indices = @transform_0, window_bounds = array<i64: 24, 32>}, {transform_indices = @transform_1, window_bounds = array<i64: 32, 128>}, {transform_indices = @transform_2, window_bounds = array<i64: 1, 128>}, {transform_indices = @transform_3, window_bounds = array<i64: 24, 128>}]} {
    %c0 = arith.constant 0 : index
    %c0_0 = arith.constant 0 : index
    %0 = vector.load %arg2[%c0, %c0_0] : memref<24x32xf32, #tpu.memory_space<vmem>>, vector<24x32xf32>
    %1 = arith.truncf %0 : vector<24x32xf32> to vector<24x32xbf16>
    %c0_1 = arith.constant 0 : index
    %c0_2 = arith.constant 0 : index
    %2 = vector.load %arg3[%c0_1, %c0_2] : memref<32x128xbf16, #tpu.memory_space<vmem>>, vector<32x128xbf16>
    %cst = arith.constant dense<0.000000e+00> : vector<24x128xf32>
    %3 = tpu.matmul %1, %2, %cst {dimension_numbers = #tpu.dot_dimension_numbers<[1], [0], [0], [1], [0, 0, 1, 1], [], []>} : vector<24x32xbf16>, vector<32x128xbf16>, vector<24x128xf32> -> vector<24x128xf32>
    %c0_3 = arith.constant 0 : index
    %c0_4 = arith.constant 0 : index
    %4 = vector.load %arg4[%c0_3, %c0_4] : memref<1x128xf32, #tpu.memory_space<vmem>>, vector<1x128xf32>
    %5 = vector.broadcast %4 : vector<1x128xf32> to vector<24x128xf32>
    %6 = arith.addf %3, %5 : vector<24x128xf32>
    %c0_5 = arith.constant 0 : index
    %c0_6 = arith.constant 0 : index
    %7 = vector.load %arg5[%c0_5, %c0_6] : memref<24x128xf32, #tpu.memory_space<vmem>>, vector<24x128xf32>
    tpu.vector_store %arg5[%c0_5, %c0_6], %6 {strides = array<i32>} : memref<24x128xf32, #tpu.memory_space<vmem>>, vector<24x128xf32>,
    return
  }
  func.func @transform_0(%arg0: i32, %arg1: i32) -> (i32, i32) {
    %c0_i32 = arith.constant 0 : i32
    %c0_i32_0 = arith.constant 0 : i32
    return %arg0, %c0_i32 : i32, i32
  }
  func.func @transform_1(%arg0: i32, %arg1: i32) -> (i32, i32) {
    %c0_i32 = arith.constant 0 : i32
    %c0_i32_0 = arith.constant 0 : i32
    return %c0_i32, %arg1 : i32, i32
  }
  func.func @transform_2(%arg0: i32, %arg1: i32) -> (i32, i32) {
    %c0_i32 = arith.constant 0 : i32
    %c0_i32_0 = arith.constant 0 : i32
    return %c0_i32, %arg1 : i32, i32
  }
  func.func @transform_3(%arg0: i32, %arg1: i32) -> (i32, i32) {
    %c0_i32 = arith.constant 0 : i32
    return %arg0, %arg1 : i32, i32
  }
}

module attributes {stable_mosaic.version = 11 : i64} {
  func.func @_linear_kernel(%arg0: i32, %arg1: i32, %arg2: memref<24x48xf32, #tpu.memory_space<vmem>>, %arg3: memref<48x128xbf16, #tpu.memory_space<vmem>>, %arg4: memref<1x128xf32, #tpu.memory_space<vmem>>, %arg5: memref<24x128xf32, #tpu.memory_space<vmem>>) attributes {dimension_semantics = [#tpu.dimension_semantics<parallel>, #tpu.dimension_semantics<parallel>], iteration_bounds = array<i64: 1, 1>, scalar_prefetch = 0 : i64, scratch_operands = 0 : i64, tpu.core_type = #tpu.core_type<tc>, window_params = [{transform_indices = @transform_0, window_bounds = array<i64: 24, 48>}, {transform_indices = @transform_1, window_bounds = array<i64: 48, 128>}, {transform_indices = @transform_2, window_bounds = array<i64: 1, 128>}, {transform_indices = @transform_3, window_bounds = array<i64: 24, 128>}]} {
    %c0 = arith.constant 0 : index
    %c0_0 = arith.constant 0 : index
    %0 = vector.load %arg2[%c0, %c0_0] : memref<24x48xf32, #tpu.memory_space<vmem>>, vector<24x48xf32>
    %1 = arith.truncf %0 : vector<24x48xf32> to vector<24x48xbf16>
    %c0_1 = arith.constant 0 : index
    %c0_2 = arith.constant 0 : index
    %2 = vector.load %arg3[%c0_1, %c0_2] : memref<48x128xbf16, #tpu.memory_space<vmem>>, vector<48x128xbf16>
    %cst = arith.constant dense<0.000000e+00> : vector<24x128xf32>
    %3 = tpu.matmul %1, %2, %cst {dimension_numbers = #tpu.dot_dimension_numbers<[1], [0], [0], [1], [0, 0, 1, 1], [], []>} : vector<24x48xbf16>, vector<48x128xbf16>, vector<24x128xf32> -> vector<24x128xf32>
    %c0_3 = arith.constant 0 : index
    %c0_4 = arith.constant 0 : index
    %4 = vector.load %arg4[%c0_3, %c0_4] : memref<1x128xf32, #tpu.memory_space<vmem>>, vector<1x128xf32>
    %5 = vector.broadcast %4 : vector<1x128xf32> to vector<24x128xf32>
    %6 = arith.addf %3, %5 : vector<24x128xf32>
    %c0_5 = arith.constant 0 : index
    %c0_6 = arith.constant 0 : index
    %7 = vector.load %arg5[%c0_5, %c0_6] : memref<24x128xf32, #tpu.memory_space<vmem>>, vector<24x128xf32>
    tpu.vector_store %arg5[%c0_5, %c0_6], %6 {strides = array<i32>} : memref<24x128xf32, #tpu.memory_space<vmem>>, vector<24x128xf32>,
    return
  }
  func.func @transform_0(%arg0: i32, %arg1: i32) -> (i32, i32) {
    %c0_i32 = arith.constant 0 : i32
    %c0_i32_0 = arith.constant 0 : i32
    return %arg0, %c0_i32 : i32, i32
  }
  func.func @transform_1(%arg0: i32, %arg1: i32) -> (i32, i32) {
    %c0_i32 = arith.constant 0 : i32
    %c0_i32_0 = arith.constant 0 : i32
    return %c0_i32, %arg1 : i32, i32
  }
  func.func @transform_2(%arg0: i32, %arg1: i32) -> (i32, i32) {
    %c0_i32 = arith.constant 0 : i32
    %c0_i32_0 = arith.constant 0 : i32
    return %c0_i32, %arg1 : i32, i32
  }
  func.func @transform_3(%arg0: i32, %arg1: i32) -> (i32, i32) {
    %c0_i32 = arith.constant 0 : i32
    return %arg0, %arg1 : i32, i32
  }
}

module attributes {stable_mosaic.version = 11 : i64} {
  func.func @_mlp_block_kernel(%arg0: i32, %arg1: memref<24x32xf32, #tpu.memory_space<vmem>>, %arg2: memref<32x64xbf16, #tpu.memory_space<vmem>>, %arg3: memref<1x64xf32, #tpu.memory_space<vmem>>, %arg4: memref<64x32xbf16, #tpu.memory_space<vmem>>, %arg5: memref<1x32xf32, #tpu.memory_space<vmem>>, %arg6: memref<1x32xf32, #tpu.memory_space<vmem>>, %arg7: memref<1x32xf32, #tpu.memory_space<vmem>>, %arg8: memref<24x32xf32, #tpu.memory_space<vmem>>) attributes {dimension_semantics = [#tpu.dimension_semantics<parallel>], iteration_bounds = array<i64: 1>, scalar_prefetch = 0 : i64, scratch_operands = 0 : i64, tpu.core_type = #tpu.core_type<tc>, window_params = [{transform_indices = @transform_0, window_bounds = array<i64: 24, 32>}, {pipeline_mode = #tpu.pipeline_mode<synchronous>, transform_indices = @transform_1, window_bounds = array<i64: 32, 64>}, {pipeline_mode = #tpu.pipeline_mode<synchronous>, transform_indices = @transform_2, window_bounds = array<i64: 1, 64>}, {pipeline_mode = #tpu.pipeline_mode<synchronous>, transform_indices = @transform_3, window_bounds = array<i64: 64, 32>}, {pipeline_mode = #tpu.pipeline_mode<synchronous>, transform_indices = @transform_4, window_bounds = array<i64: 1, 32>}, {pipeline_mode = #tpu.pipeline_mode<synchronous>, transform_indices = @transform_5, window_bounds = array<i64: 1, 32>}, {pipeline_mode = #tpu.pipeline_mode<synchronous>, transform_indices = @transform_6, window_bounds = array<i64: 1, 32>}, {transform_indices = @transform_7, window_bounds = array<i64: 24, 32>}]} {
    %c0 = arith.constant 0 : index
    %c0_0 = arith.constant 0 : index
    %0 = vector.load %arg1[%c0, %c0_0] : memref<24x32xf32, #tpu.memory_space<vmem>>, vector<24x32xf32>
    %1 = arith.truncf %0 : vector<24x32xf32> to vector<24x32xbf16>
    %c0_1 = arith.constant 0 : index
    %c0_2 = arith.constant 0 : index
    %2 = vector.load %arg2[%c0_1, %c0_2] : memref<32x64xbf16, #tpu.memory_space<vmem>>, vector<32x64xbf16>
    %cst = arith.constant dense<0.000000e+00> : vector<24x64xf32>
    %3 = tpu.matmul %1, %2, %cst {dimension_numbers = #tpu.dot_dimension_numbers<[1], [0], [0], [1], [0, 0, 1, 1], [], []>} : vector<24x32xbf16>, vector<32x64xbf16>, vector<24x64xf32> -> vector<24x64xf32>
    %c0_3 = arith.constant 0 : index
    %c0_4 = arith.constant 0 : index
    %4 = vector.load %arg3[%c0_3, %c0_4] : memref<1x64xf32, #tpu.memory_space<vmem>>, vector<1x64xf32>
    %5 = vector.broadcast %4 : vector<1x64xf32> to vector<24x64xf32>
    %6 = arith.addf %3, %5 : vector<24x64xf32>
    %cst_5 = arith.constant 0.000000e+00 : f32
    %7 = vector.broadcast %cst_5 : f32 to vector<24x64xf32>
    %8 = arith.maximumf %6, %7 : vector<24x64xf32>
    %9 = arith.truncf %8 : vector<24x64xf32> to vector<24x64xbf16>
    %c0_6 = arith.constant 0 : index
    %c0_7 = arith.constant 0 : index
    %10 = vector.load %arg4[%c0_6, %c0_7] : memref<64x32xbf16, #tpu.memory_space<vmem>>, vector<64x32xbf16>
    %cst_8 = arith.constant dense<0.000000e+00> : vector<24x32xf32>
    %11 = tpu.matmul %9, %10, %cst_8 {dimension_numbers = #tpu.dot_dimension_numbers<[1], [0], [0], [1], [0, 0, 1, 1], [], []>} : vector<24x64xbf16>, vector<64x32xbf16>, vector<24x32xf32> -> vector<24x32xf32>
    %c0_9 = arith.constant 0 : index
    %c0_10 = arith.constant 0 : index
    %12 = vector.load %arg5[%c0_9, %c0_10] : memref<1x32xf32, #tpu.memory_space<vmem>>, vector<1x32xf32>
    %13 = vector.broadcast %12 : vector<1x32xf32> to vector<24x32xf32>
    %14 = arith.addf %11, %13 : vector<24x32xf32>
    %15 = arith.addf %0, %14 : vector<24x32xf32>
    %cst_11 = arith.constant dense<0.000000e+00> : vector<24xf32>
    %16 = vector.multi_reduction <add>, %15, %cst_11 [1] : vector<24x32xf32> to vector<24xf32>
    %17 = vector.shape_cast %16 : vector<24xf32> to vector<24x1xf32>
    %cst_12 = arith.constant 3.200000e+01 : f32
    %18 = vector.broadcast %cst_12 : f32 to vector<24x1xf32>
    %19 = arith.divf %17, %18 : vector<24x1xf32>
    %20 = vector.broadcast %19 : vector<24x1xf32> to vector<24x32xf32>
    %21 = arith.subf %15, %20 : vector<24x32xf32>
    %22 = arith.mulf %21, %21 : vector<24x32xf32>
    %cst_13 = arith.constant dense<0.000000e+00> : vector<24xf32>
    %23 = vector.multi_reduction <add>, %22, %cst_13 [1] : vector<24x32xf32> to vector<24xf32>
    %24 = vector.shape_cast %23 : vector<24xf32> to vector<24x1xf32>
    %cst_14 = arith.constant 3.200000e+01 : f32
    %25 = vector.broadcast %cst_14 : f32 to vector<24x1xf32>
    %26 = arith.divf %24, %25 : vector<24x1xf32>
    %27 = vector.broadcast %19 : vector<24x1xf32> to vector<24x32xf32>
    %28 = arith.subf %15, %27 : vector<24x32xf32>
    %cst_15 = arith.constant 9.99999974E-6 : f32
    %29 = vector.broadcast %cst_15 : f32 to vector<24x1xf32>
    %30 = arith.addf %26, %29 : vector<24x1xf32>
    %31 = math.rsqrt %30 : vector<24x1xf32>
    %32 = vector.broadcast %31 : vector<24x1xf32> to vector<24x32xf32>
    %33 = arith.mulf %28, %32 : vector<24x32xf32>
    %c0_16 = arith.constant 0 : index
    %c0_17 = arith.constant 0 : index
    %34 = vector.load %arg6[%c0_16, %c0_17] : memref<1x32xf32, #tpu.memory_space<vmem>>, vector<1x32xf32>
    %35 = vector.broadcast %34 : vector<1x32xf32> to vector<24x32xf32>
    %36 = arith.mulf %33, %35 : vector<24x32xf32>
    %c0_18 = arith.constant 0 : index
    %c0_19 = arith.constant 0 : index
    %37 = vector.load %arg7[%c0_18, %c0_19] : memref<1x32xf32, #tpu.memory_space<vmem>>, vector<1x32xf32>
    %38 = vector.broadcast %37 : vector<1x32xf32> to vector<24x32xf32>
    %39 = arith.addf %36, %38 : vector<24x32xf32>
    %c0_20 = arith.constant 0 : index
    %c0_21 = arith.constant 0 : index
    %40 = vector.load %arg8[%c0_20, %c0_21] : memref<24x32xf32, #tpu.memory_space<vmem>>, vector<24x32xf32>
    tpu.vector_store %arg8[%c0_20, %c0_21], %39 {strides = array<i32>} : memref<24x32xf32, #tpu.memory_space<vmem>>, vector<24x32xf32>,
    return
  }
  func.func @transform_0(%arg0: i32) -> (i32, i32) {
    %c0_i32 = arith.constant 0 : i32
    %c0_i32_0 = arith.constant 0 : i32
    return %arg0, %c0_i32 : i32, i32
  }
  func.func @transform_1(%arg0: i32) -> (i32, i32) {
    %c0_i32 = arith.constant 0 : i32
    %c0_i32_0 = arith.constant 0 : i32
    %c0_i32_1 = arith.constant 0 : i32
    return %c0_i32, %c0_i32_0 : i32, i32
  }
  func.func @transform_2(%arg0: i32) -> (i32, i32) {
    %c0_i32 = arith.constant 0 : i32
    %c0_i32_0 = arith.constant 0 : i32
    %c0_i32_1 = arith.constant 0 : i32
    return %c0_i32, %c0_i32_0 : i32, i32
  }
  func.func @transform_3(%arg0: i32) -> (i32, i32) {
    %c0_i32 = arith.constant 0 : i32
    %c0_i32_0 = arith.constant 0 : i32
    %c0_i32_1 = arith.constant 0 : i32
    return %c0_i32, %c0_i32_0 : i32, i32
  }
  func.func @transform_4(%arg0: i32) -> (i32, i32) {
    %c0_i32 = arith.constant 0 : i32
    %c0_i32_0 = arith.constant 0 : i32
    %c0_i32_1 = arith.constant 0 : i32
    return %c0_i32, %c0_i32_0 : i32, i32
  }
  func.func @transform_5(%arg0: i32) -> (i32, i32) {
    %c0_i32 = arith.constant 0 : i32
    %c0_i32_0 = arith.constant 0 : i32
    %c0_i32_1 = arith.constant 0 : i32
    return %c0_i32, %c0_i32_0 : i32, i32
  }
  func.func @transform_6(%arg0: i32) -> (i32, i32) {
    %c0_i32 = arith.constant 0 : i32
    %c0_i32_0 = arith.constant 0 : i32
    %c0_i32_1 = arith.constant 0 : i32
    return %c0_i32, %c0_i32_0 : i32, i32
  }
  func.func @transform_7(%arg0: i32) -> (i32, i32) {
    %c0_i32 = arith.constant 0 : i32
    %c0_i32_0 = arith.constant 0 : i32
    return %arg0, %c0_i32 : i32, i32
  }
}

module attributes {stable_mosaic.version = 11 : i64} {
  func.func @_attn_block_kernel(%arg0: i32, %arg1: i32, %arg2: memref<1x12x32xf32, #tpu.memory_space<vmem>>, %arg3: memref<1x12x32xf32, #tpu.memory_space<vmem>>, %arg4: memref<32x32xbf16, #tpu.memory_space<vmem>>, %arg5: memref<32x64xbf16, #tpu.memory_space<vmem>>, %arg6: memref<1x32xf32, #tpu.memory_space<vmem>>, %arg7: memref<1x64xf32, #tpu.memory_space<vmem>>, %arg8: memref<32x32xbf16, #tpu.memory_space<vmem>>, %arg9: memref<1x32xf32, #tpu.memory_space<vmem>>, %arg10: memref<1x32xf32, #tpu.memory_space<vmem>>, %arg11: memref<1x32xf32, #tpu.memory_space<vmem>>, %arg12: memref<1x12x32xf32, #tpu.memory_space<vmem>>, %arg13: memref<12x32xbf16, #tpu.memory_space<vmem>>) attributes {dimension_semantics = [#tpu.dimension_semantics<parallel>, #tpu.dimension_semantics<parallel>], iteration_bounds = array<i64: 2, 1>, scalar_prefetch = 0 : i64, scratch_operands = 1 : i64, tpu.core_type = #tpu.core_type<tc>, window_params = [{transform_indices = @transform_0, window_bounds = array<i64: 1, 12, 32>}, {transform_indices = @transform_1, window_bounds = array<i64: 1, 12, 32>}, {pipeline_mode = #tpu.pipeline_mode<synchronous>, transform_indices = @transform_2, window_bounds = array<i64: 32, 32>}, {pipeline_mode = #tpu.pipeline_mode<synchronous>, transform_indices = @transform_3, window_bounds = array<i64: 32, 64>}, {pipeline_mode = #tpu.pipeline_mode<synchronous>, transform_indices = @transform_4, window_bounds = array<i64: 1, 32>}, {pipeline_mode = #tpu.pipeline_mode<synchronous>, transform_indices = @transform_5, window_bounds = array<i64: 1, 64>}, {pipeline_mode = #tpu.pipeline_mode<synchronous>, transform_indices = @transform_6, window_bounds = array<i64: 32, 32>}, {pipeline_mode = #tpu.pipeline_mode<synchronous>, transform_indices = @transform_7, window_bounds = array<i64: 1, 32>}, {pipeline_mode = #tpu.pipeline_mode<synchronous>, transform_indices = @transform_8, window_bounds = array<i64: 1, 32>}, {pipeline_mode = #tpu.pipeline_mode<synchronous>, transform_indices = @transform_9, window_bounds = array<i64: 1, 32>}, {transform_indices = @transform_10, window_bounds = array<i64: 1, 12, 32>}]} {
    %c12_i32 = arith.constant 12 : i32
    %0 = arith.muli %arg1, %c12_i32 : i32
    %c0 = arith.constant 0 : index
    %c0_0 = arith.constant 0 : index
    %c0_1 = arith.constant 0 : index
    %1 = vector.load %arg2[%c0, %c0_0, %c0_1] : memref<1x12x32xf32, #tpu.memory_space<vmem>>, vector<1x12x32xf32>
    %2 = vector.shape_cast %1 : vector<1x12x32xf32> to vector<12x32xf32>
    %c0_2 = arith.constant 0 : index
    %c0_3 = arith.constant 0 : index
    %c0_4 = arith.constant 0 : index
    %3 = vector.load %arg3[%c0_2, %c0_3, %c0_4] : memref<1x12x32xf32, #tpu.memory_space<vmem>>, vector<1x12x32xf32>
    %4 = vector.shape_cast %3 : vector<1x12x32xf32> to vector<12x32xf32>
    %5 = arith.addf %2, %4 : vector<12x32xf32>
    %6 = arith.truncf %5 : vector<12x32xf32> to vector<12x32xbf16>
    %c0_5 = arith.constant 0 : index
    %c0_6 = arith.constant 0 : index
    %7 = vector.load %arg4[%c0_5, %c0_6] : memref<32x32xbf16, #tpu.memory_space<vmem>>, vector<32x32xbf16>
    %cst = arith.constant dense<0.000000e+00> : vector<12x32xf32>
    %8 = tpu.matmul %6, %7, %cst {dimension_numbers = #tpu.dot_dimension_numbers<[1], [0], [0], [1], [0, 0, 1, 1], [], []>} : vector<12x32xbf16>, vector<32x32xbf16>, vector<12x32xf32> -> vector<12x32xf32>
    %c0_7 = arith.constant 0 : index
    %c0_8 = arith.constant 0 : index
    %9 = vector.load %arg6[%c0_7, %c0_8] : memref<1x32xf32, #tpu.memory_space<vmem>>, vector<1x32xf32>
    %10 = vector.broadcast %9 : vector<1x32xf32> to vector<12x32xf32>
    %11 = arith.addf %8, %10 : vector<12x32xf32>
    %cst_9 = arith.constant 0.353553385 : f32
    %12 = vector.broadcast %cst_9 : f32 to vector<12x32xf32>
    %13 = arith.mulf %11, %12 : vector<12x32xf32>
    %14 = arith.truncf %13 : vector<12x32xf32> to vector<12x32xbf16>
    %15 = arith.truncf %5 : vector<12x32xf32> to vector<12x32xbf16>
    %c0_10 = arith.constant 0 : index
    %c0_11 = arith.constant 0 : index
    %16 = vector.load %arg5[%c0_10, %c0_11] : memref<32x64xbf16, #tpu.memory_space<vmem>>, vector<32x64xbf16>
    %cst_12 = arith.constant dense<0.000000e+00> : vector<12x64xf32>
    %17 = tpu.matmul %15, %16, %cst_12 {dimension_numbers = #tpu.dot_dimension_numbers<[1], [0], [0], [1], [0, 0, 1, 1], [], []>} : vector<12x32xbf16>, vector<32x64xbf16>, vector<12x64xf32> -> vector<12x64xf32>
    %c0_13 = arith.constant 0 : index
    %c0_14 = arith.constant 0 : index
    %18 = vector.load %arg7[%c0_13, %c0_14] : memref<1x64xf32, #tpu.memory_space<vmem>>, vector<1x64xf32>
    %19 = vector.broadcast %18 : vector<1x64xf32> to vector<12x64xf32>
    %20 = arith.addf %17, %19 : vector<12x64xf32>
    %21 = arith.truncf %20 : vector<12x64xf32> to vector<12x64xbf16>
    %22 = tpu.iota {dimensions = array<i32: 0>} : vector<12x12xi32>
    %23 = vector.broadcast %0 : i32 to vector<12x12xi32>
    %24 = arith.addi %23, %22 : vector<12x12xi32>
    %25 = tpu.iota {dimensions = array<i32: 1>} : vector<12x12xi32>
    %26 = arith.cmpi sle, %25, %24 : vector<12x12xi32>
    %cst_15 = arith.constant 0.000000e+00 : f32
    %cst_16 = arith.constant -1.000000e+30 : f32
    %27 = vector.broadcast %cst_15 : f32 to vector<12x12xf32>
    %28 = vector.broadcast %cst_16 : f32 to vector<12x12xf32>
    %29 = arith.select %26, %27, %28 : vector<12x12xi1>, vector<12x12xf32>
    %30 = vector.extract_strided_slice %14 {offsets = [0, 0], sizes = [12, 8], strides = [1, 1]} : vector<12x32xbf16> to vector<12x8xbf16>
    %31 = vector.extract_strided_slice %21 {offsets = [0, 0], sizes = [12, 8], strides = [1, 1]} : vector<12x64xbf16> to vector<12x8xbf16>
    %32 = vector.extract_strided_slice %21 {offsets = [0, 32], sizes = [12, 8], strides = [1, 1]} : vector<12x64xbf16> to vector<12x8xbf16>
    %cst_17 = arith.constant dense<0.000000e+00> : vector<12x12xf32>
    %33 = tpu.matmul %30, %31, %cst_17 {dimension_numbers = #tpu.dot_dimension_numbers<[1], [1], [0], [0], [0, 0, 1, 0], [], []>} : vector<12x8xbf16>, vector<12x8xbf16>, vector<12x12xf32> -> vector<12x12xf32>
    %34 = arith.addf %33, %29 : vector<12x12xf32>
    %cst_18 = arith.constant dense<0xFF800000> : vector<12xf32>
    %35 = vector.multi_reduction <maximumf>, %34, %cst_18 [1] : vector<12x12xf32> to vector<12xf32>
    %36 = vector.shape_cast %35 : vector<12xf32> to vector<12x1xf32>
    %37 = vector.broadcast %36 : vector<12x1xf32> to vector<12x12xf32>
    %38 = arith.subf %34, %37 : vector<12x12xf32>
    %39 = math.exp %38 : vector<12x12xf32>
    %cst_19 = arith.constant dense<0.000000e+00> : vector<12xf32>
    %40 = vector.multi_reduction <add>, %39, %cst_19 [1] : vector<12x12xf32> to vector<12xf32>
    %41 = vector.shape_cast %40 : vector<12xf32> to vector<12x1xf32>
    %42 = tpu.reciprocal %41 {approx = true} : vector<12x1xf32> -> vector<12x1xf32>
    %43 = vector.broadcast %42 : vector<12x1xf32> to vector<12x12xf32>
    %44 = arith.mulf %39, %43 : vector<12x12xf32>
    %45 = arith.truncf %44 : vector<12x12xf32> to vector<12x12xbf16>
    %cst_20 = arith.constant dense<0.000000e+00> : vector<12x8xf32>
    %46 = tpu.matmul %45, %32, %cst_20 {dimension_numbers = #tpu.dot_dimension_numbers<[1], [0], [0], [1], [0, 0, 1, 1], [], []>} : vector<12x12xbf16>, vector<12x8xbf16>, vector<12x8xf32> -> vector<12x8xf32>
    %47 = arith.truncf %46 : vector<12x8xf32> to vector<12x8xbf16>
    %c0_21 = arith.constant 0 : index
    %c0_22 = arith.constant 0 : index
    %48 = vector.load %arg13[%c0_21, %c0_22] : memref<12x32xbf16, #tpu.memory_space<vmem>>, vector<12x8xbf16>
    tpu.vector_store %arg13[%c0_21, %c0_22], %47 {strides = array<i32>} : memref<12x32xbf16, #tpu.memory_space<vmem>>, vector<12x8xbf16>,
    %49 = vector.extract_strided_slice %14 {offsets = [0, 8], sizes = [12, 8], strides = [1, 1]} : vector<12x32xbf16> to vector<12x8xbf16>
    %50 = vector.extract_strided_slice %21 {offsets = [0, 8], sizes = [12, 8], strides = [1, 1]} : vector<12x64xbf16> to vector<12x8xbf16>
    %51 = vector.extract_strided_slice %21 {offsets = [0, 40], sizes = [12, 8], strides = [1, 1]} : vector<12x64xbf16> to vector<12x8xbf16>
    %cst_23 = arith.constant dense<0.000000e+00> : vector<12x12xf32>
    %52 = tpu.matmul %49, %50, %cst_23 {dimension_numbers = #tpu.dot_dimension_numbers<[1], [1], [0], [0], [0, 0, 1, 0], [], []>} : vector<12x8xbf16>, vector<12x8xbf16>, vector<12x12xf32> -> vector<12x12xf32>
    %53 = arith.addf %52, %29 : vector<12x12xf32>
    %cst_24 = arith.constant dense<0xFF800000> : vector<12xf32>
    %54 = vector.multi_reduction <maximumf>, %53, %cst_24 [1] : vector<12x12xf32> to vector<12xf32>
    %55 = vector.shape_cast %54 : vector<12xf32> to vector<12x1xf32>
    %56 = vector.broadcast %55 : vector<12x1xf32> to vector<12x12xf32>
    %57 = arith.subf %53, %56 : vector<12x12xf32>
    %58 = math.exp %57 : vector<12x12xf32>
    %cst_25 = arith.constant dense<0.000000e+00> : vector<12xf32>
    %59 = vector.multi_reduction <add>, %58, %cst_25 [1] : vector<12x12xf32> to vector<12xf32>
    %60 = vector.shape_cast %59 : vector<12xf32> to vector<12x1xf32>
    %61 = tpu.reciprocal %60 {approx = true} : vector<12x1xf32> -> vector<12x1xf32>
    %62 = vector.broadcast %61 : vector<12x1xf32> to vector<12x12xf32>
    %63 = arith.mulf %58, %62 : vector<12x12xf32>
    %64 = arith.truncf %63 : vector<12x12xf32> to vector<12x12xbf16>
    %cst_26 = arith.constant dense<0.000000e+00> : vector<12x8xf32>
    %65 = tpu.matmul %64, %51, %cst_26 {dimension_numbers = #tpu.dot_dimension_numbers<[1], [0], [0], [1], [0, 0, 1, 1], [], []>} : vector<12x12xbf16>, vector<12x8xbf16>, vector<12x8xf32> -> vector<12x8xf32>
    %66 = arith.truncf %65 : vector<12x8xf32> to vector<12x8xbf16>
    %c0_27 = arith.constant 0 : index
    %c8 = arith.constant 8 : index
    %67 = vector.load %arg13[%c0_27, %c8] : memref<12x32xbf16, #tpu.memory_space<vmem>>, vector<12x8xbf16>
    tpu.vector_store %arg13[%c0_27, %c8], %66 {strides = array<i32>} : memref<12x32xbf16, #tpu.memory_space<vmem>>, vector<12x8xbf16>,
    %68 = vector.extract_strided_slice %14 {offsets = [0, 16], sizes = [12, 8], strides = [1, 1]} : vector<12x32xbf16> to vector<12x8xbf16>
    %69 = vector.extract_strided_slice %21 {offsets = [0, 16], sizes = [12, 8], strides = [1, 1]} : vector<12x64xbf16> to vector<12x8xbf16>
    %70 = vector.extract_strided_slice %21 {offsets = [0, 48], sizes = [12, 8], strides = [1, 1]} : vector<12x64xbf16> to vector<12x8xbf16>
    %cst_28 = arith.constant dense<0.000000e+00> : vector<12x12xf32>
    %71 = tpu.matmul %68, %69, %cst_28 {dimension_numbers = #tpu.dot_dimension_numbers<[1], [1], [0], [0], [0, 0, 1, 0], [], []>} : vector<12x8xbf16>, vector<12x8xbf16>, vector<12x12xf32> -> vector<12x12xf32>
    %72 = arith.addf %71, %29 : vector<12x12xf32>
    %cst_29 = arith.constant dense<0xFF800000> : vector<12xf32>
    %73 = vector.multi_reduction <maximumf>, %72, %cst_29 [1] : vector<12x12xf32> to vector<12xf32>
    %74 = vector.shape_cast %73 : vector<12xf32> to vector<12x1xf32>
    %75 = vector.broadcast %74 : vector<12x1xf32> to vector<12x12xf32>
    %76 = arith.subf %72, %75 : vector<12x12xf32>
    %77 = math.exp %76 : vector<12x12xf32>
    %cst_30 = arith.constant dense<0.000000e+00> : vector<12xf32>
    %78 = vector.multi_reduction <add>, %77, %cst_30 [1] : vector<12x12xf32> to vector<12xf32>
    %79 = vector.shape_cast %78 : vector<12xf32> to vector<12x1xf32>
    %80 = tpu.reciprocal %79 {approx = true} : vector<12x1xf32> -> vector<12x1xf32>
    %81 = vector.broadcast %80 : vector<12x1xf32> to vector<12x12xf32>
    %82 = arith.mulf %77, %81 : vector<12x12xf32>
    %83 = arith.truncf %82 : vector<12x12xf32> to vector<12x12xbf16>
    %cst_31 = arith.constant dense<0.000000e+00> : vector<12x8xf32>
    %84 = tpu.matmul %83, %70, %cst_31 {dimension_numbers = #tpu.dot_dimension_numbers<[1], [0], [0], [1], [0, 0, 1, 1], [], []>} : vector<12x12xbf16>, vector<12x8xbf16>, vector<12x8xf32> -> vector<12x8xf32>
    %85 = arith.truncf %84 : vector<12x8xf32> to vector<12x8xbf16>
    %c0_32 = arith.constant 0 : index
    %c16 = arith.constant 16 : index
    %86 = vector.load %arg13[%c0_32, %c16] : memref<12x32xbf16, #tpu.memory_space<vmem>>, vector<12x8xbf16>
    tpu.vector_store %arg13[%c0_32, %c16], %85 {strides = array<i32>} : memref<12x32xbf16, #tpu.memory_space<vmem>>, vector<12x8xbf16>,
    %87 = vector.extract_strided_slice %14 {offsets = [0, 24], sizes = [12, 8], strides = [1, 1]} : vector<12x32xbf16> to vector<12x8xbf16>
    %88 = vector.extract_strided_slice %21 {offsets = [0, 24], sizes = [12, 8], strides = [1, 1]} : vector<12x64xbf16> to vector<12x8xbf16>
    %89 = vector.extract_strided_slice %21 {offsets = [0, 56], sizes = [12, 8], strides = [1, 1]} : vector<12x64xbf16> to vector<12x8xbf16>
    %cst_33 = arith.constant dense<0.000000e+00> : vector<12x12xf32>
    %90 = tpu.matmul %87, %88, %cst_33 {dimension_numbers = #tpu.dot_dimension_numbers<[1], [1], [0], [0], [0, 0, 1, 0], [], []>} : vector<12x8xbf16>, vector<12x8xbf16>, vector<12x12xf32> -> vector<12x12xf32>
    %91 = arith.addf %90, %29 : vector<12x12xf32>
    %cst_34 = arith.constant dense<0xFF800000> : vector<12xf32>
    %92 = vector.multi_reduction <maximumf>, %91, %cst_34 [1] : vector<12x12xf32> to vector<12xf32>
    %93 = vector.shape_cast %92 : vector<12xf32> to vector<12x1xf32>
    %94 = vector.broadcast %93 : vector<12x1xf32> to vector<12x12xf32>
    %95 = arith.subf %91, %94 : vector<12x12xf32>
    %96 = math.exp %95 : vector<12x12xf32>
    %cst_35 = arith.constant dense<0.000000e+00> : vector<12xf32>
    %97 = vector.multi_reduction <add>, %96, %cst_35 [1] : vector<12x12xf32> to vector<12xf32>
    %98 = vector.shape_cast %97 : vector<12xf32> to vector<12x1xf32>
    %99 = tpu.reciprocal %98 {approx = true} : vector<12x1xf32> -> vector<12x1xf32>
    %100 = vector.broadcast %99 : vector<12x1xf32> to vector<12x12xf32>
    %101 = arith.mulf %96, %100 : vector<12x12xf32>
    %102 = arith.truncf %101 : vector<12x12xf32> to vector<12x12xbf16>
    %cst_36 = arith.constant dense<0.000000e+00> : vector<12x8xf32>
    %103 = tpu.matmul %102, %89, %cst_36 {dimension_numbers = #tpu.dot_dimension_numbers<[1], [0], [0], [1], [0, 0, 1, 1], [], []>} : vector<12x12xbf16>, vector<12x8xbf16>, vector<12x8xf32> -> vector<12x8xf32>
    %104 = arith.truncf %103 : vector<12x8xf32> to vector<12x8xbf16>
    %c0_37 = arith.constant 0 : index
    %c24 = arith.constant 24 : index
    %105 = vector.load %arg13[%c0_37, %c24] : memref<12x32xbf16, #tpu.memory_space<vmem>>, vector<12x8xbf16>
    tpu.vector_store %arg13[%c0_37, %c24], %104 {strides = array<i32>} : memref<12x32xbf16, #tpu.memory_space<vmem>>, vector<12x8xbf16>,
    %c0_38 = arith.constant 0 : index
    %c0_39 = arith.constant 0 : index
    %106 = vector.load %arg13[%c0_38, %c0_39] : memref<12x32xbf16, #tpu.memory_space<vmem>>, vector<12x32xbf16>
    %c0_40 = arith.constant 0 : index
    %c0_41 = arith.constant 0 : index
    %107 = vector.load %arg8[%c0_40, %c0_41] : memref<32x32xbf16, #tpu.memory_space<vmem>>, vector<32x32xbf16>
    %cst_42 = arith.constant dense<0.000000e+00> : vector<12x32xf32>
    %108 = tpu.matmul %106, %107, %cst_42 {dimension_numbers = #tpu.dot_dimension_numbers<[1], [0], [0], [1], [0, 0, 1, 1], [], []>} : vector<12x32xbf16>, vector<32x32xbf16>, vector<12x32xf32> -> vector<12x32xf32>
    %c0_43 = arith.constant 0 : index
    %c0_44 = arith.constant 0 : index
    %109 = vector.load %arg9[%c0_43, %c0_44] : memref<1x32xf32, #tpu.memory_space<vmem>>, vector<1x32xf32>
    %110 = vector.broadcast %109 : vector<1x32xf32> to vector<12x32xf32>
    %111 = arith.addf %108, %110 : vector<12x32xf32>
    %112 = arith.addf %5, %111 : vector<12x32xf32>
    %cst_45 = arith.constant dense<0.000000e+00> : vector<12xf32>
    %113 = vector.multi_reduction <add>, %112, %cst_45 [1] : vector<12x32xf32> to vector<12xf32>
    %114 = vector.shape_cast %113 : vector<12xf32> to vector<12x1xf32>
    %cst_46 = arith.constant 3.200000e+01 : f32
    %115 = vector.broadcast %cst_46 : f32 to vector<12x1xf32>
    %116 = arith.divf %114, %115 : vector<12x1xf32>
    %117 = vector.broadcast %116 : vector<12x1xf32> to vector<12x32xf32>
    %118 = arith.subf %112, %117 : vector<12x32xf32>
    %119 = arith.mulf %118, %118 : vector<12x32xf32>
    %cst_47 = arith.constant dense<0.000000e+00> : vector<12xf32>
    %120 = vector.multi_reduction <add>, %119, %cst_47 [1] : vector<12x32xf32> to vector<12xf32>
    %121 = vector.shape_cast %120 : vector<12xf32> to vector<12x1xf32>
    %cst_48 = arith.constant 3.200000e+01 : f32
    %122 = vector.broadcast %cst_48 : f32 to vector<12x1xf32>
    %123 = arith.divf %121, %122 : vector<12x1xf32>
    %124 = vector.broadcast %116 : vector<12x1xf32> to vector<12x32xf32>
    %125 = arith.subf %112, %124 : vector<12x32xf32>
    %cst_49 = arith.constant 9.99999974E-6 : f32
    %126 = vector.broadcast %cst_49 : f32 to vector<12x1xf32>
    %127 = arith.addf %123, %126 : vector<12x1xf32>
    %128 = math.rsqrt %127 : vector<12x1xf32>
    %129 = vector.broadcast %128 : vector<12x1xf32> to vector<12x32xf32>
    %130 = arith.mulf %125, %129 : vector<12x32xf32>
    %c0_50 = arith.constant 0 : index
    %c0_51 = arith.constant 0 : index
    %131 = vector.load %arg10[%c0_50, %c0_51] : memref<1x32xf32, #tpu.memory_space<vmem>>, vector<1x32xf32>
    %132 = vector.broadcast %131 : vector<1x32xf32> to vector<12x32xf32>
    %133 = arith.mulf %130, %132 : vector<12x32xf32>
    %c0_52 = arith.constant 0 : index
    %c0_53 = arith.constant 0 : index
    %134 = vector.load %arg11[%c0_52, %c0_53] : memref<1x32xf32, #tpu.memory_space<vmem>>, vector<1x32xf32>
    %135 = vector.broadcast %134 : vector<1x32xf32> to vector<12x32xf32>
    %136 = arith.addf %133, %135 : vector<12x32xf32>
    %c0_54 = arith.constant 0 : index
    %c0_55 = arith.constant 0 : index
    %c0_56 = arith.constant 0 : index
    %137 = vector.load %arg12[%c0_54, %c0_55, %c0_56] : memref<1x12x32xf32, #tpu.memory_space<vmem>>, vector<1x12x32xf32>
    %138 = vector.shape_cast %137 : vector<1x12x32xf32> to vector<12x32xf32>
    %139 = vector.shape_cast %136 : vector<12x32xf32> to vector<1x12x32xf32>
    tpu.vector_store %arg12[%c0_54, %c0_55, %c0_56], %139 {strides = array<i32>} : memref<1x12x32xf32, #tpu.memory_space<vmem>>, vector<1x12x32xf32>,
    return
  }
  func.func @transform_0(%arg0: i32, %arg1: i32) -> (i32, i32, i32) {
    %c0_i32 = arith.constant 0 : i32
    %c0_i32_0 = arith.constant 0 : i32
    %c0_i32_1 = arith.constant 0 : i32
    return %arg0, %c0_i32, %c0_i32_0 : i32, i32, i32
  }
  func.func @transform_1(%arg0: i32, %arg1: i32) -> (i32, i32, i32) {
    %c0_i32 = arith.constant 0 : i32
    %c0_i32_0 = arith.constant 0 : i32
    %c0_i32_1 = arith.constant 0 : i32
    return %arg0, %c0_i32, %c0_i32_0 : i32, i32, i32
  }
  func.func @transform_2(%arg0: i32, %arg1: i32) -> (i32, i32) {
    %c0_i32 = arith.constant 0 : i32
    %c0_i32_0 = arith.constant 0 : i32
    %c0_i32_1 = arith.constant 0 : i32
    return %c0_i32, %c0_i32_0 : i32, i32
  }
  func.func @transform_3(%arg0: i32, %arg1: i32) -> (i32, i32) {
    %c0_i32 = arith.constant 0 : i32
    %c0_i32_0 = arith.constant 0 : i32
    %c0_i32_1 = arith.constant 0 : i32
    return %c0_i32, %c0_i32_0 : i32, i32
  }
  func.func @transform_4(%arg0: i32, %arg1: i32) -> (i32, i32) {
    %c0_i32 = arith.constant 0 : i32
    %c0_i32_0 = arith.constant 0 : i32
    %c0_i32_1 = arith.constant 0 : i32
    return %c0_i32, %c0_i32_0 : i32, i32
  }
  func.func @transform_5(%arg0: i32, %arg1: i32) -> (i32, i32) {
    %c0_i32 = arith.constant 0 : i32
    %c0_i32_0 = arith.constant 0 : i32
    %c0_i32_1 = arith.constant 0 : i32
    return %c0_i32, %c0_i32_0 : i32, i32
  }
  func.func @transform_6(%arg0: i32, %arg1: i32) -> (i32, i32) {
    %c0_i32 = arith.constant 0 : i32
    %c0_i32_0 = arith.constant 0 : i32
    %c0_i32_1 = arith.constant 0 : i32
    return %c0_i32, %c0_i32_0 : i32, i32
  }
  func.func @transform_7(%arg0: i32, %arg1: i32) -> (i32, i32) {
    %c0_i32 = arith.constant 0 : i32
    %c0_i32_0 = arith.constant 0 : i32
    %c0_i32_1 = arith.constant 0 : i32
    return %c0_i32, %c0_i32_0 : i32, i32
  }
  func.func @transform_8(%arg0: i32, %arg1: i32) -> (i32, i32) {
    %c0_i32 = arith.constant 0 : i32
    %c0_i32_0 = arith.constant 0 : i32
    %c0_i32_1 = arith.constant 0 : i32
    return %c0_i32, %c0_i32_0 : i32, i32
  }
  func.func @transform_9(%arg0: i32, %arg1: i32) -> (i32, i32) {
    %c0_i32 = arith.constant 0 : i32
    %c0_i32_0 = arith.constant 0 : i32
    %c0_i32_1 = arith.constant 0 : i32
    return %c0_i32, %c0_i32_0 : i32, i32
  }
  func.func @transform_10(%arg0: i32, %arg1: i32) -> (i32, i32, i32) {
    %c0_i32 = arith.constant 0 : i32
    %c0_i32_0 = arith.constant 0 : i32
    return %arg0, %arg1, %c0_i32 : i32, i32, i32
  }
}

</mosaic_0001>

<bundles_post_ra>
// kernel: custom-call.4
= control target key start
LH: loop header
LB: loop body
LE: loop exit
PB: predicated region body
PF: predicated region fallthrough
CT: control target
= control target key end

     0   :  { %s6_s0 = inlined_call_operand.vmem [shape: u32[2,12], index: 0, kind: output, shape index: {}]  }

// kernel: musemorphose_forward.15
= control target key start
LH: loop header
LB: loop body
LE: loop exit
PB: predicated region body
PF: predicated region fallthrough
CT: control target
= control target key end

     0   :  { %v108_v0 = vmov 0.0   ;;  %vm109_vm0 = vmmov 0   ;;  %vm40_vm1 = vcmask 261120   ;;  %s145_s1 = inlined_call_operand.vmem [shape: bf16[32,128], index: 1, kind: input, shape index: {}]   ;;  %s146_s0 = inlined_call_operand.vmem [shape: f32[4,32], index: 0, kind: input, shape index: {}]   ;;  %s147_s2 = inlined_call_operand.vmem [shape: f32[1,128], index: 2, kind: input, shape index: {}]   ;;  %s148_s3 = inlined_call_operand.vmem [shape: f32[4,128], index: 3, kind: output, shape index: {}]  }
   0x1   :  { %96 = vmatprep.subr.bf16.mxu0 %v108_v0  ;;  %v106_v1 = vld [vmem:[%s145_s1] sm:$0xff]   ;;  %100 = vmatprep.mubr.msk.bf16.mxu0 %vm109_vm0, %v108_v0  ;;  %v107_v2 = vld [vmem:[%s145_s1 + $0x8] sm:$0xff]  }
   0x2   :  { %97 = vmatpush3.bf16.msra.mxu0 %v106_v1  ;;  %v15_v3 = vld [vmem:[%s146_s0] sm:$0xf] }
   0x3   :  { %98 = vmatprep.subr.bf16.mxu0 %v108_v0  ;;  %v16_v4 = vpack.c.bf16 %v15_v3, %v15_v3  ;;  %v89_v5 = vld [vmem:[%s147_s2] ss:$0 sm:$0xff] }
   0x6   :  { %99 = vmatpush3.bf16.msra.mxu0 %v107_v2 }
   0x9   :  { %101 = vmatmul.mubr.msk.bf16.vlgmr.msra.gmra.mrb[0].mxu0 %vm40_vm1, %v16_v4 }
  0xdc   :  { %v78_v6 = vpop.f32.mrb[0].mxu0 }
  0xdd   :  { %v79_v7 = vadd.f32 %v89_v5, %v78_v6  ;;  %v102_v8 = vpop.f32.mrb[1].mxu0 }
  0xde   :  { %v81_v9 = vpop.f32.mrb[2].mxu0 }
  0xdf   :  { %84 = vst [vmem:[%s148_s3] sm:$0xf] %v79_v7  ;;  %v103_v10 = vpop.f32.mrb[3].mxu0 }

// kernel: squeeze.5
= control target key start
LH: loop header
LB: loop body
LE: loop exit
PB: predicated region body
PF: predicated region fallthrough
CT: control target
= control target key end

     0   :  { %vm7_vm0 = vcmask 97280   ;;  %s39_s0 = inlined_call_operand.vmem [shape: s32[24], index: 0, kind: input, shape index: {}]   ;;  %s40_s1 = inlined_call_operand.vmem [shape: s32[2,12], index: 1, kind: output, shape index: {}]  }
   0x1   :  { %v4_v0 = vld [vmem:[%s39_s0] sm:$0x1]  ;;  %s22_s0 = smov 116  }
   0x2   :  { %5 = vst [vmem:[#allocation1] sm:$0x1] %v4_v0 }
   0x9   :  { %v9_v1 = vld [vmem:[#allocation1] sm:$0x1]  }
   0xa   :  { %v6_v2 = vld [vmem:[#allocation1] sm:$0x1]   ;;  %10 = vrot.lane.b32.xlu0 %v9_v1, %s22_s0 }
   0xb   :  { %8 = vst.msk [vmem:[#allocation0] sm:$0x1] %vm7_vm0, %v6_v2  }
  0x7c   :  { %v11_v3 = vpop.permute.xlu0 %10  }
  0x7d   :  { %14 = vst.msk [vmem:[#allocation0 + $0x1] sm:$0x1] %vm7_vm0, %v11_v3  }
  0x84   :  { %v18_v4 = vld [vmem:[#allocation0] sm:$0x3] }
  0x85   :  { %20 = vst [vmem:[%s40_s1] sm:$0x3] %v18_v4 }

// kernel: musemorphose_forward.11
= control target key start
LH: loop header
LB: loop body
LE: loop exit
PB: predicated region body
PF: predicated region fallthrough
CT: control target
= control target key end

     0   :  { %s1404_s30 = smov 0   ;;  %s1406_s10 = smov 0   ;;  %s1558_s0 = inlined_call_operand.vmem [shape: f32[4,8,32], index: 0, kind: input, shape index: {}]   ;;  %s1559_s1 = inlined_call_operand.vmem [shape: bf16[32,32], index: 1, kind: input, shape index: {}]   ;;  %s1560_s2 = inlined_call_operand.vmem [shape: bf16[32,64], index: 2, kind: input, shape index: {}]   ;;  %s1561_s3 = inlined_call_operand.vmem [shape: f32[1,32], index: 3, kind: input, shape index: {}]   ;;  %s1562_s4 = inlined_call_operand.vmem [shape: f32[1,64], index: 4, kind: input, shape index: {}]   ;;  %s1563_s5 = inlined_call_operand.vmem [shape: bf16[32,32], index: 5, kind: input, shape index: {}]   ;;  %s1564_s6 = inlined_call_operand.vmem [shape: f32[1,32], index: 6, kind: input, shape index: {}]   ;;  %s1565_s7 = inlined_call_operand.vmem [shape: f32[1,32], index: 7, kind: input, shape index: {}]   ;;  %s1566_s8 = inlined_call_operand.vmem [shape: f32[1,32], index: 8, kind: input, shape index: {}]   ;;  %s1567_s9 = inlined_call_operand.vmem [shape: f32[4,8,32], index: 9, kind: output, shape index: {}]  }
   0x1   :  { %s1408_s11 = smov 0  }
   0x2 LB: > { %s31_s12 = sadd.s32 1, %s1336_s10  ;;  %p1128_p0 = scmp.ge.s32.totalorder %s1340_s11, 1  ;;  %s1340_s11 = sphi %s1408_s11, %s19_s11   ;;  %s1336_s10 = sphi %s1406_s10, %s1569_s10   ;;  %s1332_s30 = sphi %s1404_s30, %s1568_s30  }
   0x3   : > { %p33_p1 = scmp.ge.s32.totalorder %s31_s12, 4  ;;  %p300_p2 = scmp.lt.s32.totalorder %s1340_s11, 5 }
   0x5   : > { %s1571_s12 = smov (%p33_p1, %s31_s12), 0  ;;  %p301_p3 = pnand %p1128_p0, %p300_p2 }
   0x6   : > { %v1294_v0 = vld [vmem:[%s1560_s2] sm:$0xff] (!%p301_p3)   ;;  %v1342_v1 = vmov (!%p301_p3), 0.0   ;;  %v1296_v3 = vld [vmem:[%s1560_s2 + $0x8] sm:$0xff] (!%p301_p3)   ;;  %vm1343_vm0 = vmmov (!%p301_p3), 0   ;;  %p337_p4 = scmp.lt.s32.totalorder (!%p301_p3), %s1332_s30, 3  ;;  %vm374_vm1 = vcmask (!%p301_p3), 261120  }
   0x7   : > { %304 = sbr.rel (%p301_p3) target bundleno = 1779 (0x6f3), region = 56  ;;  %1194 = vmatprep.subr.bf16.mxu1 (!%p301_p3), %v1342_v1  ;;  %1186 = vmatprep.subr.bf16.mxu0 (!%p301_p3), %v1342_v1  ;;  %v1295_v2 = vld [vmem:[%s1559_s1] sm:$0xff] (!%p301_p3)   ;;  %v1297_v4 = vld [vmem:[%s1559_s1 + $0x8] sm:$0xff] (!%p301_p3)   ;;  %vm484_vm2 = vcmask (!%p301_p3), 64512   ;;  %s1344_s29 = smov (!%p301_p3), 112   ;;  %vm549_vm3 = vcmask (!%p301_p3), 1043456  }
   0x8   : > { %1195 = vmatpush3.bf16.msra.mxu1 (!%p301_p3), %v1294_v0  ;;  %1198 = vmatprep.mubr.msk.bf16.mxu1 (!%p301_p3), %vm1343_vm0, %v1342_v1  ;;  %v1135_v7 = vld [vmem:[%s1562_s4] ss:$0 sm:$0xff] (!%p301_p3)  ;;  %s1345_s13 = smov (!%p301_p3), 120   ;;  %s1346_s14 = smov (!%p301_p3), 104   ;;  %vm594_vm4 = vcmask (!%p301_p3), 60416   ;;  %vm714_vm5 = vcmask (!%p301_p3), 126016  }
   0x9   : > { %1187 = vmatpush3.bf16.msra.mxu0 (!%p301_p3), %v1295_v2  ;;  %1196 = vmatprep.subr.bf16.mxu1 (!%p301_p3), %v1342_v1  ;;  %v1131_v8 = vld [vmem:[%s1561_s3] ss:$0 sm:$0xff] (!%p301_p3)  ;;  %s1347_s15 = smov (!%p301_p3), 96   ;;  %s1348_s16 = smov (!%p301_p3), 80   ;;  %vm833_vm6 = vcmask (!%p301_p3), 191616   ;;  %vm952_vm7 = vcmask (!%p301_p3), 257216  }
   0xa   : > { %1188 = vmatprep.subr.bf16.mxu0 (!%p301_p3), %v1342_v1  ;;  %1190 = vmatprep.mubr.msk.bf16.mxu0 (!%p301_p3), %vm1343_vm0, %v1342_v1  ;;  %s1349_s17 = smov (!%p301_p3), 72   ;;  %s1350_s18 = smov (!%p301_p3), 88  }
   0xb   : > { %s1351_s19 = smov (!%p301_p3), 8   ;;  %s1352_s25 = smov (!%p301_p3), 16  }
   0xc   : > { %1197 = vmatpush3.bf16.msra.mxu1 (!%p301_p3), %v1296_v3  ;;  %s1353_s26 = smov (!%p301_p3), 24  }
   0xd   : > { %1189 = vmatpush3.bf16.msra.mxu0 (!%p301_p3), %v1297_v4  ;;  %1208 = vmatprep.subr.bf16.mxu1 (!%p301_p3), %v1342_v1 }
   0xe   : > { %s1573_s30 = smov (!%p337_p4, %s1332_s30), 3  ;;  %1202 = vmatprep.subr.bf16.mxu0 %v1342_v1 }
   0xf   : > { %s1129_s21 = sshll.u32 %s1573_s30, 3 }
  0x10   : > { %s340_s24 = scalar_lea.vmem %s1558_s0, %s1129_s21 }
  0x11   : > { %v1451_v5 = vld [vmem:[%s340_s24] sm:$0xff] }
  0x12   : > { %v350_v6 = vpack.c.bf16 %v1451_v5, %v1451_v5 }
  0x14   : > { %1199 = vmatmul.mubr.msk.bf16.vlgmr.msra.gmra.mrb[0].mxu1 %vm374_vm1, %v350_v6  ;;  %1191 = vmatmul.mubr.msk.bf16.vlgmr.msra.gmra.mrb[0].mxu0 %vm374_vm1, %v350_v6 }
  0x15   : > { %1204 = vmatprep.mubr.msk.bf16.mxu0 %vm1343_vm0, %v1342_v1  ;;  %1210 = vmatprep.mubr.msk.bf16.mxu1 %vm1343_vm0, %v1342_v1 }
  0xe7   : > { %v477_v9 = vpop.f32.mrb[0].mxu1  ;;  %v412_v10 = vpop.f32.mrb[0].mxu0 }
  0xe8   : > { %v478_v11 = vadd.f32 %v1135_v7, %v477_v9  ;;  %v1200_v12 = vpop.f32.mrb[1].mxu1  ;;  %v413_v13 = vadd.f32 %v1131_v8, %v412_v10  ;;  %v1192_v14 = vpop.f32.mrb[1].mxu0 }
  0xe9   : > { %v480_v15 = vpop.f32.mrb[2].mxu1  ;;  %v415_v16 = vpop.f32.mrb[2].mxu0 }
  0xea   : > { %v1468_v17 = vpack.c.bf16 %v478_v11, %v478_v11  ;;  %v418_v18 = vmul.f32 0.35355338, %v413_v13  ;;  %v1201_v19 = vpop.f32.mrb[3].mxu1  ;;  %v1193_v20 = vpop.f32.mrb[3].mxu0 }
  0xec   : > { %v419_v21 = vpack.c.bf16 %v418_v18, %v418_v18  ;;  %718 = vrot.lane.b32.xlu1 %v1468_v17, %s1344_s29  ;;  %599 = vrot.lane.b32.xlu0 %v1468_v17, %s1345_s13  ;;  %v489_v22 = vsel %vm484_vm2, %v1468_v17, 0 }
  0xed   : > { %1203 = vmatpush3.bf16.xpose.msra.mxu0 %v489_v22 }
  0xee   : > { %1214 = vmatprep.subr.bf16.mxu0 %v1342_v1 }
  0xf0   : > { %716 = vrot.lane.b32.xlu1 %v419_v21, %s1344_s29  ;;  %597 = vrot.lane.b32.xlu0 %v419_v21, %s1345_s13 }
  0xf4   : > { %835 = vrot.lane.b32.xlu1 %v419_v21, %s1346_s14  ;;  %837 = vrot.lane.b32.xlu0 %v1468_v17, %s1346_s14 }
  0xf5   : > { %1205 = vmatmul.mubr.msk.bf16.vlgmr.msra.gmra.mrb[4].mxu0 %vm484_vm2, %v419_v21 }
  0xf6   : > { %1216 = vmatprep.mubr.msk.bf16.mxu0 %vm1343_vm0, %v1342_v1 }
 0x15e   : > { %v600_v23 = vpop.permute.xlu0 %599  ;;  %v719_v25 = vpop.permute.xlu1 %718 }
 0x15f   : > { %v605_v24 = vsel %vm484_vm2, %v600_v23, 0  ;;  %v724_v27 = vsel %vm484_vm2, %v719_v25, 0 }
 0x160   : > { %1215 = vmatpush3.bf16.xpose.msra.mxu0 %v605_v24 }
 0x161   : > { %1226 = vmatprep.subr.bf16.mxu0 %v1342_v1 }
 0x162   : > { %v598_v26 = vpop.permute.xlu0 %597  ;;  %v717_v29 = vpop.permute.xlu1 %716 }
 0x166   : > { %v838_v28 = vpop.permute.xlu0 %837  ;;  %v836_v31 = vpop.permute.xlu1 %835 }
 0x167   : > { %1217 = vmatmul.mubr.msk.bf16.vlgmr.msra.gmra.mrb[8].mxu0 %vm484_vm2, %v598_v26  ;;  %v843_v30 = vsel %vm484_vm2, %v838_v28, 0 }
 0x168   : > { %1227 = vmatpush3.bf16.xpose.msra.mxu0 %v724_v27  ;;  %1228 = vmatprep.mubr.msk.bf16.mxu0 %vm1343_vm0, %v1342_v1 }
 0x169   : > { %1238 = vmatprep.subr.bf16.mxu0 %v1342_v1 }
 0x16f   : > { %1229 = vmatmul.mubr.msk.bf16.vlgmr.msra.gmra.mrb[12].mxu0 %vm484_vm2, %v717_v29 }
 0x170   : > { %1239 = vmatpush3.bf16.xpose.msra.mxu0 %v843_v30  ;;  %1240 = vmatprep.mubr.msk.bf16.mxu0 %vm1343_vm0, %v1342_v1 }
 0x171   : > { %1250 = vmatprep.subr.bf16.mxu0 %v1342_v1 }
 0x177   : > { %1241 = vmatmul.mubr.msk.bf16.vlgmr.msra.gmra.mrb[16].mxu0 %vm484_vm2, %v836_v31 }
 0x178   : > { %1254 = vmatprep.mubr.msk.bf16.mxu0 %vm1343_vm0, %v1342_v1 }
 0x1c8   : > { %v525_v32 = vpop.f32.mrb[4].mxu0 }
 0x1c9   : > { %v1206_v33 = vpop.f32.mrb[5].mxu0  ;;  %v531_v34 = vsel %vm484_vm2, %v525_v32, -inf }
 0x1ca   : > { %532 = vmax.xlane.f32.xlu0 %v531_v34  ;;  %v528_v35 = vpop.f32.mrb[6].mxu0 }
 0x1cb   : > { %v1207_v36 = vpop.f32.mrb[7].mxu0 }
 0x23a   : > { %v641_v37 = vpop.f32.mrb[8].mxu0 }
 0x23b   : > { %v1218_v38 = vpop.f32.mrb[9].mxu0  ;;  %v647_v39 = vsel %vm484_vm2, %v641_v37, -inf }
 0x23c   : > { %648 = vmax.xlane.f32.xlu1 %v647_v39  ;;  %v644_v40 = vpop.f32.mrb[10].mxu0 }
 0x23d   : > { %v1219_v41 = vpop.f32.mrb[11].mxu0 }
 0x242   : > { %v760_v42 = vpop.f32.mrb[12].mxu0 }
 0x243   : > { %v1230_v43 = vpop.f32.mrb[13].mxu0  ;;  %v766_v44 = vsel %vm484_vm2, %v760_v42, -inf }
 0x244   : > { %767 = vmax.xlane.f32.xlu0 %v766_v44  ;;  %v763_v45 = vpop.f32.mrb[14].mxu0  ;;  %v1298_v44 = vld [vmem:[%s1563_s5] sm:$0xff]  }
 0x245   : > { %v1231_v46 = vpop.f32.mrb[15].mxu0  ;;  %1251 = vmatpush3.bf16.msra.mxu0 %v1298_v44 }
 0x246   : > { %v1299_v46 = vld [vmem:[%s1563_s5 + $0x8] sm:$0xff]   ;;  %1252 = vmatprep.subr.bf16.mxu0 %v1342_v1 }
 0x249   : > { %1253 = vmatpush3.bf16.msra.mxu0 %v1299_v46 }
 0x24a   : > { %v879_v47 = vpop.f32.mrb[16].mxu0 }
 0x24b   : > { %v1242_v48 = vpop.f32.mrb[17].mxu0  ;;  %v885_v49 = vsel %vm484_vm2, %v879_v47, -inf }
 0x24c   : > { %886 = vmax.xlane.f32.xlu0 %v885_v49  ;;  %v882_v50 = vpop.f32.mrb[18].mxu0 }
 0x24d   : > { %v1243_v51 = vpop.f32.mrb[19].mxu0 }
 0x257   : > { %v533_v52 = vpop.xlane.xlu0 %532 }
 0x258   : > { %v534_v53 = vsub.f32 %v525_v32, %v533_v52 }
 0x25a   : > { %v535_v54 = vmul.f32 1.442695, %v534_v53 }
 0x25c   : > { %1300 = vpow2.f32 %v535_v54 }
 0x266   : > { %v1301_v55 = vpop.eup %1300 }
 0x267   : > { %v537_v56 = vsel %vm484_vm2, %v1301_v55, 0.0 }
 0x268   : > { %538 = vadd.xlane.f32.xlu1 %v537_v56 }
 0x279   : > { %544 = vrot.lane.b32.xlu1 %v1468_v17, %s1347_s15 }
 0x2c9   : > { %v649_v57 = vpop.xlane.xlu1 %648 }
 0x2ca   : > { %v650_v58 = vsub.f32 %v641_v37, %v649_v57 }
 0x2cc   : > { %v651_v59 = vmul.f32 1.442695, %v650_v58 }
 0x2ce   : > { %1302 = vpow2.f32 %v651_v59  ;;  %v1150_v59 = vld [vmem:[%s1564_s6] ss:$0 sm:$0xff] }
 0x2d1   : > { %v768_v60 = vpop.xlane.xlu0 %767 }
 0x2d2   : > { %v769_v61 = vsub.f32 %v760_v42, %v768_v60 }
 0x2d4   : > { %v770_v62 = vmul.f32 1.442695, %v769_v61 }
 0x2d6   : > { %1304 = vpow2.f32 %v770_v62 }
 0x2d8   : > { %v1303_v63 = vpop.eup %1302 }
 0x2d9   : > { %v887_v0 = vpop.xlane.xlu0 %886  ;;  %v653_v2 = vsel %vm484_vm2, %v1303_v63, 0.0 }
 0x2da   : > { %v888_v3 = vsub.f32 %v879_v47, %v887_v0  ;;  %654 = vadd.xlane.f32.xlu0 %v653_v2 }
 0x2dc   : > { %v889_v4 = vmul.f32 1.442695, %v888_v3 }
 0x2de   : > { %1306 = vpow2.f32 %v889_v4 }
 0x2e0   : > { %v1305_v6 = vpop.eup %1304 }
 0x2e1   : > { %v772_v7 = vsel %vm484_vm2, %v1305_v6, 0.0 }
 0x2e2   : > { %773 = vadd.xlane.f32.xlu1 %v772_v7 }
 0x2e8   : > { %v1307_v8 = vpop.eup %1306 }
 0x2e9   : > { %v891_v9 = vsel %vm484_vm2, %v1307_v8, 0.0 }
 0x2ea   : > { %892 = vadd.xlane.f32.xlu0 %v891_v9 }
 0x2f3   : > { %778 = vrot.lane.b32.xlu1 %v1468_v17, %s1348_s16 }
 0x2f5   : > { %v539_v10 = vpop.xlane.xlu1 %538 }
 0x2f6   : > { %1308 = vrcp.f32 %v539_v10 }
 0x2f7   : > { %897 = vrot.lane.b32.xlu1 %v1468_v17, %s1349_s17 }
 0x2f9   : > { %v545_v11 = vpop.permute.xlu1 %544 }
 0x2fa   : > { %v551_v12 = vsel %vm549_vm3, %v545_v11, 0 }
 0x2fb   : > { %1209 = vmatpush3.bf16.msra.mxu1 %v551_v12 }
 0x2fc   : > { %1220 = vmatprep.subr.bf16.mxu1 %v1342_v1 }
 0x300   : > { %v1309_v13 = vpop.eup %1308  ;;  %659 = vrot.lane.b32.xlu0 %v1468_v17, %s1350_s18  ;;  %s347_s18 = scalar_lea.vmem %s1567_s9, %s1129_s21 }
 0x301   : > { %v541_v14 = vmul.f32 %v1309_v13, %v1301_v55 }
 0x303   : > { %v542_v15 = vpack.c.bf16 %v541_v14, %v541_v14 }
 0x305   : > { %1211 = vmatmul.mubr.msk.bf16.vlgmr.msra.gmra.mrb[4].mxu1 %vm484_vm2, %v542_v15  ;;  %v1155_v15 = vld [vmem:[%s1566_s8] ss:$0 sm:$0xff] }
 0x306   : > { %1222 = vmatprep.mubr.msk.bf16.mxu1 %vm1343_vm0, %v1342_v1 }
 0x367   : > { %v655_v16 = vpop.xlane.xlu0 %654 }
 0x368   : > { %1310 = vrcp.f32 %v655_v16 }
 0x36f   : > { %v774_v18 = vpop.xlane.xlu1 %773 }
 0x370   : > { %1312 = vrcp.f32 %v774_v18 }
 0x372   : > { %v1311_v19 = vpop.eup %1310 }
 0x373   : > { %v657_v21 = vmul.f32 %v1311_v19, %v1303_v63  ;;  %v779_v24 = vpop.permute.xlu1 %778 }
 0x374   : > { %v784_v26 = vsel %vm549_vm3, %v779_v24, 0 }
 0x375   : > { %v658_v17 = vpack.c.bf16 %v657_v21, %v657_v21 }
 0x377   : > { %v893_v20 = vpop.xlane.xlu0 %892  ;;  %v898_v28 = vpop.permute.xlu1 %897 }
 0x378   : > { %1314 = vrcp.f32 %v893_v20  ;;  %v903_v31 = vsel %vm549_vm3, %v898_v28, 0 }
 0x37a   : > { %v1313_v25 = vpop.eup %1312 }
 0x37b   : > { %v660_v22 = vpop.permute.xlu0 %659  ;;  %v776_v27 = vmul.f32 %v1313_v25, %v1305_v6 }
 0x37c   : > { %v665_v23 = vsel %vm549_vm3, %v660_v22, 0 }
 0x37d   : > { %1221 = vmatpush3.bf16.msra.mxu1 %v665_v23  ;;  %v777_v29 = vpack.c.bf16 %v776_v27, %v776_v27 }
 0x37e   : > { %1232 = vmatprep.subr.bf16.mxu1 %v1342_v1 }
 0x380   : > { %1223 = vmatmul.mubr.msk.bf16.vlgmr.msra.gmra.mrb[8].mxu1 %vm484_vm2, %v658_v17 }
 0x381   : > { %1233 = vmatpush3.bf16.msra.mxu1 %v784_v26  ;;  %1234 = vmatprep.mubr.msk.bf16.mxu1 %vm1343_vm0, %v1342_v1 }
 0x382   : > { %1244 = vmatprep.subr.bf16.mxu1 %v1342_v1  ;;  %v1315_v30 = vpop.eup %1314 }
 0x383   : > { %v895_v32 = vmul.f32 %v1315_v30, %v1307_v8 }
 0x385   : > { %v896_v33 = vpack.c.bf16 %v895_v32, %v895_v32 }
 0x388   : > { %1235 = vmatmul.mubr.msk.bf16.vlgmr.msra.gmra.mrb[12].mxu1 %vm484_vm2, %v777_v29 }
 0x389   : > { %1245 = vmatpush3.bf16.msra.mxu1 %v903_v31  ;;  %1246 = vmatprep.mubr.msk.bf16.mxu1 %vm1343_vm0, %v1342_v1 }
 0x390   : > { %1247 = vmatmul.mubr.msk.bf16.vlgmr.msra.gmra.mrb[16].mxu1 %vm484_vm2, %v896_v33 }
 0x3d8   : > { %v587_v34 = vpop.f32.mrb[4].mxu1 }
 0x3d9   : > { %v593_v35 = vpack.c.bf16 %v587_v34, %v587_v34  ;;  %v1212_v36 = vpop.f32.mrb[5].mxu1 }
 0x3da   : > { %v590_v37 = vpop.f32.mrb[6].mxu1 }
 0x3db   : > { %595 = vst.msk [vmem:[#allocation2] sm:$0xf] %vm594_vm4, %v593_v35  ;;  %v1213_v38 = vpop.f32.mrb[7].mxu1 }
 0x453   : > { %v701_v39 = vpop.f32.mrb[8].mxu1 }
 0x454   : > { %v1158_v40 = vpack.c.bf16 %v701_v39, %v701_v39  ;;  %v1224_v41 = vpop.f32.mrb[9].mxu1 }
 0x455   : > { %v704_v42 = vpop.f32.mrb[10].mxu1 }
 0x456   : > { %711 = vrot.lane.b32.xlu0 %v1158_v40, %s1351_s19  ;;  %v1225_v43 = vpop.f32.mrb[11].mxu1 }
 0x45b   : > { %v820_v45 = vpop.f32.mrb[12].mxu1 }
 0x45c   : > { %v1159_v47 = vpack.c.bf16 %v820_v45, %v820_v45  ;;  %v1236_v48 = vpop.f32.mrb[13].mxu1 }
 0x45d   : > { %v823_v49 = vpop.f32.mrb[14].mxu1 }
 0x45e   : > { %830 = vrot.lane.b32.xlu1 %v1159_v47, %s1352_s25  ;;  %v1237_v50 = vpop.f32.mrb[15].mxu1 }
 0x463   : > { %v939_v51 = vpop.f32.mrb[16].mxu1 }
 0x464   : > { %v1160_v52 = vpack.c.bf16 %v939_v51, %v939_v51  ;;  %v1248_v53 = vpop.f32.mrb[17].mxu1 }
 0x465   : > { %v942_v54 = vpop.f32.mrb[18].mxu1 }
 0x466   : > { %949 = vrot.lane.b32.xlu0 %v1160_v52, %s1353_s26  ;;  %v1249_v55 = vpop.f32.mrb[19].mxu1 }
 0x4c8   : > { %v712_v56 = vpop.permute.xlu0 %711 }
 0x4c9   : > { %715 = vst.msk [vmem:[#allocation2] sm:$0xf] %vm714_vm5, %v712_v56 }
 0x4d0   : > { %v831_v57 = vpop.permute.xlu1 %830 }
 0x4d1   : > { %834 = vst.msk [vmem:[#allocation2] sm:$0xf] %vm833_vm6, %v831_v57 }
 0x4d8   : > { %v950_v1 = vpop.permute.xlu0 %949 }
 0x4d9   : > { %953 = vst.msk [vmem:[#allocation2] sm:$0xf] %vm952_vm7, %v950_v1 }
 0x4e0   : > { %v954_v58 = vld [vmem:[#allocation2] sm:$0xf] }
 0x4e1   : > { %1255 = vmatmul.mubr.msk.bf16.vlgmr.msra.gmra.mrb[20].mxu0 %vm374_vm1, %v954_v58 }
 0x5b4   : > { %v1015_v60 = vpop.f32.mrb[20].mxu0 }
 0x5b5   : > { %v1016_v61 = vadd.f32 %v1150_v59, %v1015_v60  ;;  %v1256_v62 = vpop.f32.mrb[21].mxu0 }
 0x5b6   : > { %v1018_v63 = vpop.f32.mrb[22].mxu0 }
 0x5b7   : > { %v1257_v0 = vpop.f32.mrb[23].mxu0  ;;  %v1021_v2 = vadd.f32 %v1016_v61, %v1451_v5  ;;  %v1154_v5 = vld [vmem:[%s1565_s7] ss:$0 sm:$0xff] }
 0x5b9   : > { %v1022_v3 = vsel %vm374_vm1, %v1021_v2, 0.0 }
 0x5ba   : > { %1023 = vadd.xlane.f32.xlu1 %v1022_v3 }
 0x647   : > { %v1024_v4 = vpop.xlane.xlu1 %1023 }
 0x648   : > { %v1026_v6 = vmul.f32 0.03125, %v1024_v4 }
 0x64a   : > { %v1027_v7 = vsub.f32 %v1021_v2, %v1026_v6 }
 0x64c   : > { %v1028_v8 = vmul.f32 %v1027_v7, %v1027_v7 }
 0x64e   : > { %v1029_v9 = vsel %vm374_vm1, %v1028_v8, 0.0 }
 0x64f   : > { %1030 = vadd.xlane.f32.xlu0 %v1029_v9 }
 0x6dc   : > { %v1031_v10 = vpop.xlane.xlu0 %1030 }
 0x6dd   : > { %v1032_v11 = vmul.f32 0.03125, %v1031_v10 }
 0x6df   : > { %v1033_v12 = vadd.f32 1e-05, %v1032_v11 }
 0x6e1   : > { %1316 = vrsqrt.f32 %v1033_v12 }
 0x6eb   : > { %v1317_v13 = vpop.eup %1316 }
 0x6ec   : > { %v1035_v14 = vmul.f32 %v1317_v13, %v1027_v7 }
 0x6ee   : > { %v1043_v16 = vmul.f32 %v1154_v5, %v1035_v14 }
 0x6f0   : > { %v1051_v18 = vadd.f32 %v1155_v15, %v1043_v16 }
 0x6f2   : > { %1052 = vst.msk [vmem:[%s347_s18] sm:$0xff] %vm374_vm1, %v1051_v18 }
 0x6f3 PF: > { %s19_s11 = sadd.s32 1, %s1340_s11   ;;  %s1568_s30 = smov %s1336_s10 }
 0x6f4   : > { %p16_p5 = scmp.ge.s32.totalorder %s19_s11, 6   ;;  %s1569_s10 = smov %s1571_s12 }
 0x6f6   :  { %18 = sbr.rel (!%p16_p5) target bundleno = 2 (0x2), region = 86 }

// kernel: musemorphose_forward.12
= control target key start
LH: loop header
LB: loop body
LE: loop exit
PB: predicated region body
PF: predicated region fallthrough
CT: control target
= control target key end

     0   :  { %vm56_vm0 = vcmask 261120   ;;  %vm157_vm1 = vcmask 523264   ;;  %s466_s1 = inlined_call_operand.vmem [shape: bf16[32,64], index: 1, kind: input, shape index: {}]   ;;  %s467_s0 = inlined_call_operand.vmem [shape: f32[32,32], index: 0, kind: input, shape index: {}]   ;;  %s468_s3 = inlined_call_operand.vmem [shape: bf16[64,32], index: 3, kind: input, shape index: {}]   ;;  %s469_s2 = inlined_call_operand.vmem [shape: f32[1,64], index: 2, kind: input, shape index: {}]   ;;  %s470_s4 = inlined_call_operand.vmem [shape: f32[1,32], index: 4, kind: input, shape index: {}]   ;;  %s471_s5 = inlined_call_operand.vmem [shape: f32[1,32], index: 5, kind: input, shape index: {}]   ;;  %s472_s6 = inlined_call_operand.vmem [shape: f32[1,32], index: 6, kind: input, shape index: {}]   ;;  %s473_s7 = inlined_call_operand.vmem [shape: f32[32,32], index: 7, kind: output, shape index: {}]  }
   0x1   :  { %v344_v0 = vld [vmem:[%s466_s1] sm:$0xff]   ;;  %v345_v1 = vld [vmem:[%s466_s1 + $0x8] sm:$0xff]   ;;  %v29_v4 = vld [vmem:[%s467_s0 + $0x10] sm:$0xff] }
   0x2   :  { %324 = vmatprep.subr.bf16.mxu0 %v344_v0  ;;  %v27_v2 = vld [vmem:[%s467_s0] sm:$0xff]  ;;  %v28_v3 = vld [vmem:[%s467_s0 + $0x8] sm:$0xff]  ;;  %v30_v6 = vld [vmem:[%s467_s0 + $0x18] sm:$0xff] }
   0x3   :  { %325 = vmatpush3.bf16.msra.mxu0 %v344_v0  ;;  %v31_v5 = vpack.c.bf16 %v28_v3, %v27_v2  ;;  %v346_v7 = vld [vmem:[%s468_s3] sm:$0xff]   ;;  %v347_v8 = vld [vmem:[%s468_s3 + $0x8] sm:$0xff]   ;;  %v32_v9 = vpack.c.bf16 %v30_v6, %v29_v4  ;;  %v348_v10 = vld [vmem:[%s468_s3 + $0x10] sm:$0xff]  }
   0x4   :  { %326 = vmatprep.subr.bf16.mxu0 %v345_v1  ;;  %332 = vmatprep.subr.bf16.mxu1 %v346_v7  ;;  %v349_v11 = vld [vmem:[%s468_s3 + $0x18] sm:$0xff]   ;;  %v300_v12 = vld [vmem:[%s469_s2] ss:$0 sm:$0xff] }
   0x5   :  { %328 = vmatprep.mubr.msk.bf16.mxu0 %vm56_vm0, %v31_v5  ;;  %333 = vmatpush3.bf16.msra.mxu1 %v346_v7  ;;  %v305_v27 = vld [vmem:[%s470_s4] ss:$0 sm:$0xff] }
   0x6   :  { %334 = vmatprep.subr.bf16.mxu1 %v347_v8 }
   0x7   :  { %327 = vmatpush3.bf16.msra.mxu0 %v345_v1 }
   0x9   :  { %335 = vmatpush3.bf16.msra.mxu1 %v347_v8 }
   0xa   :  { %329 = vmatmul.mubr.msk.bf16.vlgmr.msra.gmra.mrb[0].mxu0 %vm56_vm0, %v32_v9  ;;  %336 = vmatprep.subr.bf16.mxu1 %v348_v10 }
   0xd   :  { %337 = vmatpush3.bf16.msra.mxu1 %v348_v10 }
   0xe   :  { %338 = vmatprep.subr.bf16.mxu1 %v349_v11 }
  0x11   :  { %339 = vmatpush3.bf16.msra.mxu1 %v349_v11 }
  0xdd   :  { %v330_v13 = vpop.f32.mrb[0].mxu0 }
  0xde   :  { %v106_v14 = vadd.f32 %v330_v13, %v300_v12  ;;  %v97_v15 = vpop.f32.mrb[1].mxu0  ;;  %v312_v13 = vld [vmem:[%s471_s5] ss:$0 sm:$0xff] }
  0xdf   :  { %v98_v16 = vadd.f32 %v300_v12, %v97_v15  ;;  %v331_v17 = vpop.f32.mrb[2].mxu0  ;;  %v313_v15 = vld [vmem:[%s472_s6] ss:$0 sm:$0xff] }
  0xe0   :  { %v109_v18 = vadd.f32 %v331_v17, %v300_v12  ;;  %v100_v19 = vpop.f32.mrb[3].mxu0  ;;  %v114_v21 = vmax.f32 %v106_v14, 0.0 }
  0xe1   :  { %v101_v20 = vadd.f32 %v300_v12, %v100_v19  ;;  %v112_v23 = vmax.f32 %v98_v16, 0.0 }
  0xe2   :  { %v115_v22 = vmax.f32 %v109_v18, 0.0 }
  0xe3   :  { %v113_v24 = vmax.f32 %v101_v20, 0.0 }
  0xe4   :  { %v117_v25 = vpack.c.bf16 %v115_v22, %v114_v21 }
  0xe5   :  { %v116_v26 = vpack.c.bf16 %v113_v24, %v112_v23 }
  0xe7   :  { %340 = vmatprep.mubr.msk.bf16.mxu1 %vm157_vm1, %v116_v26 }
  0xe8   :  { %341 = vmatmul.mubr.msk.bf16.vlgmr.msra.gmra.mrb[0].mxu1 %vm157_vm1, %v117_v25 }
 0x1bb   :  { %v342_v28 = vpop.f32.mrb[0].mxu1 }
 0x1bc   :  { %v207_v29 = vadd.f32 %v342_v28, %v305_v27  ;;  %v198_v30 = vpop.f32.mrb[1].mxu1 }
 0x1bd   :  { %v199_v31 = vadd.f32 %v305_v27, %v198_v30  ;;  %v343_v32 = vpop.f32.mrb[2].mxu1 }
 0x1be   :  { %v210_v33 = vadd.f32 %v343_v32, %v305_v27  ;;  %v201_v34 = vpop.f32.mrb[3].mxu1  ;;  %v215_v35 = vadd.f32 %v207_v29, %v29_v4 }
 0x1bf   :  { %v202_v36 = vadd.f32 %v305_v27, %v201_v34  ;;  %v213_v37 = vadd.f32 %v199_v31, %v27_v2 }
 0x1c0   :  { %v223_v38 = vsel %vm56_vm0, %v215_v35, 0.0  ;;  %v216_v39 = vadd.f32 %v210_v33, %v30_v6 }
 0x1c1   :  { %224 = vadd.xlane.f32.xlu1 %v223_v38  ;;  %v217_v40 = vsel %vm56_vm0, %v213_v37, 0.0  ;;  %v214_v41 = vadd.f32 %v202_v36, %v28_v3 }
 0x1c2   :  { %218 = vadd.xlane.f32.xlu0 %v217_v40  ;;  %v226_v42 = vsel %vm56_vm0, %v216_v39, 0.0 }
 0x1c3   :  { %v220_v43 = vsel %vm56_vm0, %v214_v41, 0.0 }
 0x1c5   :  { %227 = vadd.xlane.f32.xlu1 %v226_v42 }
 0x1c6   :  { %221 = vadd.xlane.f32.xlu0 %v220_v43 }
 0x24e   :  { %v225_v44 = vpop.xlane.xlu1 %224 }
 0x24f   :  { %v232_v45 = vmul.f32 0.03125, %v225_v44  ;;  %v219_v46 = vpop.xlane.xlu0 %218 }
 0x250   :  { %v230_v47 = vmul.f32 0.03125, %v219_v46 }
 0x251   :  { %v236_v48 = vsub.f32 %v215_v35, %v232_v45 }
 0x252   :  { %v234_v49 = vsub.f32 %v213_v37, %v230_v47  ;;  %v228_v50 = vpop.xlane.xlu1 %227 }
 0x253   :  { %v233_v51 = vmul.f32 0.03125, %v228_v50  ;;  %v222_v52 = vpop.xlane.xlu0 %221  ;;  %v240_v58 = vmul.f32 %v236_v48, %v236_v48 }
 0x254   :  { %v231_v53 = vmul.f32 0.03125, %v222_v52  ;;  %v238_v54 = vmul.f32 %v234_v49, %v234_v49 }
 0x255   :  { %v237_v55 = vsub.f32 %v216_v39, %v233_v51  ;;  %v248_v60 = vsel %vm56_vm0, %v240_v58, 0.0 }
 0x256   :  { %v235_v56 = vsub.f32 %v214_v41, %v231_v53  ;;  %v242_v57 = vsel %vm56_vm0, %v238_v54, 0.0 }
 0x257   :  { %243 = vadd.xlane.f32.xlu0 %v242_v57  ;;  %v241_v62 = vmul.f32 %v237_v55, %v237_v55 }
 0x258   :  { %v239_v59 = vmul.f32 %v235_v56, %v235_v56 }
 0x259   :  { %v251_v63 = vsel %vm56_vm0, %v241_v62, 0.0 }
 0x25a   :  { %v245_v61 = vsel %vm56_vm0, %v239_v59, 0.0 }
 0x25b   :  { %249 = vadd.xlane.f32.xlu0 %v248_v60  ;;  %246 = vadd.xlane.f32.xlu1 %v245_v61 }
 0x25f   :  { %252 = vadd.xlane.f32.xlu1 %v251_v63 }
 0x2e4   :  { %v244_v0 = vpop.xlane.xlu0 %243 }
 0x2e5   :  { %v254_v1 = vmul.f32 0.03125, %v244_v0 }
 0x2e7   :  { %v258_v2 = vadd.f32 1e-05, %v254_v1 }
 0x2e8   :  { %v247_v3 = vpop.xlane.xlu1 %246  ;;  %v250_v4 = vpop.xlane.xlu0 %249 }
 0x2e9   :  { %350 = vrsqrt.f32 %v258_v2  ;;  %v255_v5 = vmul.f32 0.03125, %v247_v3  ;;  %v256_v6 = vmul.f32 0.03125, %v250_v4 }
 0x2eb   :  { %v259_v7 = vadd.f32 1e-05, %v255_v5  ;;  %v260_v8 = vadd.f32 1e-05, %v256_v6 }
 0x2ec   :  { %v253_v9 = vpop.xlane.xlu1 %252 }
 0x2ed   :  { %352 = vrsqrt.f32 %v259_v7  ;;  %v257_v10 = vmul.f32 0.03125, %v253_v9 }
 0x2ee   :  { %354 = vrsqrt.f32 %v260_v8 }
 0x2ef   :  { %v261_v11 = vadd.f32 1e-05, %v257_v10 }
 0x2f1   :  { %356 = vrsqrt.f32 %v261_v11 }
 0x2f3   :  { %v351_v12 = vpop.eup %350 }
 0x2f4   :  { %v266_v14 = vmul.f32 %v351_v12, %v234_v49 }
 0x2f6   :  { %v277_v16 = vmul.f32 %v312_v13, %v266_v14 }
 0x2f7   :  { %v353_v17 = vpop.eup %352 }
 0x2f8   :  { %v355_v18 = vpop.eup %354  ;;  %v288_v19 = vadd.f32 %v313_v15, %v277_v16  ;;  %v267_v20 = vmul.f32 %v353_v17, %v235_v56 }
 0x2f9   :  { %v268_v21 = vmul.f32 %v355_v18, %v236_v48 }
 0x2fa   :  { %292 = vst.msk [vmem:[%s473_s7] sm:$0xff] %vm56_vm0, %v288_v19  ;;  %v278_v22 = vmul.f32 %v312_v13, %v267_v20 }
 0x2fb   :  { %v357_v23 = vpop.eup %356  ;;  %v279_v24 = vmul.f32 %v312_v13, %v268_v21 }
 0x2fc   :  { %v289_v25 = vadd.f32 %v313_v15, %v278_v22  ;;  %v269_v26 = vmul.f32 %v357_v23, %v237_v55 }
 0x2fd   :  { %v290_v27 = vadd.f32 %v313_v15, %v279_v24 }
 0x2fe   :  { %293 = vst.msk [vmem:[%s473_s7 + $0x8] sm:$0xff] %vm56_vm0, %v289_v25  ;;  %v280_v28 = vmul.f32 %v312_v13, %v269_v26 }
 0x2ff   :  { %294 = vst.msk [vmem:[%s473_s7 + $0x10] sm:$0xff] %vm56_vm0, %v290_v27 }
 0x300   :  { %v291_v29 = vadd.f32 %v313_v15, %v280_v28 }
 0x302   :  { %295 = vst.msk [vmem:[%s473_s7 + $0x18] sm:$0xff] %vm56_vm0, %v291_v29 }

// kernel: musemorphose_forward.21
= control target key start
LH: loop header
LB: loop body
LE: loop exit
PB: predicated region body
PF: predicated region fallthrough
CT: control target
= control target key end

     0   :  { %vm43_vm0 = vcmask 261120   ;;  %s171_s1 = inlined_call_operand.vmem [shape: bf16[32,128], index: 1, kind: input, shape index: {}]   ;;  %s172_s0 = inlined_call_operand.vmem [shape: f32[24,32], index: 0, kind: input, shape index: {}]   ;;  %s173_s2 = inlined_call_operand.vmem [shape: f32[1,128], index: 2, kind: input, shape index: {}]   ;;  %s174_s3 = inlined_call_operand.vmem [shape: f32[24,128], index: 3, kind: output, shape index: {}]  }
   0x1   :  { %v122_v0 = vld [vmem:[%s171_s1] sm:$0xff]   ;;  %v123_v1 = vld [vmem:[%s171_s1 + $0x8] sm:$0xff]   ;;  %v17_v4 = vld [vmem:[%s172_s0 + $0x10] sm:$0xff] }
   0x2   :  { %114 = vmatprep.subr.bf16.mxu0 %v122_v0  ;;  %v15_v2 = vld [vmem:[%s172_s0] sm:$0xff]  ;;  %v16_v3 = vld [vmem:[%s172_s0 + $0x8] sm:$0xff]  ;;  %v19_v6 = vpack.c.bf16 %v17_v4, %v17_v4 }
   0x3   :  { %115 = vmatpush3.bf16.msra.mxu0 %v122_v0  ;;  %v18_v5 = vpack.c.bf16 %v16_v3, %v15_v2  ;;  %v105_v7 = vld [vmem:[%s173_s2] ss:$0 sm:$0xff] }
   0x4   :  { %116 = vmatprep.subr.bf16.mxu0 %v123_v1 }
   0x5   :  { %118 = vmatprep.mubr.msk.bf16.mxu0 %vm43_vm0, %v18_v5 }
   0x7   :  { %117 = vmatpush3.bf16.msra.mxu0 %v123_v1 }
   0xa   :  { %119 = vmatmul.mubr.msk.bf16.vlgmr.msra.gmra.mrb[0].mxu0 %vm43_vm0, %v19_v6 }
  0xdd   :  { %v120_v8 = vpop.f32.mrb[0].mxu0 }
  0xde   :  { %v93_v9 = vadd.f32 %v120_v8, %v105_v7  ;;  %v84_v10 = vpop.f32.mrb[1].mxu0 }
  0xdf   :  { %v85_v11 = vadd.f32 %v105_v7, %v84_v10  ;;  %v121_v12 = vpop.f32.mrb[2].mxu0 }
  0xe0   :  { %100 = vst [vmem:[%s174_s3 + $0x10] sm:$0xff] %v93_v9  ;;  %v87_v13 = vpop.f32.mrb[3].mxu0 }
  0xe1   :  { %98 = vst [vmem:[%s174_s3] sm:$0xff] %v85_v11  ;;  %v88_v14 = vadd.f32 %v105_v7, %v87_v13 }
  0xe3   :  { %99 = vst [vmem:[%s174_s3 + $0x8] sm:$0xff] %v88_v14 }

// kernel: musemorphose_forward.16
= control target key start
LH: loop header
LB: loop body
LE: loop exit
PB: predicated region body
PF: predicated region fallthrough
CT: control target
= control target key end

     0   :  { %vm51_vm0 = vcmask 392192   ;;  %s187_s1 = inlined_call_operand.vmem [shape: bf16[48,128], index: 1, kind: input, shape index: {}]   ;;  %s188_s0 = inlined_call_operand.vmem [shape: f32[24,48], index: 0, kind: input, shape index: {}]   ;;  %s189_s2 = inlined_call_operand.vmem [shape: f32[1,128], index: 2, kind: input, shape index: {}]   ;;  %s190_s3 = inlined_call_operand.vmem [shape: f32[24,128], index: 3, kind: output, shape index: {}]  }
   0x1   :  { %v134_v0 = vld [vmem:[%s187_s1] sm:$0xff]   ;;  %v135_v1 = vld [vmem:[%s187_s1 + $0x8] sm:$0xff]   ;;  %v136_v4 = vld [vmem:[%s187_s1 + $0x10] sm:$0xff]  }
   0x2   :  { %124 = vmatprep.subr.bf16.mxu0 %v134_v0  ;;  %v15_v2 = vld [vmem:[%s188_s0] sm:$0xff]  ;;  %v16_v3 = vld [vmem:[%s188_s0 + $0x8] sm:$0xff]  ;;  %v17_v6 = vld [vmem:[%s188_s0 + $0x10] sm:$0xff] }
   0x3   :  { %125 = vmatpush3.bf16.msra.mxu0 %v134_v0  ;;  %v18_v5 = vpack.c.bf16 %v16_v3, %v15_v2  ;;  %v19_v7 = vpack.c.bf16 %v17_v6, %v17_v6  ;;  %v113_v8 = vld [vmem:[%s189_s2] ss:$0 sm:$0xff] }
   0x4   :  { %126 = vmatprep.subr.bf16.mxu0 %v135_v1 }
   0x5   :  { %130 = vmatprep.mubr.msk.bf16.mxu0 %vm51_vm0, %v18_v5 }
   0x7   :  { %127 = vmatpush3.bf16.msra.mxu0 %v135_v1 }
   0x8   :  { %128 = vmatprep.subr.bf16.mxu0 %v136_v4 }
   0xb   :  { %129 = vmatpush3.bf16.msra.mxu0 %v136_v4 }
   0xe   :  { %131 = vmatmul.mubr.msk.bf16.vlgmr.msra.gmra.mrb[0].mxu0 %vm51_vm0, %v19_v7 }
  0xe1   :  { %v132_v9 = vpop.f32.mrb[0].mxu0 }
  0xe2   :  { %v101_v10 = vadd.f32 %v132_v9, %v113_v8  ;;  %v92_v11 = vpop.f32.mrb[1].mxu0 }
  0xe3   :  { %v93_v12 = vadd.f32 %v113_v8, %v92_v11  ;;  %v133_v13 = vpop.f32.mrb[2].mxu0 }
  0xe4   :  { %108 = vst [vmem:[%s190_s3 + $0x10] sm:$0xff] %v101_v10  ;;  %v95_v14 = vpop.f32.mrb[3].mxu0 }
  0xe5   :  { %106 = vst [vmem:[%s190_s3] sm:$0xff] %v93_v12  ;;  %v96_v15 = vadd.f32 %v113_v8, %v95_v14 }
  0xe7   :  { %107 = vst [vmem:[%s190_s3 + $0x8] sm:$0xff] %v96_v15 }

// kernel: musemorphose_forward.18
= control target key start
LH: loop header
LB: loop body
LE: loop exit
PB: predicated region body
PF: predicated region fallthrough
CT: control target
= control target key end

     0   :  { %vm55_vm0 = vcmask 261120   ;;  %vm154_vm1 = vcmask 523264   ;;  %s434_s1 = inlined_call_operand.vmem [shape: bf16[32,64], index: 1, kind: input, shape index: {}]   ;;  %s435_s0 = inlined_call_operand.vmem [shape: f32[24,32], index: 0, kind: input, shape index: {}]   ;;  %s436_s3 = inlined_call_operand.vmem [shape: bf16[64,32], index: 3, kind: input, shape index: {}]   ;;  %s437_s2 = inlined_call_operand.vmem [shape: f32[1,64], index: 2, kind: input, shape index: {}]   ;;  %s438_s4 = inlined_call_operand.vmem [shape: f32[1,32], index: 4, kind: input, shape index: {}]   ;;  %s439_s5 = inlined_call_operand.vmem [shape: f32[1,32], index: 5, kind: input, shape index: {}]   ;;  %s440_s6 = inlined_call_operand.vmem [shape: f32[1,32], index: 6, kind: input, shape index: {}]   ;;  %s441_s7 = inlined_call_operand.vmem [shape: f32[24,32], index: 7, kind: output, shape index: {}]  }
   0x1   :  { %v323_v0 = vld [vmem:[%s434_s1] sm:$0xff]   ;;  %v324_v1 = vld [vmem:[%s434_s1 + $0x8] sm:$0xff]   ;;  %v29_v4 = vld [vmem:[%s435_s0 + $0x10] sm:$0xff] }
   0x2   :  { %303 = vmatprep.subr.bf16.mxu0 %v323_v0  ;;  %v27_v2 = vld [vmem:[%s435_s0] sm:$0xff]  ;;  %v28_v3 = vld [vmem:[%s435_s0 + $0x8] sm:$0xff]  ;;  %v31_v8 = vpack.c.bf16 %v29_v4, %v29_v4  ;;  %v327_v9 = vld [vmem:[%s436_s3 + $0x10] sm:$0xff]  }
   0x3   :  { %304 = vmatpush3.bf16.msra.mxu0 %v323_v0  ;;  %v30_v5 = vpack.c.bf16 %v28_v3, %v27_v2  ;;  %v325_v6 = vld [vmem:[%s436_s3] sm:$0xff]   ;;  %v326_v7 = vld [vmem:[%s436_s3 + $0x8] sm:$0xff]   ;;  %v328_v10 = vld [vmem:[%s436_s3 + $0x18] sm:$0xff]  }
   0x4   :  { %305 = vmatprep.subr.bf16.mxu0 %v324_v1  ;;  %311 = vmatprep.subr.bf16.mxu1 %v325_v6  ;;  %v279_v11 = vld [vmem:[%s437_s2] ss:$0 sm:$0xff] }
   0x5   :  { %307 = vmatprep.mubr.msk.bf16.mxu0 %vm55_vm0, %v30_v5  ;;  %312 = vmatpush3.bf16.msra.mxu1 %v325_v6  ;;  %v284_v24 = vld [vmem:[%s438_s4] ss:$0 sm:$0xff] }
   0x6   :  { %313 = vmatprep.subr.bf16.mxu1 %v326_v7  ;;  %v291_v63 = vld [vmem:[%s439_s5] ss:$0 sm:$0xff] }
   0x7   :  { %306 = vmatpush3.bf16.msra.mxu0 %v324_v1  ;;  %v292_v1 = vld [vmem:[%s440_s6] ss:$0 sm:$0xff] }
   0x9   :  { %314 = vmatpush3.bf16.msra.mxu1 %v326_v7 }
   0xa   :  { %308 = vmatmul.mubr.msk.bf16.vlgmr.msra.gmra.mrb[0].mxu0 %vm55_vm0, %v31_v8  ;;  %315 = vmatprep.subr.bf16.mxu1 %v327_v9 }
   0xd   :  { %316 = vmatpush3.bf16.msra.mxu1 %v327_v9 }
   0xe   :  { %317 = vmatprep.subr.bf16.mxu1 %v328_v10 }
  0x11   :  { %318 = vmatpush3.bf16.msra.mxu1 %v328_v10 }
  0xdd   :  { %v309_v12 = vpop.f32.mrb[0].mxu0 }
  0xde   :  { %v105_v13 = vadd.f32 %v309_v12, %v279_v11  ;;  %v96_v14 = vpop.f32.mrb[1].mxu0 }
  0xdf   :  { %v97_v15 = vadd.f32 %v279_v11, %v96_v14  ;;  %v310_v16 = vpop.f32.mrb[2].mxu0 }
  0xe0   :  { %v99_v17 = vpop.f32.mrb[3].mxu0  ;;  %v112_v19 = vmax.f32 %v105_v13, 0.0 }
  0xe1   :  { %v100_v18 = vadd.f32 %v279_v11, %v99_v17  ;;  %v110_v20 = vmax.f32 %v97_v15, 0.0 }
  0xe2   :  { %v114_v23 = vpack.c.bf16 %v112_v19, %v112_v19 }
  0xe3   :  { %v111_v21 = vmax.f32 %v100_v18, 0.0 }
  0xe5   :  { %v113_v22 = vpack.c.bf16 %v111_v21, %v110_v20 }
  0xe7   :  { %319 = vmatprep.mubr.msk.bf16.mxu1 %vm154_vm1, %v113_v22 }
  0xe8   :  { %320 = vmatmul.mubr.msk.bf16.vlgmr.msra.gmra.mrb[0].mxu1 %vm154_vm1, %v114_v23 }
 0x1bb   :  { %v321_v25 = vpop.f32.mrb[0].mxu1 }
 0x1bc   :  { %v204_v26 = vadd.f32 %v321_v25, %v284_v24  ;;  %v195_v27 = vpop.f32.mrb[1].mxu1 }
 0x1bd   :  { %v196_v28 = vadd.f32 %v284_v24, %v195_v27  ;;  %v322_v29 = vpop.f32.mrb[2].mxu1 }
 0x1be   :  { %v198_v30 = vpop.f32.mrb[3].mxu1  ;;  %v211_v31 = vadd.f32 %v204_v26, %v29_v4 }
 0x1bf   :  { %v199_v32 = vadd.f32 %v284_v24, %v198_v30  ;;  %v209_v33 = vadd.f32 %v196_v28, %v27_v2 }
 0x1c0   :  { %v218_v34 = vsel %vm55_vm0, %v211_v31, 0.0 }
 0x1c1   :  { %219 = vadd.xlane.f32.xlu1 %v218_v34  ;;  %v212_v35 = vsel %vm55_vm0, %v209_v33, 0.0  ;;  %v210_v36 = vadd.f32 %v199_v32, %v28_v3 }
 0x1c2   :  { %213 = vadd.xlane.f32.xlu0 %v212_v35 }
 0x1c3   :  { %v215_v37 = vsel %vm55_vm0, %v210_v36, 0.0 }
 0x1c6   :  { %216 = vadd.xlane.f32.xlu0 %v215_v37 }
 0x24e   :  { %v220_v38 = vpop.xlane.xlu1 %219 }
 0x24f   :  { %v224_v39 = vmul.f32 0.03125, %v220_v38  ;;  %v214_v40 = vpop.xlane.xlu0 %213 }
 0x250   :  { %v222_v41 = vmul.f32 0.03125, %v214_v40 }
 0x251   :  { %v227_v42 = vsub.f32 %v211_v31, %v224_v39 }
 0x252   :  { %v225_v43 = vsub.f32 %v209_v33, %v222_v41 }
 0x253   :  { %v217_v44 = vpop.xlane.xlu0 %216  ;;  %v230_v49 = vmul.f32 %v227_v42, %v227_v42 }
 0x254   :  { %v223_v45 = vmul.f32 0.03125, %v217_v44  ;;  %v228_v46 = vmul.f32 %v225_v43, %v225_v43 }
 0x255   :  { %v237_v51 = vsel %vm55_vm0, %v230_v49, 0.0 }
 0x256   :  { %v226_v47 = vsub.f32 %v210_v36, %v223_v45  ;;  %v231_v48 = vsel %vm55_vm0, %v228_v46, 0.0 }
 0x257   :  { %232 = vadd.xlane.f32.xlu1 %v231_v48 }
 0x258   :  { %v229_v50 = vmul.f32 %v226_v47, %v226_v47 }
 0x25a   :  { %v234_v52 = vsel %vm55_vm0, %v229_v50, 0.0 }
 0x25b   :  { %238 = vadd.xlane.f32.xlu1 %v237_v51  ;;  %235 = vadd.xlane.f32.xlu0 %v234_v52 }
 0x2e4   :  { %v233_v53 = vpop.xlane.xlu1 %232 }
 0x2e5   :  { %v240_v54 = vmul.f32 0.03125, %v233_v53 }
 0x2e7   :  { %v243_v55 = vadd.f32 1e-05, %v240_v54 }
 0x2e8   :  { %v239_v56 = vpop.xlane.xlu1 %238  ;;  %v236_v57 = vpop.xlane.xlu0 %235 }
 0x2e9   :  { %329 = vrsqrt.f32 %v243_v55  ;;  %v242_v58 = vmul.f32 0.03125, %v239_v56  ;;  %v241_v59 = vmul.f32 0.03125, %v236_v57 }
 0x2eb   :  { %v245_v60 = vadd.f32 1e-05, %v242_v58  ;;  %v244_v61 = vadd.f32 1e-05, %v241_v59 }
 0x2ed   :  { %331 = vrsqrt.f32 %v245_v60 }
 0x2ee   :  { %333 = vrsqrt.f32 %v244_v61 }
 0x2f3   :  { %v330_v62 = vpop.eup %329 }
 0x2f4   :  { %v249_v0 = vmul.f32 %v330_v62, %v225_v43 }
 0x2f6   :  { %v259_v2 = vmul.f32 %v291_v63, %v249_v0 }
 0x2f7   :  { %v332_v3 = vpop.eup %331 }
 0x2f8   :  { %v334_v4 = vpop.eup %333  ;;  %v269_v5 = vadd.f32 %v292_v1, %v259_v2  ;;  %v251_v6 = vmul.f32 %v332_v3, %v227_v42 }
 0x2f9   :  { %v250_v7 = vmul.f32 %v334_v4, %v226_v47 }
 0x2fa   :  { %272 = vst.msk [vmem:[%s441_s7] sm:$0xff] %vm55_vm0, %v269_v5  ;;  %v261_v8 = vmul.f32 %v291_v63, %v251_v6 }
 0x2fb   :  { %v260_v9 = vmul.f32 %v291_v63, %v250_v7 }
 0x2fc   :  { %v271_v10 = vadd.f32 %v292_v1, %v261_v8 }
 0x2fd   :  { %v270_v11 = vadd.f32 %v292_v1, %v260_v9 }
 0x2fe   :  { %274 = vst.msk [vmem:[%s441_s7 + $0x10] sm:$0xff] %vm55_vm0, %v271_v10 }
 0x2ff   :  { %273 = vst.msk [vmem:[%s441_s7 + $0x8] sm:$0xff] %vm55_vm0, %v270_v11 }

// kernel: musemorphose_forward.17
= control target key start
LH: loop header
LB: loop body
LE: loop exit
PB: predicated region body
PF: predicated region fallthrough
CT: control target
= control target key end

     0   :  { %s1655_s13 = smov 0   ;;  %s1657_s14 = smov 0   ;;  %s1840_s0 = inlined_call_operand.vmem [shape: f32[2,12,32], index: 0, kind: input, shape index: {}]   ;;  %s1841_s1 = inlined_call_operand.vmem [shape: f32[2,12,32], index: 1, kind: input, shape index: {}]   ;;  %s1842_s2 = inlined_call_operand.vmem [shape: bf16[32,32], index: 2, kind: input, shape index: {}]   ;;  %s1843_s3 = inlined_call_operand.vmem [shape: bf16[32,64], index: 3, kind: input, shape index: {}]   ;;  %s1844_s4 = inlined_call_operand.vmem [shape: f32[1,32], index: 4, kind: input, shape index: {}]   ;;  %s1845_s5 = inlined_call_operand.vmem [shape: f32[1,64], index: 5, kind: input, shape index: {}]   ;;  %s1846_s6 = inlined_call_operand.vmem [shape: bf16[32,32], index: 6, kind: input, shape index: {}]   ;;  %s1847_s7 = inlined_call_operand.vmem [shape: f32[1,32], index: 7, kind: input, shape index: {}]   ;;  %s1848_s8 = inlined_call_operand.vmem [shape: f32[1,32], index: 8, kind: input, shape index: {}]   ;;  %s1849_s9 = inlined_call_operand.vmem [shape: f32[1,32], index: 9, kind: input, shape index: {}]   ;;  %s1850_s10 = inlined_call_operand.vmem [shape: f32[2,12,32], index: 10, kind: output, shape index: {}]  }
   0x1   :  { %s1659_s15 = smov 0  }
   0x2 LB: > { %s32_s16 = sadd.s32 1, %s1581_s14  ;;  %p1335_p0 = scmp.ge.s32.totalorder %s1585_s15, 1  ;;  %s1585_s15 = sphi %s1659_s15, %s20_s15   ;;  %s1581_s14 = sphi %s1657_s14, %s1852_s14   ;;  %s1577_s13 = sphi %s1655_s13, %s1851_s13  }
   0x3   : > { %p34_p1 = scmp.ge.s32.totalorder %s32_s16, 2  ;;  %p336_p2 = scmp.lt.s32.totalorder %s1585_s15, 3 }
   0x5   : > { %s1854_s16 = smov (%p34_p1, %s32_s16), 0  ;;  %p337_p3 = pnand %p1335_p0, %p336_p2 }
   0x6   : > { %v1520_v0 = vld [vmem:[%s1843_s3] sm:$0xff] (!%p337_p3)   ;;  %v1587_v1 = vmov (!%p337_p3), 0.0   ;;  %v1522_v3 = vld [vmem:[%s1843_s3 + $0x8] sm:$0xff] (!%p337_p3)   ;;  %vm1588_vm0 = vmmov (!%p337_p3), 0   ;;  %p383_p4 = scmp.lt.s32.totalorder (!%p337_p3), %s1577_s13, 1  ;;  %vm435_vm1 = vcmask (!%p337_p3), 261120   ;;  %v548_v40 = vlaneseq (!%p337_p3) }
   0x7   : > { %340 = sbr.rel (%p337_p3) target bundleno = 1794 (0x702), region = 60  ;;  %1419 = vmatprep.subr.bf16.mxu1 (!%p337_p3), %v1587_v1  ;;  %1411 = vmatprep.subr.bf16.mxu0 (!%p337_p3), %v1587_v1  ;;  %v1521_v2 = vld [vmem:[%s1842_s2] sm:$0xff] (!%p337_p3)   ;;  %v1523_v4 = vld [vmem:[%s1842_s2 + $0x8] sm:$0xff] (!%p337_p3)   ;;  %vm560_vm2 = vcmask (!%p337_p3), 64512   ;;  %s1589_s19 = smov (!%p337_p3), 112   ;;  %vm608_vm5 = vcmask (!%p337_p3), 97280  }
   0x8   : > { %1420 = vmatpush3.bf16.msra.mxu1 (!%p337_p3), %v1520_v0  ;;  %1423 = vmatprep.mubr.msk.bf16.mxu1 (!%p337_p3), %vm1588_vm0, %v1587_v1  ;;  %v1342_v12 = vld [vmem:[%s1844_s4] ss:$0 sm:$0xff] (!%p337_p3)  ;;  %s1590_s20 = smov (!%p337_p3), 120   ;;  %s1591_s21 = smov (!%p337_p3), 104   ;;  %v549_v41 = vshrl.u32 (!%p337_p3), %v548_v40, 7  ;;  %v555_v42 = vand.u32 (!%p337_p3), 127, %v548_v40 }
   0x9   : > { %1412 = vmatpush3.bf16.msra.mxu0 (!%p337_p3), %v1521_v2  ;;  %1421 = vmatprep.subr.bf16.mxu1 (!%p337_p3), %v1587_v1  ;;  %v1346_v13 = vld [vmem:[%s1845_s5] ss:$0 sm:$0xff] (!%p337_p3)  ;;  %v1592_v44 = vmov (!%p337_p3), -1e+30   ;;  %vm612_vm6 = vcmask (!%p337_p3), 93184   ;;  %s1593_s22 = smov (!%p337_p3), 96  }
   0xa   : > { %1413 = vmatprep.subr.bf16.mxu0 (!%p337_p3), %v1587_v1  ;;  %1415 = vmatprep.mubr.msk.bf16.mxu0 (!%p337_p3), %vm1588_vm0, %v1587_v1  ;;  %v550_v43 = vadd.s32 (!%p337_p3), 8, %v549_v41  ;;  %vm556_vm3 = vcmp.le.s32.totalorder (!%p337_p3), %v555_v42, %v549_v41  ;;  %vm639_vm7 = vcmask (!%p337_p3), 1045504   ;;  %s1594_s23 = smov (!%p337_p3), 80   ;;  %s1595_s24 = smov (!%p337_p3), 72   ;;  %vm692_vm8 = vcmask (!%p337_p3), 60416  }
   0xb   : > { %v558_v45 = vsel (!%p337_p3), %vm556_vm3, 0.0, %v1592_v44  ;;  %s1596_s26 = smov (!%p337_p3), 88   ;;  %vm694_vm9 = vcmask (!%p337_p3), 58368   ;;  %s1597_s27 = smov (!%p337_p3), 8   ;;  %vm832_vm10 = vcmask (!%p337_p3), 126016   ;;  %vm834_vm11 = vcmask (!%p337_p3), 123968  }
   0xc   : > { %1422 = vmatpush3.bf16.msra.mxu1 (!%p337_p3), %v1522_v3  ;;  %vm557_vm4 = vcmp.le.s32.totalorder (!%p337_p3), %v555_v42, %v550_v43  ;;  %s1598_s12 = smov (!%p337_p3), 16   ;;  %vm971_vm12 = vcmask (!%p337_p3), 191616   ;;  %vm973_vm13 = vcmask (!%p337_p3), 189568   ;;  %vm1110_vm14 = vcmask (!%p337_p3), 257216  }
   0xd   : > { %1414 = vmatpush3.bf16.msra.mxu0 (!%p337_p3), %v1523_v4  ;;  %1433 = vmatprep.subr.bf16.mxu1 (!%p337_p3), %v1587_v1  ;;  %v559_v47 = vsel (!%p337_p3), %vm557_vm4, 0.0, %v1592_v44  ;;  %vm1112_vm15 = vcmask (!%p337_p3), 255168  }
   0xe   : > { %s1856_s13 = smov (!%p383_p4, %s1577_s13), 1  ;;  %1427 = vmatprep.subr.bf16.mxu0 %v1587_v1 }
   0xf   : > { %s1693_s25 = sshll.u32 %s1856_s13, 4  ;;  %s1599_s13 = smov 24  }
  0x10   : > { %s387_s28 = scalar_lea.vmem %s1840_s0, %s1693_s25  ;;  %s392_s11 = scalar_lea.vmem %s1841_s1, %s1693_s25 }
  0x11   : > { %v405_v5 = vld [vmem:[%s387_s28] sm:$0xff]  ;;  %v406_v6 = vld [vmem:[%s387_s28 + $0x8] sm:$0xf] }
  0x12   : > { %v407_v7 = vld [vmem:[%s392_s11] sm:$0xff]  ;;  %v408_v8 = vld [vmem:[%s392_s11 + $0x8] sm:$0xf] }
  0x13   : > { %v1705_v9 = vadd.f32 %v407_v7, %v405_v5  ;;  %v1707_v10 = vadd.f32 %v408_v8, %v406_v6 }
  0x15   : > { %v411_v11 = vpack.c.bf16 %v1707_v10, %v1705_v9 }
  0x17   : > { %1424 = vmatmul.mubr.msk.bf16.vlgmr.msra.gmra.mrb[0].mxu1 %vm435_vm1, %v411_v11  ;;  %1416 = vmatmul.mubr.msk.bf16.vlgmr.msra.gmra.mrb[0].mxu0 %vm435_vm1, %v411_v11 }
  0x18   : > { %1429 = vmatprep.mubr.msk.bf16.mxu0 %vm1588_vm0, %v1587_v1  ;;  %1435 = vmatprep.mubr.msk.bf16.mxu1 %vm1588_vm0, %v1587_v1 }
  0xea   : > { %v540_v14 = vpop.f32.mrb[0].mxu1  ;;  %v473_v15 = vpop.f32.mrb[0].mxu0 }
  0xeb   : > { %v1425_v16 = vpop.f32.mrb[1].mxu1  ;;  %v474_v17 = vadd.f32 %v1342_v12, %v473_v15  ;;  %v1417_v18 = vpop.f32.mrb[1].mxu0  ;;  %v541_v21 = vadd.f32 %v1346_v13, %v540_v14 }
  0xec   : > { %v543_v19 = vpop.f32.mrb[2].mxu1  ;;  %v476_v20 = vpop.f32.mrb[2].mxu0 }
  0xed   : > { %v480_v22 = vmul.f32 0.35355338, %v474_v17  ;;  %v544_v23 = vadd.f32 %v1346_v13, %v543_v19  ;;  %v1426_v24 = vpop.f32.mrb[3].mxu1  ;;  %v477_v25 = vadd.f32 %v1342_v12, %v476_v20  ;;  %v1418_v26 = vpop.f32.mrb[3].mxu0 }
  0xef   : > { %v1723_v27 = vpack.c.bf16 %v544_v23, %v541_v21  ;;  %v481_v28 = vmul.f32 0.35355338, %v477_v25 }
  0xf1   : > { %v482_v29 = vpack.c.bf16 %v481_v28, %v480_v22  ;;  %838 = vrot.lane.b32.xlu1 %v1723_v27, %s1589_s19  ;;  %699 = vrot.lane.b32.xlu0 %v1723_v27, %s1590_s20  ;;  %v565_v30 = vsel %vm560_vm2, %v1723_v27, 0 }
  0xf2   : > { %1428 = vmatpush3.bf16.xpose.msra.mxu0 %v565_v30 }
  0xf3   : > { %1439 = vmatprep.subr.bf16.mxu0 %v1587_v1 }
  0xf5   : > { %836 = vrot.lane.b32.xlu1 %v482_v29, %s1589_s19  ;;  %697 = vrot.lane.b32.xlu0 %v482_v29, %s1590_s20 }
  0xf9   : > { %975 = vrot.lane.b32.xlu1 %v482_v29, %s1591_s21  ;;  %977 = vrot.lane.b32.xlu0 %v1723_v27, %s1591_s21 }
  0xfa   : > { %1430 = vmatmul.mubr.msk.bf16.vlgmr.msra.gmra.mrb[4].mxu0 %vm560_vm2, %v482_v29 }
  0xfb   : > { %1441 = vmatprep.mubr.msk.bf16.mxu0 %vm1588_vm0, %v1587_v1 }
 0x163   : > { %v700_v31 = vpop.permute.xlu0 %699  ;;  %v839_v33 = vpop.permute.xlu1 %838 }
 0x164   : > { %v705_v32 = vsel %vm560_vm2, %v700_v31, 0  ;;  %v844_v35 = vsel %vm560_vm2, %v839_v33, 0 }
 0x165   : > { %1440 = vmatpush3.bf16.xpose.msra.mxu0 %v705_v32 }
 0x166   : > { %1451 = vmatprep.subr.bf16.mxu0 %v1587_v1 }
 0x167   : > { %v698_v34 = vpop.permute.xlu0 %697  ;;  %v837_v37 = vpop.permute.xlu1 %836 }
 0x16b   : > { %v978_v36 = vpop.permute.xlu0 %977  ;;  %v976_v39 = vpop.permute.xlu1 %975 }
 0x16c   : > { %1442 = vmatmul.mubr.msk.bf16.vlgmr.msra.gmra.mrb[8].mxu0 %vm560_vm2, %v698_v34  ;;  %v983_v38 = vsel %vm560_vm2, %v978_v36, 0 }
 0x16d   : > { %1452 = vmatpush3.bf16.xpose.msra.mxu0 %v844_v35  ;;  %1453 = vmatprep.mubr.msk.bf16.mxu0 %vm1588_vm0, %v1587_v1 }
 0x16e   : > { %1463 = vmatprep.subr.bf16.mxu0 %v1587_v1 }
 0x174   : > { %1454 = vmatmul.mubr.msk.bf16.vlgmr.msra.gmra.mrb[12].mxu0 %vm560_vm2, %v837_v37 }
 0x175   : > { %1464 = vmatpush3.bf16.xpose.msra.mxu0 %v983_v38  ;;  %1465 = vmatprep.mubr.msk.bf16.mxu0 %vm1588_vm0, %v1587_v1 }
 0x176   : > { %1475 = vmatprep.subr.bf16.mxu0 %v1587_v1 }
 0x17c   : > { %1466 = vmatmul.mubr.msk.bf16.vlgmr.msra.gmra.mrb[16].mxu0 %vm560_vm2, %v976_v39 }
 0x17d   : > { %1479 = vmatprep.mubr.msk.bf16.mxu0 %vm1588_vm0, %v1587_v1 }
 0x1cd   : > { %v601_v46 = vpop.f32.mrb[4].mxu0 }
 0x1ce   : > { %v602_v48 = vadd.f32 %v601_v46, %v558_v45  ;;  %v1431_v49 = vpop.f32.mrb[5].mxu0 }
 0x1cf   : > { %v604_v50 = vpop.f32.mrb[6].mxu0 }
 0x1d0   : > { %v605_v51 = vadd.f32 %v604_v50, %v559_v47  ;;  %v1432_v52 = vpop.f32.mrb[7].mxu0  ;;  %v609_v53 = vsel %vm608_vm5, %v602_v48, -inf }
 0x1d1   : > { %610 = vmax.xlane.f32.xlu0 %v609_v53 }
 0x1d2   : > { %v613_v54 = vsel %vm612_vm6, %v605_v51, -inf }
 0x1d3   : > { %614 = vmax.xlane.f32.xlu1 %v613_v54 }
 0x23f   : > { %v741_v55 = vpop.f32.mrb[8].mxu0 }
 0x240   : > { %v742_v56 = vadd.f32 %v741_v55, %v558_v45  ;;  %v1443_v57 = vpop.f32.mrb[9].mxu0 }
 0x241   : > { %v744_v58 = vpop.f32.mrb[10].mxu0 }
 0x242   : > { %v745_v59 = vadd.f32 %v744_v58, %v559_v47  ;;  %v1444_v60 = vpop.f32.mrb[11].mxu0  ;;  %v748_v61 = vsel %vm608_vm5, %v742_v56, -inf }
 0x243   : > { %749 = vmax.xlane.f32.xlu0 %v748_v61 }
 0x244   : > { %v751_v62 = vsel %vm612_vm6, %v745_v59, -inf }
 0x247   : > { %752 = vmax.xlane.f32.xlu0 %v751_v62  ;;  %v880_v63 = vpop.f32.mrb[12].mxu0 }
 0x248   : > { %v881_v0 = vadd.f32 %v880_v63, %v558_v45  ;;  %v1455_v2 = vpop.f32.mrb[13].mxu0 }
 0x249   : > { %v883_v3 = vpop.f32.mrb[14].mxu0 }
 0x24a   : > { %v884_v4 = vadd.f32 %v883_v3, %v559_v47  ;;  %v1456_v5 = vpop.f32.mrb[15].mxu0  ;;  %v887_v6 = vsel %vm608_vm5, %v881_v0, -inf }
 0x24b   : > { %888 = vmax.xlane.f32.xlu1 %v887_v6 }
 0x24c   : > { %v890_v7 = vsel %vm612_vm6, %v884_v4, -inf }
 0x24d   : > { %891 = vmax.xlane.f32.xlu0 %v890_v7 }
 0x24f   : > { %v1019_v8 = vpop.f32.mrb[16].mxu0 }
 0x250   : > { %v1020_v11 = vadd.f32 %v1019_v8, %v558_v45  ;;  %v1467_v12 = vpop.f32.mrb[17].mxu0 }
 0x251   : > { %v1022_v13 = vpop.f32.mrb[18].mxu0 }
 0x252   : > { %v1023_v14 = vadd.f32 %v1022_v13, %v559_v47  ;;  %v1468_v15 = vpop.f32.mrb[19].mxu0  ;;  %v1026_v16 = vsel %vm608_vm5, %v1020_v11, -inf }
 0x253   : > { %1027 = vmax.xlane.f32.xlu1 %v1026_v16 }
 0x254   : > { %v1029_v17 = vsel %vm612_vm6, %v1023_v14, -inf }
 0x255   : > { %1030 = vmax.xlane.f32.xlu0 %v1029_v17 }
 0x25e   : > { %v611_v22 = vpop.xlane.xlu0 %610 }
 0x25f   : > { %v616_v24 = vsub.f32 %v602_v48, %v611_v22 }
 0x260   : > { %v615_v18 = vpop.xlane.xlu1 %614 }
 0x261   : > { %v617_v19 = vsub.f32 %v605_v51, %v615_v18  ;;  %v618_v25 = vmul.f32 1.442695, %v616_v24 }
 0x263   : > { %v620_v20 = vmul.f32 1.442695, %v617_v19 }
 0x264   : > { %634 = vrot.lane.b32.xlu1 %v1723_v27, %s1593_s22 }
 0x265   : > { %1527 = vpow2.f32 %v620_v20 }
 0x266   : > { %1529 = vpow2.f32 %v618_v25 }
 0x26f   : > { %v1758_v21 = vpop.eup %1527 }
 0x270   : > { %v625_v23 = vsel %vm612_vm6, %v1758_v21, 0.0  ;;  %v1762_v26 = vpop.eup %1529 }
 0x271   : > { %626 = vadd.xlane.f32.xlu0 %v625_v23  ;;  %v622_v28 = vsel %vm608_vm5, %v1762_v26, 0.0 }
 0x288   : > { %623 = vadd.xlane.f32.xlu1 %v622_v28 }
 0x2d0   : > { %v750_v29 = vpop.xlane.xlu0 %749 }
 0x2d1   : > { %v754_v30 = vsub.f32 %v742_v56, %v750_v29 }
 0x2d3   : > { %v756_v31 = vmul.f32 1.442695, %v754_v30 }
 0x2d4   : > { %v753_v32 = vpop.xlane.xlu0 %752 }
 0x2d5   : > { %1531 = vpow2.f32 %v756_v31  ;;  %v755_v33 = vsub.f32 %v745_v59, %v753_v32 }
 0x2d7   : > { %v758_v34 = vmul.f32 1.442695, %v755_v33 }
 0x2d8   : > { %v889_v35 = vpop.xlane.xlu1 %888 }
 0x2d9   : > { %1533 = vpow2.f32 %v758_v34  ;;  %v893_v36 = vsub.f32 %v881_v0, %v889_v35 }
 0x2da   : > { %v892_v37 = vpop.xlane.xlu0 %891 }
 0x2db   : > { %v895_v38 = vmul.f32 1.442695, %v893_v36  ;;  %v894_v39 = vsub.f32 %v884_v4, %v892_v37 }
 0x2dd   : > { %1535 = vpow2.f32 %v895_v38  ;;  %v897_v40 = vmul.f32 1.442695, %v894_v39 }
 0x2df   : > { %v1766_v41 = vpop.eup %1531  ;;  %1537 = vpow2.f32 %v897_v40 }
 0x2e0   : > { %v1028_v42 = vpop.xlane.xlu1 %1027  ;;  %v760_v43 = vsel %vm608_vm5, %v1766_v41, 0.0 }
 0x2e1   : > { %v1032_v44 = vsub.f32 %v1020_v11, %v1028_v42  ;;  %761 = vadd.xlane.f32.xlu1 %v760_v43 }
 0x2e2   : > { %v1031_v45 = vpop.xlane.xlu0 %1030 }
 0x2e3   : > { %v1534_v46 = vpop.eup %1533  ;;  %v1034_v47 = vmul.f32 1.442695, %v1032_v44  ;;  %v1033_v48 = vsub.f32 %v1023_v14, %v1031_v45 }
 0x2e4   : > { %v635_v49 = vpop.permute.xlu1 %634  ;;  %v763_v50 = vsel %vm612_vm6, %v1534_v46, 0.0 }
 0x2e5   : > { %1539 = vpow2.f32 %v1034_v47  ;;  %v1036_v51 = vmul.f32 1.442695, %v1033_v48  ;;  %v641_v52 = vsel %vm639_vm7, %v635_v49, 0  ;;  %764 = vadd.xlane.f32.xlu0 %v763_v50  ;;  %v1524_v47 = vld [vmem:[%s1846_s6] sm:$0xff]  }
 0x2e6   : > { %1434 = vmatpush3.bf16.msra.mxu1 %v641_v52  ;;  %1476 = vmatpush3.bf16.msra.mxu0 %v1524_v47 }
 0x2e7   : > { %v1536_v53 = vpop.eup %1535  ;;  %1541 = vpow2.f32 %v1036_v51  ;;  %1445 = vmatprep.subr.bf16.mxu1 %v1587_v1  ;;  %v1525_v51 = vld [vmem:[%s1846_s6 + $0x8] sm:$0xff]   ;;  %1477 = vmatprep.subr.bf16.mxu0 %v1587_v1 }
 0x2e8   : > { %v899_v54 = vsel %vm608_vm5, %v1536_v53, 0.0 }
 0x2e9   : > { %v1538_v55 = vpop.eup %1537  ;;  %900 = vadd.xlane.f32.xlu1 %v899_v54 }
 0x2ea   : > { %v902_v56 = vsel %vm612_vm6, %v1538_v55, 0.0  ;;  %1478 = vmatpush3.bf16.msra.mxu0 %v1525_v51 }
 0x2eb   : > { %903 = vadd.xlane.f32.xlu0 %v902_v56 }
 0x2ef   : > { %v1775_v57 = vpop.eup %1539 }
 0x2f0   : > { %v1038_v58 = vsel %vm608_vm5, %v1775_v57, 0.0 }
 0x2f1   : > { %v1542_v59 = vpop.eup %1541  ;;  %1039 = vadd.xlane.f32.xlu1 %v1038_v58 }
 0x2f2   : > { %v1041_v60 = vsel %vm612_vm6, %v1542_v59, 0.0 }
 0x2f3   : > { %1042 = vadd.xlane.f32.xlu0 %v1041_v60 }
 0x2fe   : > { %v627_v61 = vpop.xlane.xlu0 %626 }
 0x2ff   : > { %1543 = vrcp.f32 %v627_v61 }
 0x302   : > { %910 = vrot.lane.b32.xlu1 %v1723_v27, %s1594_s23 }
 0x306   : > { %1049 = vrot.lane.b32.xlu1 %v1723_v27, %s1595_s24 }
 0x309   : > { %771 = vrot.lane.b32.xlu0 %v1723_v27, %s1596_s26  ;;  %v1544_v63 = vpop.eup %1543  ;;  %s401_s26 = scalar_lea.vmem %s1850_s10, %s1693_s25 }
 0x30a   : > { %v631_v2 = vmul.f32 %v1544_v63, %v1758_v21 }
 0x315   : > { %v624_v62 = vpop.xlane.xlu1 %623 }
 0x316   : > { %1545 = vrcp.f32 %v624_v62 }
 0x320   : > { %v1546_v0 = vpop.eup %1545 }
 0x321   : > { %v630_v3 = vmul.f32 %v1546_v0, %v1762_v26 }
 0x323   : > { %v632_v4 = vpack.c.bf16 %v631_v2, %v630_v3  ;;  %v1366_v3 = vld [vmem:[%s1847_s7] ss:$0 sm:$0xff] }
 0x325   : > { %1436 = vmatmul.mubr.msk.bf16.vlgmr.msra.gmra.mrb[4].mxu1 %vm608_vm5, %v632_v4 }
 0x326   : > { %1447 = vmatprep.mubr.msk.bf16.mxu1 %vm1588_vm0, %v1587_v1 }
 0x36e   : > { %v762_v6 = vpop.xlane.xlu1 %761 }
 0x372   : > { %v765_v5 = vpop.xlane.xlu0 %764 }
 0x373   : > { %1547 = vrcp.f32 %v765_v5 }
 0x374   : > { %1549 = vrcp.f32 %v762_v6 }
 0x376   : > { %v901_v7 = vpop.xlane.xlu1 %900 }
 0x378   : > { %v904_v27 = vpop.xlane.xlu0 %903 }
 0x379   : > { %1551 = vrcp.f32 %v904_v27 }
 0x37a   : > { %1553 = vrcp.f32 %v901_v7 }
 0x37d   : > { %v1548_v8 = vpop.eup %1547 }
 0x37e   : > { %v1040_v11 = vpop.xlane.xlu1 %1039  ;;  %v1550_v13 = vpop.eup %1549  ;;  %v769_v14 = vmul.f32 %v1548_v8, %v1534_v46 }
 0x37f   : > { %v768_v16 = vmul.f32 %v1550_v13, %v1766_v41 }
 0x380   : > { %v1043_v12 = vpop.xlane.xlu0 %1042 }
 0x381   : > { %1555 = vrcp.f32 %v1043_v12  ;;  %v770_v19 = vpack.c.bf16 %v769_v14, %v768_v16 }
 0x382   : > { %v911_v18 = vpop.permute.xlu1 %910  ;;  %1557 = vrcp.f32 %v1040_v11 }
 0x383   : > { %v1552_v20 = vpop.eup %1551  ;;  %v916_v21 = vsel %vm639_vm7, %v911_v18, 0 }
 0x384   : > { %v772_v15 = vpop.permute.xlu0 %771  ;;  %v1554_v22 = vpop.eup %1553  ;;  %v908_v23 = vmul.f32 %v1552_v20, %v1538_v55 }
 0x385   : > { %v777_v17 = vsel %vm639_vm7, %v772_v15, 0  ;;  %v907_v24 = vmul.f32 %v1554_v22, %v1536_v53 }
 0x386   : > { %1446 = vmatpush3.bf16.msra.mxu1 %v777_v17  ;;  %v1050_v25 = vpop.permute.xlu1 %1049 }
 0x387   : > { %1457 = vmatprep.subr.bf16.mxu1 %v1587_v1  ;;  %v909_v26 = vpack.c.bf16 %v908_v23, %v907_v24  ;;  %v1055_v29 = vsel %vm639_vm7, %v1050_v25, 0 }
 0x389   : > { %1448 = vmatmul.mubr.msk.bf16.vlgmr.msra.gmra.mrb[8].mxu1 %vm608_vm5, %v770_v19 }
 0x38a   : > { %1458 = vmatpush3.bf16.msra.mxu1 %v916_v21  ;;  %1459 = vmatprep.mubr.msk.bf16.mxu1 %vm1588_vm0, %v1587_v1 }
 0x38b   : > { %1469 = vmatprep.subr.bf16.mxu1 %v1587_v1  ;;  %v1556_v28 = vpop.eup %1555 }
 0x38c   : > { %v1558_v30 = vpop.eup %1557  ;;  %v1047_v31 = vmul.f32 %v1556_v28, %v1542_v59 }
 0x38d   : > { %v1046_v32 = vmul.f32 %v1558_v30, %v1775_v57 }
 0x38f   : > { %v1048_v33 = vpack.c.bf16 %v1047_v31, %v1046_v32  ;;  %v1371_v31 = vld [vmem:[%s1848_s8] ss:$0 sm:$0xff] }
 0x391   : > { %1460 = vmatmul.mubr.msk.bf16.vlgmr.msra.gmra.mrb[12].mxu1 %vm608_vm5, %v909_v26 }
 0x392   : > { %1470 = vmatpush3.bf16.msra.mxu1 %v1055_v29  ;;  %1471 = vmatprep.mubr.msk.bf16.mxu1 %vm1588_vm0, %v1587_v1  ;;  %vm1193_vm0 = vcmask 257024  }
 0x399   : > { %1472 = vmatmul.mubr.msk.bf16.vlgmr.msra.gmra.mrb[16].mxu1 %vm608_vm5, %v1048_v33  ;;  %v1372_v33 = vld [vmem:[%s1849_s9] ss:$0 sm:$0xff] }
 0x3f8   : > { %v677_v34 = vpop.f32.mrb[4].mxu1 }
 0x3f9   : > { %v1378_v35 = vpack.c.bf16 %v677_v34, %v677_v34  ;;  %v1437_v36 = vpop.f32.mrb[5].mxu1 }
 0x3fa   : > { %v680_v37 = vpop.f32.mrb[6].mxu1 }
 0x3fb   : > { %693 = vst.msk [vmem:[#allocation2] sm:$0xf] %vm692_vm8, %v1378_v35  ;;  %v1379_v38 = vpack.c.bf16 %v680_v37, %v680_v37  ;;  %v1438_v39 = vpop.f32.mrb[7].mxu1 }
 0x3fd   : > { %695 = vst.msk [vmem:[#allocation2 + $0x4] sm:$0x3] %vm694_vm9, %v1379_v38 }
 0x45c   : > { %v813_v40 = vpop.f32.mrb[8].mxu1 }
 0x45d   : > { %v1380_v41 = vpack.c.bf16 %v813_v40, %v813_v40  ;;  %v1449_v42 = vpop.f32.mrb[9].mxu1 }
 0x45e   : > { %v816_v43 = vpop.f32.mrb[10].mxu1 }
 0x45f   : > { %v1381_v44 = vpack.c.bf16 %v816_v43, %v816_v43  ;;  %826 = vrot.lane.b32.xlu0 %v1380_v41, %s1597_s27  ;;  %v1450_v45 = vpop.f32.mrb[11].mxu1 }
 0x461   : > { %828 = vrot.lane.b32.xlu1 %v1381_v44, %s1597_s27 }
 0x464   : > { %v952_v46 = vpop.f32.mrb[12].mxu1 }
 0x465   : > { %v1382_v48 = vpack.c.bf16 %v952_v46, %v952_v46  ;;  %v1461_v49 = vpop.f32.mrb[13].mxu1 }
 0x466   : > { %v955_v50 = vpop.f32.mrb[14].mxu1 }
 0x467   : > { %v1383_v52 = vpack.c.bf16 %v955_v50, %v955_v50  ;;  %965 = vrot.lane.b32.xlu0 %v1382_v48, %s1598_s12  ;;  %v1462_v53 = vpop.f32.mrb[15].mxu1 }
 0x469   : > { %967 = vrot.lane.b32.xlu1 %v1383_v52, %s1598_s12 }
 0x46c   : > { %v1091_v54 = vpop.f32.mrb[16].mxu1 }
 0x46d   : > { %v1384_v55 = vpack.c.bf16 %v1091_v54, %v1091_v54  ;;  %v1473_v56 = vpop.f32.mrb[17].mxu1 }
 0x46e   : > { %v1094_v57 = vpop.f32.mrb[18].mxu1 }
 0x46f   : > { %v1385_v58 = vpack.c.bf16 %v1094_v57, %v1094_v57  ;;  %1104 = vrot.lane.b32.xlu0 %v1384_v55, %s1599_s13  ;;  %v1474_v59 = vpop.f32.mrb[19].mxu1 }
 0x471   : > { %1106 = vrot.lane.b32.xlu1 %v1385_v58, %s1599_s13 }
 0x4d1   : > { %v827_v60 = vpop.permute.xlu0 %826 }
 0x4d2   : > { %833 = vst.msk [vmem:[#allocation2] sm:$0xf] %vm832_vm10, %v827_v60 }
 0x4d3   : > { %v829_v61 = vpop.permute.xlu1 %828 }
 0x4d4   : > { %835 = vst.msk [vmem:[#allocation2 + $0x4] sm:$0x3] %vm834_vm11, %v829_v61 }
 0x4d9   : > { %v966_v62 = vpop.permute.xlu0 %965 }
 0x4da   : > { %972 = vst.msk [vmem:[#allocation2] sm:$0xf] %vm971_vm12, %v966_v62 }
 0x4db   : > { %v968_v1 = vpop.permute.xlu1 %967 }
 0x4dc   : > { %974 = vst.msk [vmem:[#allocation2 + $0x4] sm:$0x3] %vm973_vm13, %v968_v1 }
 0x4e1   : > { %v1105_v63 = vpop.permute.xlu0 %1104 }
 0x4e2   : > { %1111 = vst.msk [vmem:[#allocation2] sm:$0xf] %vm1110_vm14, %v1105_v63 }
 0x4e3   : > { %v1107_v0 = vpop.permute.xlu1 %1106 }
 0x4e4   : > { %1113 = vst.msk [vmem:[#allocation2 + $0x4] sm:$0x3] %vm1112_vm15, %v1107_v0 }
 0x4eb   : > { %v1526_v2 = vld [vmem:[#allocation2] sm:$0x3f]  }
 0x4ec   : > { %1480 = vmatmul.mubr.msk.bf16.vlgmr.msra.gmra.mrb[20].mxu0 %vm435_vm1, %v1526_v2 }
 0x5bf   : > { %v1181_v4 = vpop.f32.mrb[20].mxu0 }
 0x5c0   : > { %v1182_v5 = vadd.f32 %v1366_v3, %v1181_v4  ;;  %v1481_v6 = vpop.f32.mrb[21].mxu0 }
 0x5c1   : > { %v1184_v27 = vpop.f32.mrb[22].mxu0 }
 0x5c2   : > { %v1185_v7 = vadd.f32 %v1366_v3, %v1184_v27  ;;  %v1482_v8 = vpop.f32.mrb[23].mxu0  ;;  %v1188_v11 = vadd.f32 %v1182_v5, %v1705_v9 }
 0x5c4   : > { %v1190_v12 = vsel %vm435_vm1, %v1188_v11, 0.0  ;;  %v1189_v13 = vadd.f32 %v1185_v7, %v1707_v10 }
 0x5c5   : > { %1191 = vadd.xlane.f32.xlu0 %v1190_v12 }
 0x5c6   : > { %v1194_v14 = vsel %vm1193_vm0, %v1189_v13, 0.0 }
 0x5c7   : > { %1195 = vadd.xlane.f32.xlu1 %v1194_v14 }
 0x652   : > { %v1192_v15 = vpop.xlane.xlu0 %1191 }
 0x653   : > { %v1198_v16 = vmul.f32 0.03125, %v1192_v15 }
 0x654   : > { %v1196_v17 = vpop.xlane.xlu1 %1195 }
 0x655   : > { %v1200_v18 = vsub.f32 %v1188_v11, %v1198_v16  ;;  %v1199_v19 = vmul.f32 0.03125, %v1196_v17 }
 0x657   : > { %v1201_v20 = vsub.f32 %v1189_v13, %v1199_v19  ;;  %v1202_v21 = vmul.f32 %v1200_v18, %v1200_v18 }
 0x659   : > { %v1204_v22 = vsel %vm435_vm1, %v1202_v21, 0.0  ;;  %v1203_v23 = vmul.f32 %v1201_v20, %v1201_v20 }
 0x65a   : > { %1205 = vadd.xlane.f32.xlu0 %v1204_v22 }
 0x65b   : > { %v1207_v9 = vsel %vm1193_vm0, %v1203_v23, 0.0 }
 0x65e   : > { %1208 = vadd.xlane.f32.xlu0 %v1207_v9 }
 0x6e7   : > { %v1206_v10 = vpop.xlane.xlu0 %1205 }
 0x6e8   : > { %v1210_v24 = vmul.f32 0.03125, %v1206_v10 }
 0x6ea   : > { %v1212_v25 = vadd.f32 1e-05, %v1210_v24 }
 0x6eb   : > { %v1209_v26 = vpop.xlane.xlu0 %1208 }
 0x6ec   : > { %1559 = vrsqrt.f32 %v1212_v25  ;;  %v1211_v28 = vmul.f32 0.03125, %v1209_v26 }
 0x6ee   : > { %v1213_v29 = vadd.f32 1e-05, %v1211_v28 }
 0x6f0   : > { %1561 = vrsqrt.f32 %v1213_v29 }
 0x6f6   : > { %v1560_v30 = vpop.eup %1559 }
 0x6f7   : > { %v1216_v32 = vmul.f32 %v1560_v30, %v1200_v18 }
 0x6f9   : > { %v1225_v34 = vmul.f32 %v1371_v31, %v1216_v32 }
 0x6fa   : > { %v1562_v35 = vpop.eup %1561 }
 0x6fb   : > { %v1234_v36 = vadd.f32 %v1372_v33, %v1225_v34  ;;  %v1217_v37 = vmul.f32 %v1562_v35, %v1201_v20 }
 0x6fd   : > { %1236 = vst.msk [vmem:[%s401_s26] sm:$0xff] %vm435_vm1, %v1234_v36  ;;  %v1226_v38 = vmul.f32 %v1371_v31, %v1217_v37 }
 0x6ff   : > { %v1235_v39 = vadd.f32 %v1372_v33, %v1226_v38 }
 0x701   : > { %1237 = vst.msk [vmem:[%s401_s26 + $0x8] sm:$0xf] %vm1193_vm0, %v1235_v39 }
 0x702 PF: > { %s20_s15 = sadd.s32 1, %s1585_s15   ;;  %s1851_s13 = smov %s1581_s14 }
 0x703   : > { %p17_p5 = scmp.ge.s32.totalorder %s20_s15, 4   ;;  %s1852_s14 = smov %s1854_s16 }
 0x705   :  { %19 = sbr.rel (!%p17_p5) target bundleno = 2 (0x2), region = 93 }

</bundles_post_ra>
